<compile_context>
chip_gen: v7x
topology: tpu7x:2x2x1
jax: 0.10.0
libtpu: 0.0.40
codegen_flags: <defaults>
</compile_context>

<pallas_src>
import functools

import jax
import jax.numpy as jnp
from jax.experimental import pallas as pl
from jax.experimental.pallas import tpu as pltpu

CIN = 1280        # encoder channels (fixed by the module)
CMID = 256        # hidden channels of each decoder head
CMID2 = 2 * CMID  # fused hidden width (seg + depth)
BN_EPS = 1e-5
VMEM_LIMIT = 32 * 1024 * 1024


# ---------------------------------------------------------------------------
# Kernel 1: fused seg+depth head.
#   x block:  (1, CIN, TP)      f32   (channels on sublanes, pixels on lanes;
#                                      cast to bf16 inside the kernel)
#   w1t:      (CMID2, CIN)      bf16  (BN scale already folded into the rows)
#   bias:     (CMID2, 1)        f32   (conv1 bias + BN folded)
#   w2t:      (COUT_PAD, CMID2) bf16  (block-diagonal: seg rows | depth row)
#   b2:       (COUT_PAD, 1)     f32
#   out:      (1, COUT_PAD, TP) f32
# ---------------------------------------------------------------------------
def _head_kernel(x_ref, w1t_ref, bias_ref, w2t_ref, b2_ref, o_ref):
    x = x_ref[0].astype(jnp.bfloat16)                                  # (CIN, TP)
    h = jnp.dot(w1t_ref[...], x, preferred_element_type=jnp.float32)   # (CMID2, TP)
    h = jnp.maximum(h + bias_ref[...], 0.0)                            # bias + ReLU
    o = jnp.dot(w2t_ref[...], h.astype(jnp.bfloat16),
                preferred_element_type=jnp.float32)                    # (COUT_PAD, TP)
    o_ref[0] = o + b2_ref[...]


def _pixel_tiling(hw, n_batch):
    """Lane-dense pixel tile: multiple of 256 (MXU-width friendly), up to 1024,
    keeping >= 2 total grid steps whenever possible."""
    hwp = ((hw + 255) // 256) * 256
    tp = 256
    for cand in (1024, 512):
        if hwp % cand == 0 and n_batch * (hwp // cand) >= 2:
            tp = cand
            break
    return tp, hwp


def fused_head(x_ncp, w1t, bias, w2t, b2, tp):
    """x_ncp: (N, CIN, HWp) f32.  Returns (N, COUT_PAD, HWp) f32."""
    N, _, hwp = x_ncp.shape
    cout_pad = w2t.shape[0]
    flops = 2 * N * hwp * (CIN * CMID2 + CMID2 * cout_pad)
    bytes_accessed = (x_ncp.size * 4 + w1t.size * 2 + w2t.size * 2
                      + (bias.size + b2.size) * 4 + N * cout_pad * hwp * 4)
    return pl.pallas_call(
        _head_kernel,
        out_shape=jax.ShapeDtypeStruct((N, cout_pad, hwp), jnp.float32),
        grid_spec=pltpu.PrefetchScalarGridSpec(
            num_scalar_prefetch=0,
            grid=(N, hwp // tp),
            in_specs=[
                pl.BlockSpec((1, CIN, tp), lambda n, p: (n, 0, p)),
                pl.BlockSpec((CMID2, CIN), lambda n, p: (0, 0)),
                pl.BlockSpec((CMID2, 1), lambda n, p: (0, 0)),
                pl.BlockSpec((cout_pad, CMID2), lambda n, p: (0, 0)),
                pl.BlockSpec((cout_pad, 1), lambda n, p: (0, 0)),
            ],
            out_specs=pl.BlockSpec((1, cout_pad, tp), lambda n, p: (n, 0, p)),
        ),
        compiler_params=pltpu.CompilerParams(
            dimension_semantics=("parallel", "parallel"),
            vmem_limit_bytes=VMEM_LIMIT),
        cost_estimate=pl.CostEstimate(flops=flops, transcendentals=0,
                                      bytes_accessed=bytes_accessed),
    )(x_ncp, w1t, bias, w2t, b2)


# ---------------------------------------------------------------------------
# Kernel 2: bilinear x8 upsample (align_corners=True).
# Grid (N, Hout-blocks, channel); per step: one (H,W)x(W,Wout) W-interp matmul
# and one (THO,H)x(H,Wout) H-interp matmul, stored as bf16.  seg / depth are
# separate outputs; the depth output block is resident along the (arbitrary)
# channel axis and only written at the depth step.
# ---------------------------------------------------------------------------
def _upsample_kernel(x_ref, awt_ref, ah_ref, seg_ref, dep_ref, *, num_classes):
    c = pl.program_id(2)
    x = x_ref[0, 0]                                                      # (H, W) f32
    tmp = jnp.dot(x, awt_ref[...], preferred_element_type=jnp.float32)   # (H, Wout)
    out = jnp.dot(ah_ref[...], tmp, preferred_element_type=jnp.float32)  # (THO, Wout)
    out = out.astype(seg_ref.dtype)

    @pl.when(c < num_classes)
    def _():
        seg_ref[0, 0] = out

    @pl.when(c == num_classes)
    def _():
        dep_ref[0, 0] = out


def _interp_matrix(n_out, n_in):
    """Row-interpolation matrix for bilinear align_corners=True (PyTorch)."""
    if n_in == 1:
        return jnp.ones((n_out, 1), jnp.float32)
    src = jnp.arange(n_out, dtype=jnp.float32) * (n_in - 1) / (n_out - 1)
    i0 = jnp.clip(jnp.floor(src).astype(jnp.int32), 0, n_in - 2)
    wgt = src - i0.astype(jnp.float32)
    m = jnp.zeros((n_out, n_in), jnp.float32)
    rows = jnp.arange(n_out)
    m = m.at[rows, i0].add(1.0 - wgt)
    m = m.at[rows, i0 + 1].add(wgt)
    return m


def _best_div(hout, limit):
    for t in range(min(hout, limit), 7, -1):
        if hout % t == 0 and t % 8 == 0:
            return t
    return min(hout, 8)


def _choose_hout_tile(hout, wout, n_parallel):
    """VMEM-aware Hout tile: bf16 output block capped at ~1 MiB, and >= 2
    parallel (n, h-block) steps whenever possible (v7x megacore)."""
    budget = 1 << 20
    max_rows = max(8, min(hout, (budget // (wout * 2)) // 8 * 8))
    tho = _best_div(hout, max_rows)
    if n_parallel * (hout // tho) < 2 and hout // 2 >= 8:
        tho = _best_div(hout, hout // 2)
    return tho


def bilinear_upsample8(head4d, num_classes):
    """head4d: (N, cout_pad, H, W) f32 (channels >= num_classes+1; extras are
    padding and never read).  Returns (seg, depth) in bf16."""
    N, _, H, W = head4d.shape
    Hout, Wout = 8 * H, 8 * W
    nc_out = num_classes + 1
    ah = _interp_matrix(Hout, H)          # (Hout, H)
    awt = _interp_matrix(Wout, W).T       # (W, Wout)
    tho = _choose_hout_tile(Hout, Wout, N)
    n_hb = Hout // tho

    kernel = functools.partial(_upsample_kernel, num_classes=num_classes)
    flops = 2 * N * nc_out * (n_hb * H * W * Wout + Hout * H * Wout)
    bytes_accessed = (N * nc_out * H * W * 4
                      + W * Wout * 4 + Hout * H * 4
                      + N * nc_out * Hout * Wout * 2)

    seg, dep = pl.pallas_call(
        kernel,
        out_shape=(jax.ShapeDtypeStruct((N, num_classes, Hout, Wout), jnp.bfloat16),
                   jax.ShapeDtypeStruct((N, 1, Hout, Wout), jnp.bfloat16)),
        grid_spec=pltpu.PrefetchScalarGridSpec(
            num_scalar_prefetch=0,
            grid=(N, n_hb, nc_out),
            in_specs=[
                pl.BlockSpec((1, 1, H, W), lambda n, hb, c: (n, c, 0, 0)),
                pl.BlockSpec((W, Wout), lambda n, hb, c: (0, 0)),
                pl.BlockSpec((tho, H), lambda n, hb, c: (hb, 0)),
            ],
            out_specs=(
                # seg: block index repeats at the final (depth) step so the
                # resident buffer (written at c = num_classes-1) is kept.
                pl.BlockSpec((1, 1, tho, Wout),
                             lambda n, hb, c: (n, jnp.minimum(c, num_classes - 1),
                                               hb, 0)),
                # depth: resident along the arbitrary c axis, written once.
                pl.BlockSpec((1, 1, tho, Wout), lambda n, hb, c: (n, 0, hb, 0)),
            ),
        ),
        compiler_params=pltpu.CompilerParams(
            dimension_semantics=("parallel", "parallel", "arbitrary"),
            vmem_limit_bytes=VMEM_LIMIT),
        cost_estimate=pl.CostEstimate(flops=flops, transcendentals=0,
                                      bytes_accessed=bytes_accessed),
    )(head4d, awt, ah)
    return seg, dep


# ---------------------------------------------------------------------------
# Parameter construction (deterministic, synthetic): per-head conv/BN params are
# drawn, BN(eval) is folded (scale -> w1 rows, shift -> bias), heads are fused.
# ---------------------------------------------------------------------------
def make_decoder_params(key, num_classes):
    def head_raw(k, cout):
        k1, k2, k3, k4, k5, k6, k7, k8 = jax.random.split(k, 8)
        w1 = jax.random.normal(k1, (CMID, CIN), jnp.float32) * 0.02
        b1 = jax.random.normal(k2, (CMID,), jnp.float32) * 0.02
        gamma = 1.0 + 0.1 * jax.random.normal(k3, (CMID,), jnp.float32)
        beta = 0.1 * jax.random.normal(k4, (CMID,), jnp.float32)
        mean = 0.1 * jax.random.normal(k5, (CMID,), jnp.float32)
        var = jnp.abs(jax.random.normal(k6, (CMID,), jnp.float32)) + 0.5
        w2 = jax.random.normal(k7, (cout, CMID), jnp.float32) * 0.05
        b2 = jax.random.normal(k8, (cout,), jnp.float32) * 0.05
        sg = gamma / jnp.sqrt(var + BN_EPS)           # fold conv1 bias + BN(eval)
        return w1, sg, (b1 - mean) * sg + beta, w2, b2

    kseg, kdep = jax.random.split(key)
    w1_s, sc_s, bi_s, w2_s, b2_s = head_raw(kseg, num_classes)
    w1_d, sc_d, bi_d, w2_d, b2_d = head_raw(kdep, 1)

    cout = num_classes + 1
    cout_pad = max(8, ((cout + 7) // 8) * 8)          # pad channel (sublane) dim

    w1 = jnp.concatenate([w1_s, w1_d], axis=0)                         # (CMID2, CIN)
    scale = jnp.concatenate([sc_s, sc_d]).reshape(CMID2, 1)
    bias = jnp.concatenate([bi_s, bi_d]).reshape(CMID2, 1)
    w1f = w1 * scale                                  # fold BN scale into w1 rows
    w2t = jnp.zeros((cout_pad, CMID2), jnp.float32)                    # block-diagonal
    w2t = w2t.at[:num_classes, :CMID].set(w2_s)
    w2t = w2t.at[num_classes:cout, CMID:].set(w2_d)
    b2 = jnp.zeros((cout_pad, 1), jnp.float32)
    b2 = b2.at[:num_classes, 0].set(b2_s)
    b2 = b2.at[num_classes:cout, 0].set(b2_d)

    return dict(num_classes=num_classes,
                w1t=w1f.astype(jnp.bfloat16), bias=bias,
                w2t=w2t.astype(jnp.bfloat16), b2=b2)


# ---------------------------------------------------------------------------
# Forward glue (2 pallas_calls; only free reshapes between them in the common
# case where H*W is a multiple of 256).
# ---------------------------------------------------------------------------
def decoder_forward(encoder_output, params):
    num_classes = params["num_classes"]
    N, C, H, W = encoder_output.shape
    hw = H * W
    tp, hwp = _pixel_tiling(hw, N)
    x = encoder_output.reshape(N, C, hw)             # layout-preserving (free)
    if hwp != hw:
        x = jnp.pad(x, ((0, 0), (0, 0), (0, hwp - hw)))
    head = fused_head(x, params["w1t"], params["bias"],
                      params["w2t"], params["b2"], tp)   # (N, cout_pad, hwp) f32
    if hwp != hw:
        head = head[:, :, :hw]                       # small copy only when padded
    head4d = head.reshape(N, -1, H, W)               # free reshape (split last dim)
    seg, depth = bilinear_upsample8(head4d, num_classes)
    return seg, depth
# TODO(synk): context_forward (3x3-conv context decoder) is not part of forward()
# and is not implemented here.


# ---------------------------------------------------------------------------
# Pure-JAX reference of the same math (matching bf16 operand quantization)
# ---------------------------------------------------------------------------
def _ref_decoder(encoder_output, params):
    num_classes = params["num_classes"]
    nc_out = num_classes + 1
    N, C, H, W = encoder_output.shape
    hp = jax.lax.Precision.HIGHEST
    x = encoder_output.reshape(N, C, H * W).astype(jnp.bfloat16).astype(jnp.float32)
    w1 = params["w1t"].astype(jnp.float32)           # scale already folded in
    h = jnp.einsum("oc,ncp->nop", w1, x, precision=hp)
    h = jnp.maximum(h + params["bias"][None], 0.0)
    hq = h.astype(jnp.bfloat16).astype(jnp.float32)
    w2 = params["w2t"].astype(jnp.float32)
    o = jnp.einsum("oc,ncp->nop", w2, hq, precision=hp) + params["b2"][None]
    o = o[:, :nc_out].reshape(N, nc_out, H, W)
    ah = _interp_matrix(8 * H, H)
    aw = _interp_matrix(8 * W, W)
    up = jnp.einsum("oh,nchw,pw->ncop", ah, o, aw, precision=hp)
    return up[:, :num_classes], up[:, num_classes:]


if __name__ == "__main__":
    num_classes = 8
    N, H, W = 2, 16, 16

    key = jax.random.PRNGKey(0)
    kx, kp = jax.random.split(key)
    encoder_output = jax.random.normal(kx, (N, CIN, H, W), jnp.float32)
    params = make_decoder_params(kp, num_classes)

    fwd = jax.jit(lambda enc: decoder_forward(enc, params))
    seg_out, depth_out = fwd(encoder_output)
    seg_out = jax.block_until_ready(seg_out)
    depth_out = jax.block_until_ready(depth_out)

    assert seg_out.shape == (N, num_classes, 8 * H, 8 * W)
    assert depth_out.shape == (N, 1, 8 * H, 8 * W)

    # correctness check against a pure-JAX reference of the same formulas
    seg_ref, depth_ref = _ref_decoder(encoder_output, params)
    assert jnp.allclose(seg_out.astype(jnp.float32), seg_ref, atol=2e-2, rtol=2e-2)
    assert jnp.allclose(depth_out.astype(jnp.float32), depth_ref, atol=2e-2, rtol=2e-2)

    print("KERNEL_OK")
</pallas_src>

<mosaic_0001>
module attributes {stable_mosaic.version = 11 : i64} {
  func.func private @main(%arg0: i32) attributes {dimension_semantics = [#tpu.dimension_semantics<core_parallel>], iteration_bounds = array<i64: 2>, tpu.core_type = #tpu.core_type<sc_scalar_subcore>, window_params = []} {
    return
  }
}

module attributes {stable_mosaic.version = 11 : i64} {
  func.func private @main(%arg0: i32) attributes {dimension_semantics = [#tpu.dimension_semantics<core_parallel>], iteration_bounds = array<i64: 2>, tpu.core_type = #tpu.core_type<sc_scalar_subcore>, window_params = []} {
    return
  }
}

module attributes {stable_mosaic.version = 11 : i64} {
  func.func @_head_kernel(%arg0: i32, %arg1: i32, %arg2: memref<1x1280x256xf32, #tpu.memory_space<vmem>>, %arg3: memref<512x1280xbf16, #tpu.memory_space<vmem>>, %arg4: memref<512x1xf32, #tpu.memory_space<vmem>>, %arg5: memref<16x512xbf16, #tpu.memory_space<vmem>>, %arg6: memref<16x1xf32, #tpu.memory_space<vmem>>, %arg7: memref<1x16x256xf32, #tpu.memory_space<vmem>>) attributes {dimension_semantics = [#tpu.dimension_semantics<parallel>, #tpu.dimension_semantics<parallel>], iteration_bounds = array<i64: 2, 1>, scalar_prefetch = 0 : i64, scratch_operands = 0 : i64, tpu.core_type = #tpu.core_type<tc>, window_params = [{transform_indices = @transform_0, window_bounds = array<i64: 1, 1280, 256>}, {pipeline_mode = #tpu.pipeline_mode<synchronous>, transform_indices = @transform_1, window_bounds = array<i64: 512, 1280>}, {pipeline_mode = #tpu.pipeline_mode<synchronous>, transform_indices = @transform_2, window_bounds = array<i64: 512, 1>}, {pipeline_mode = #tpu.pipeline_mode<synchronous>, transform_indices = @transform_3, window_bounds = array<i64: 16, 512>}, {pipeline_mode = #tpu.pipeline_mode<synchronous>, transform_indices = @transform_4, window_bounds = array<i64: 16, 1>}, {transform_indices = @transform_5, window_bounds = array<i64: 1, 16, 256>}]} {
    %c0 = arith.constant 0 : index
    %c0_0 = arith.constant 0 : index
    %c0_1 = arith.constant 0 : index
    %0 = vector.load %arg2[%c0, %c0_0, %c0_1] : memref<1x1280x256xf32, #tpu.memory_space<vmem>>, vector<1x1280x256xf32>
    %1 = vector.shape_cast %0 : vector<1x1280x256xf32> to vector<1280x256xf32>
    %2 = arith.truncf %1 : vector<1280x256xf32> to vector<1280x256xbf16>
    %c0_2 = arith.constant 0 : index
    %c0_3 = arith.constant 0 : index
    %3 = vector.load %arg3[%c0_2, %c0_3] : memref<512x1280xbf16, #tpu.memory_space<vmem>>, vector<512x1280xbf16>
    %cst = arith.constant dense<0.000000e+00> : vector<512x256xf32>
    %4 = tpu.matmul %3, %2, %cst {dimension_numbers = #tpu.dot_dimension_numbers<[1], [0], [0], [1], [0, 0, 1, 1], [], []>} : vector<512x1280xbf16>, vector<1280x256xbf16>, vector<512x256xf32> -> vector<512x256xf32>
    %c0_4 = arith.constant 0 : index
    %c0_5 = arith.constant 0 : index
    %5 = vector.load %arg4[%c0_4, %c0_5] : memref<512x1xf32, #tpu.memory_space<vmem>>, vector<512x1xf32>
    %6 = vector.broadcast %5 : vector<512x1xf32> to vector<512x256xf32>
    %7 = arith.addf %4, %6 : vector<512x256xf32>
    %cst_6 = arith.constant 0.000000e+00 : f32
    %8 = vector.broadcast %cst_6 : f32 to vector<512x256xf32>
    %9 = arith.maximumf %7, %8 : vector<512x256xf32>
    %c0_7 = arith.constant 0 : index
    %c0_8 = arith.constant 0 : index
    %10 = vector.load %arg5[%c0_7, %c0_8] : memref<16x512xbf16, #tpu.memory_space<vmem>>, vector<16x512xbf16>
    %11 = arith.truncf %9 : vector<512x256xf32> to vector<512x256xbf16>
    %cst_9 = arith.constant dense<0.000000e+00> : vector<16x256xf32>
    %12 = tpu.matmul %10, %11, %cst_9 {dimension_numbers = #tpu.dot_dimension_numbers<[1], [0], [0], [1], [0, 0, 1, 1], [], []>} : vector<16x512xbf16>, vector<512x256xbf16>, vector<16x256xf32> -> vector<16x256xf32>
    %c0_10 = arith.constant 0 : index
    %c0_11 = arith.constant 0 : index
    %13 = vector.load %arg6[%c0_10, %c0_11] : memref<16x1xf32, #tpu.memory_space<vmem>>, vector<16x1xf32>
    %14 = vector.broadcast %13 : vector<16x1xf32> to vector<16x256xf32>
    %15 = arith.addf %12, %14 : vector<16x256xf32>
    %c0_12 = arith.constant 0 : index
    %c0_13 = arith.constant 0 : index
    %c0_14 = arith.constant 0 : index
    %16 = vector.load %arg7[%c0_12, %c0_13, %c0_14] : memref<1x16x256xf32, #tpu.memory_space<vmem>>, vector<1x16x256xf32>
    %17 = vector.shape_cast %16 : vector<1x16x256xf32> to vector<16x256xf32>
    %18 = vector.shape_cast %15 : vector<16x256xf32> to vector<1x16x256xf32>
    tpu.vector_store %arg7[%c0_12, %c0_13, %c0_14], %18 {strides = array<i32>} : memref<1x16x256xf32, #tpu.memory_space<vmem>>, vector<1x16x256xf32>,
    return
  }
  func.func @transform_0(%arg0: i32, %arg1: i32) -> (i32, i32, i32) {
    %c0_i32 = arith.constant 0 : i32
    %c0_i32_0 = arith.constant 0 : i32
    return %arg0, %c0_i32, %arg1 : i32, i32, i32
  }
  func.func @transform_1(%arg0: i32, %arg1: i32) -> (i32, i32) {
    %c0_i32 = arith.constant 0 : i32
    %c0_i32_0 = arith.constant 0 : i32
    %c0_i32_1 = arith.constant 0 : i32
    return %c0_i32, %c0_i32_0 : i32, i32
  }
  func.func @transform_2(%arg0: i32, %arg1: i32) -> (i32, i32) {
    %c0_i32 = arith.constant 0 : i32
    %c0_i32_0 = arith.constant 0 : i32
    %c0_i32_1 = arith.constant 0 : i32
    return %c0_i32, %c0_i32_0 : i32, i32
  }
  func.func @transform_3(%arg0: i32, %arg1: i32) -> (i32, i32) {
    %c0_i32 = arith.constant 0 : i32
    %c0_i32_0 = arith.constant 0 : i32
    %c0_i32_1 = arith.constant 0 : i32
    return %c0_i32, %c0_i32_0 : i32, i32
  }
  func.func @transform_4(%arg0: i32, %arg1: i32) -> (i32, i32) {
    %c0_i32 = arith.constant 0 : i32
    %c0_i32_0 = arith.constant 0 : i32
    %c0_i32_1 = arith.constant 0 : i32
    return %c0_i32, %c0_i32_0 : i32, i32
  }
  func.func @transform_5(%arg0: i32, %arg1: i32) -> (i32, i32, i32) {
    %c0_i32 = arith.constant 0 : i32
    %c0_i32_0 = arith.constant 0 : i32
    return %arg0, %c0_i32, %arg1 : i32, i32, i32
  }
}

module attributes {stable_mosaic.version = 11 : i64} {
  func.func @_upsample_kernel(%arg0: i32, %arg1: i32, %arg2: i32, %arg3: memref<1x1x16x16xf32, #tpu.memory_space<vmem>>, %arg4: memref<16x128xf32, #tpu.memory_space<vmem>>, %arg5: memref<128x16xf32, #tpu.memory_space<vmem>>, %arg6: memref<1x1x128x128xbf16, #tpu.memory_space<vmem>>, %arg7: memref<1x1x128x128xbf16, #tpu.memory_space<vmem>>) attributes {dimension_semantics = [#tpu.dimension_semantics<parallel>, #tpu.dimension_semantics<parallel>, #tpu.dimension_semantics<arbitrary>], iteration_bounds = array<i64: 2, 1, 9>, scalar_prefetch = 0 : i64, scratch_operands = 0 : i64, tpu.core_type = #tpu.core_type<tc>, window_params = [{transform_indices = @transform_0, window_bounds = array<i64: 1, 1, 16, 16>}, {pipeline_mode = #tpu.pipeline_mode<synchronous>, transform_indices = @transform_1, window_bounds = array<i64: 16, 128>}, {transform_indices = @transform_2, window_bounds = array<i64: 128, 16>}, {transform_indices = @transform_3, window_bounds = array<i64: 1, 1, 128, 128>}, {transform_indices = @transform_4, window_bounds = array<i64: 1, 1, 128, 128>}]} {
    %c0 = arith.constant 0 : index
    %c0_0 = arith.constant 0 : index
    %c0_1 = arith.constant 0 : index
    %c0_2 = arith.constant 0 : index
    %0 = vector.load %arg3[%c0, %c0_0, %c0_1, %c0_2] : memref<1x1x16x16xf32, #tpu.memory_space<vmem>>, vector<1x1x16x16xf32>
    %1 = vector.shape_cast %0 : vector<1x1x16x16xf32> to vector<16x16xf32>
    %c0_3 = arith.constant 0 : index
    %c0_4 = arith.constant 0 : index
    %2 = vector.load %arg4[%c0_3, %c0_4] : memref<16x128xf32, #tpu.memory_space<vmem>>, vector<16x128xf32>
    %cst = arith.constant dense<0.000000e+00> : vector<16x128xf32>
    %3 = tpu.matmul %1, %2, %cst {dimension_numbers = #tpu.dot_dimension_numbers<[1], [0], [0], [1], [0, 0, 1, 1], [], []>} : vector<16x16xf32>, vector<16x128xf32>, vector<16x128xf32> -> vector<16x128xf32>
    %c0_5 = arith.constant 0 : index
    %c0_6 = arith.constant 0 : index
    %4 = vector.load %arg5[%c0_5, %c0_6] : memref<128x16xf32, #tpu.memory_space<vmem>>, vector<128x16xf32>
    %cst_7 = arith.constant dense<0.000000e+00> : vector<128x128xf32>
    %5 = tpu.matmul %4, %3, %cst_7 {dimension_numbers = #tpu.dot_dimension_numbers<[1], [0], [0], [1], [0, 0, 1, 1], [], []>} : vector<128x16xf32>, vector<16x128xf32>, vector<128x128xf32> -> vector<128x128xf32>
    %6 = arith.truncf %5 : vector<128x128xf32> to vector<128x128xbf16>
    %c8_i32 = arith.constant 8 : i32
    %7 = arith.cmpi slt, %arg2, %c8_i32 : i32
    %8 = arith.extui %7 : i1 to i32
    %c0_i32 = arith.constant 0 : i32
    %9 = arith.cmpi ne, %8, %c0_i32 : i32
    scf.if %9 {
      %c0_10 = arith.constant 0 : index
      %c0_11 = arith.constant 0 : index
      %c0_12 = arith.constant 0 : index
      %c0_13 = arith.constant 0 : index
      %13 = vector.load %arg6[%c0_10, %c0_11, %c0_12, %c0_13] : memref<1x1x128x128xbf16, #tpu.memory_space<vmem>>, vector<1x1x128x128xbf16>
      %14 = vector.shape_cast %13 : vector<1x1x128x128xbf16> to vector<128x128xbf16>
      %15 = vector.shape_cast %6 : vector<128x128xbf16> to vector<1x1x128x128xbf16>
      tpu.vector_store %arg6[%c0_10, %c0_11, %c0_12, %c0_13], %15 {strides = array<i32>} : memref<1x1x128x128xbf16, #tpu.memory_space<vmem>>, vector<1x1x128x128xbf16>,
    } else {
    }
    %c8_i32_8 = arith.constant 8 : i32
    %10 = arith.cmpi eq, %arg2, %c8_i32_8 : i32
    %11 = arith.extui %10 : i1 to i32
    %c0_i32_9 = arith.constant 0 : i32
    %12 = arith.cmpi ne, %11, %c0_i32_9 : i32
    scf.if %12 {
      %c0_10 = arith.constant 0 : index
      %c0_11 = arith.constant 0 : index
      %c0_12 = arith.constant 0 : index
      %c0_13 = arith.constant 0 : index
      %13 = vector.load %arg7[%c0_10, %c0_11, %c0_12, %c0_13] : memref<1x1x128x128xbf16, #tpu.memory_space<vmem>>, vector<1x1x128x128xbf16>
      %14 = vector.shape_cast %13 : vector<1x1x128x128xbf16> to vector<128x128xbf16>
      %15 = vector.shape_cast %6 : vector<128x128xbf16> to vector<1x1x128x128xbf16>
      tpu.vector_store %arg7[%c0_10, %c0_11, %c0_12, %c0_13], %15 {strides = array<i32>} : memref<1x1x128x128xbf16, #tpu.memory_space<vmem>>, vector<1x1x128x128xbf16>,
    } else {
    }
    return
  }
  func.func @transform_0(%arg0: i32, %arg1: i32, %arg2: i32) -> (i32, i32, i32, i32) {
    %c0_i32 = arith.constant 0 : i32
    %c0_i32_0 = arith.constant 0 : i32
    %c0_i32_1 = arith.constant 0 : i32
    return %arg0, %arg2, %c0_i32, %c0_i32_0 : i32, i32, i32, i32
  }
  func.func @transform_1(%arg0: i32, %arg1: i32, %arg2: i32) -> (i32, i32) {
    %c0_i32 = arith.constant 0 : i32
    %c0_i32_0 = arith.constant 0 : i32
    %c0_i32_1 = arith.constant 0 : i32
    return %c0_i32, %c0_i32_0 : i32, i32
  }
  func.func @transform_2(%arg0: i32, %arg1: i32, %arg2: i32) -> (i32, i32) {
    %c0_i32 = arith.constant 0 : i32
    %c0_i32_0 = arith.constant 0 : i32
    return %arg1, %c0_i32 : i32, i32
  }
  func.func @transform_3(%arg0: i32, %arg1: i32, %arg2: i32) -> (i32, i32, i32, i32) {
    %c7_i32 = arith.constant 7 : i32
    %0 = arith.minsi %arg2, %c7_i32 : i32
    %c0_i32 = arith.constant 0 : i32
    %c0_i32_0 = arith.constant 0 : i32
    return %arg0, %0, %arg1, %c0_i32 : i32, i32, i32, i32
  }
  func.func @transform_4(%arg0: i32, %arg1: i32, %arg2: i32) -> (i32, i32, i32, i32) {
    %c0_i32 = arith.constant 0 : i32
    %c0_i32_0 = arith.constant 0 : i32
    %c0_i32_1 = arith.constant 0 : i32
    return %arg0, %c0_i32, %arg1, %c0_i32_0 : i32, i32, i32, i32
  }
}

</mosaic_0001>

<bundles_post_ra>
// kernel: _lambda_.3
= control target key start
LH: loop header
LB: loop body
LE: loop exit
PB: predicated region body
PF: predicated region fallthrough
CT: control target
= control target key end

     0   :  { %s1927_s0 = inlined_call_operand.vmem [shape: f32[2,16,16,16], index: 0, kind: input, shape index: {}]   ;;  %s1928_s1 = inlined_call_operand.hbm [shape: f32[16,128], index: 1, kind: input, shape index: {}]   ;;  %s1929_s2 = inlined_call_operand.vmem [shape: f32[128,16], index: 2, kind: input, shape index: {}]   ;;  %s1930_s3 = inlined_call_operand.hbm [shape: bf16[2,8,128,128], index: 3, kind: output, shape index: {0}]   ;;  %s1931_s4 = inlined_call_operand.hbm [shape: bf16[2,1,128,128], index: 4, kind: output, shape index: {1}]  }
   0x1   :  { %1945 = sst [smem:[#allocation17_spill]] %s1927_s0 }
   0x2   :  { %1946 = sst [smem:[#allocation18_spill]] %s1928_s1 }
   0x3   :  { %1947 = sst [smem:[#allocation19_spill]] %s1929_s2 }
   0x4   :  { %10 = vsyncpa [#allocation3], 0 }
   0x5   :  { %11 = vsyncpa [#allocation4], 0 }
   0x6   :  { %13 = vsyncpa [#allocation4 + $0x1], 0 }
   0x7   :  { %14 = vsyncpa [#allocation7], 0 }
   0x8   :  { %16 = vsyncpa [#allocation7 + $0x1], 0  ;;  %s1540_s15 = smov 0   ;;  %s1542_s16 = smov 0  }
   0x9   :  { %s1544_s17 = smov 0   ;;  %s1546_s18 = smov 0  }
   0xa   :  { %s1548_s19 = smov 0   ;;  %s1550_s20 = smov 0  }
   0xb   :  { %s1552_s21 = smov 0   ;;  %s1554_s22 = smov 0  }
   0xc   :  { %s1556_s23 = smov 0   ;;  %s1558_s24 = smov 0  }
   0xd   :  { %s1560_s25 = smov 0  }
   0xe LB: > { %1948 = sst [smem:[#allocation11_spill]] %s1486_s20  ;;  %s1932_s26 = sadd.s32 4294967295, %s1506_s25   ;;  %s1506_s25 = sphi %s1560_s25, %s22_s25   ;;  %s1502_s24 = sphi %s1558_s24, %s1980_s24   ;;  %s1498_s23 = sphi %s1556_s23, %s1979_s23   ;;  %s1494_s22 = sphi %s1554_s22, %s1978_s22   ;;  %s1490_s21 = sphi %s1552_s21, %s1977_s21   ;;  %s1486_s20 = sphi %s1550_s20, %s1976_s20   ;;  %s1482_s19 = sphi %s1548_s19, %s1985_s19   ;;  %s1478_s18 = sphi %s1546_s18, %s1984_s18   ;;  %s1474_s17 = sphi %s1544_s17, %s1983_s17   ;;  %s1470_s16 = sphi %s1542_s16, %s1982_s16   ;;  %s1466_s15 = sphi %s1540_s15, %s1981_s15  }
   0xf   : > { %1949 = sst [smem:[#allocation12_spill]] %s1498_s23  ;;  %s942_s27 = sadd.s32 4294967294, %s1506_s25  }
  0x10   : > { %1950 = sst [smem:[#allocation13_spill]] %s1502_s24  ;;  %s34_s28 = sadd.s32 1, %s1498_s23 }
  0x11   : > { %s41_s29 = sadd.s32 1, %s1502_s24  ;;  %p35_p0 = scmp.ge.s32.totalorder %s34_s28, 9 }
  0x12   : > { %p120_p1 = scmp.lt.s32.totalorder %s1498_s23, 7  ;;  %s131_s30 = sadd.s32 1, %s1486_s20 }
  0x13   : > { %p141_p2 = scmp.ne.s32.totalorder %s1486_s20, %s1482_s19  ;;  %s1987_s28 = smov (%p35_p0, %s34_s28), 0 }
  0x14   : > { %1951 = sst [smem:[#allocation14_spill]] %s1987_s28  ;;  %s1989_s29 = smov (!%p35_p0, %s41_s29), %s1502_s24 }
  0x15   : > { %s121_s5 = scalar_select %p120_p1, %s1498_s23, 7 }
  0x16   : > { %p43_p3 = scmp.ge.s32.totalorder %s1989_s29, 2  ;;  %p122_p4 = scmp.lt.s32.totalorder %s1987_s28, 7 }
  0x17   : > { %p1610_p5 = scmp.eq.s32.totalorder %s1932_s26, 17  ;;  %p147_p6 = scmp.ne.s32.totalorder %s1482_s19, %s1478_s18 }
  0x18   : > { %s1991_s29 = smov (%p43_p3, %s1989_s29), 0  ;;  %p1627_p8 = scmp.eq.s32.totalorder %s942_s27, 17 }
  0x19   : > { %1953 = sst [smem:[#allocation15_spill]] %s1991_s29  ;;  %s124_s8 = ssub.s32 %s1502_s24, %s1991_s29 }
  0x1a   : > { %s123_s7 = scalar_select %p122_p4, %s1987_s28, 7 }
  0x1b   : > { %p1623_p7 = por %p1610_p5, %p141_p2  ;;  %p157_p9 = scmp.eq.s32.totalorder %s124_s8, 0 }
  0x1c   : > { %s125_s10 = ssub.s32 %s121_s5, %s123_s7  ;;  %p1633_p11 = por %p1627_p8, %p147_p6 }
  0x1d   : > { %s1954_s9 = scalar_select %p1623_p7, 1, 0 }
  0x1e   : > { %s126_s12 = sor.u32 %s125_s10, %s124_s8  ;;  %s159_s14 = sadd.s32 1, %s1474_s17 }
  0x1f   : > { %p129_p10 = scmp.eq.s32.totalorder %s126_s12, 0  ;;  %p169_p12 = scmp.ne.s32.totalorder %s1474_s17, %s1470_s16 }
  0x20   : > { %s1956_s13 = scalar_select %p1633_p11, 1, 0 }
  0x21   : > { %s1641_s26 = scalar_select %p129_p10, %s1486_s20, %s131_s30  }
  0x22   : > { %s1644_s5 = scalar_select %p157_p9, %s1474_s17, %s159_s14  }
  0x23   : > { %1957 = sst [smem:[#allocation16_spill]] %s1641_s26  ;;  %p1648_p13 = por %p169_p12, %p1610_p5 }
  0x24   : > { %p175_p0 = scmp.ne.s32.totalorder %s1470_s16, %s1466_s15  ;;  %p943_p1 = scmp.ge.s32.totalorder %s1506_s25, 1 }
  0x25   : > { %s1958_s27 = scalar_select %p1648_p13, 1, 0 }
  0x26   : > { %p183_p2 = scmp.lt.s32.totalorder %s1506_s25, 19  ;;  %p1658_p3 = por %p175_p0, %p1627_p8 }
  0x27   : > { %s1961_s30 = sadd.s32 4294967295, %s1506_s25   ;;  %s1508_s10 = smov [#allocation2]  }
  0x28   : > { %s1959_s7 = scalar_select %p1658_p3, 1, 0 }
  0x29   : > { %p1662_p4 = pnand %p943_p1, %p183_p2  ;;  %p1668_p6 = scmp.eq.s32.totalorder %s1961_s30, 0 }
  0x2a   : > { %s195_s12 = sshll.u32 %s1508_s10, 4  ;;  %s1964_s1 = sld [smem:[#allocation18_spill]]  ;;  %s196_s12 = int_to_ptr.vmem [resolvable:$true] %s195_s12 }
  0x2b   : > { %s1960_s8 = scalar_select %p1662_p4, 1, 0 }
  0x2c   : > { %s1962_s6 = scalar_select %p1668_p6, 1, 0 }
  0x2d   : > { %p1217_p5 = pneg %p1662_p4 }
  0x2f   : > { %p1676_p8 = pnand %p1668_p6, %p1217_p5 }
  0x30   : > { %s1324_s28 = scalar_lea.hbm %s1964_s1, 256 }
  0x31   : > { %p1325_p9 = scmp.ne.s32.totalorder %s1964_s1, %s1324_s28  ;;  %p1326_p10 = pneg %p1676_p8 }
  0x32   : > { %p1331_p1 = scmp.lt.u32.totalorder %s1324_s28, %s1964_s1 }
  0x33   : > { %p1327_p12 = pnand %p1326_p10, %p1325_p9 }
  0x35   : > { %p1328_p0 = pneg %p1327_p12 }
  0x37   : > { %p1333_p2 = pnand %p1331_p1, %p1328_p0 }
  0x39   : > { %1336 = shalt.err (!%p1333_p2)
}
  0x3a   : > { %s1337_s26 = scalar_lea.vmem %s196_s12, 256  ;;  %p1345_p13 = scmp.lt.s32.totalorder %s196_s12, %s196_s12 }
  0x3b   : > { %p1338_p5 = scmp.ne.s32.totalorder %s196_s12, %s1337_s26  ;;  %p1346_p7 = scmp.lt.s32.totalorder %s1337_s26, %s1337_s26 }
  0x3d   : > { %p1340_p3 = pnand %p1338_p5, %p1326_p10  ;;  %p1347_p6 = por %p1346_p7, %p1345_p13 }
  0x3f   : > { %p1341_p11 = pneg %p1340_p3 }
  0x41   : > { %p1348_p4 = pnand %p1347_p6, %p1341_p11 }
  0x43   : > { %1351 = shalt.err (!%p1348_p4)
}
  0x44   : > { %s1509_s24 = smov 128   ;;  %s1510_s29 = smov 8  }
  0x45   : > { %1220 = dma.hbm_to_vmem [thread:$0]  (!%p1676_p8), %s1964_s1, 256, %s196_s12, [#allocation3], %s1509_s24, %s1509_s24, %s1510_s29  }
  0x46   : > { %p1965_p9 = scmp.ne.s32.totalorder %s1960_s8, 0 }
  0x47   : > { %p1966_p12 = scmp.ne.s32.totalorder (!%p1965_p9), %s1962_s6, 0 }
  0x48   : > { %232 = sbr.rel (%p1965_p9) target bundleno = 608 (0x260), region = 32 }
  0x4f   : > { %1453 = dma.done.wait (%p1966_p12), [#allocation3], 256  }
  0x50   : > { %1455 = vsyncadd (%p1966_p12), [#allocation3], 4294967040  ;;  %s1942_s23 = sand.u32 1, %s1482_s19   ;;  %s1943_s26 = sand.u32 1, %s1470_s16   ;;  %v293_v0 = vld [vmem:[#allocation2] sm:$0xff]  ;;  %v294_v1 = vld [vmem:[#allocation2 + $0x8] sm:$0xff] }
  0x51   : > { %s1706_s28 = sshll.u32 %s1942_s23, 6  ;;  %s1710_s8 = sshll.u32 %s1943_s26, 6  ;;  %v1199_v2 = vpack.c.bf16 %v294_v1, %v293_v0  ;;  %vm295_vm0 = vcmask 130048  }
  0x52   : > { %p272_p7 = scmp.lt.s32.totalorder %s1494_s22, 1  ;;  %p274_p11 = scmp.lt.s32.totalorder %s1490_s21, 15 }
  0x53   : > { %1200 = vmatprep.subr.bf16.mxu0 %v1199_v2  ;;  %s1967_s0 = sld [smem:[#allocation17_spill]]  ;;  %s1968_s2 = sld [smem:[#allocation19_spill]] }
  0x54   : > { %s273_s6 = scalar_select %p272_p7, %s1494_s22, 1  ;;  %1202 = vmatpush3.bf16.msra.mxu0 %v1199_v2 }
  0x55   : > { %s275_s12 = scalar_select %p274_p11, %s1490_s21, 15 }
  0x56   : > { %s952_s11 = sshll.u32 %s273_s6, 5  ;;  %s1789_s14 = scalar_lea.vmem [#allocation6], %s1710_s8 }
  0x57   : > { %s951_s10 = sshll.u32 %s275_s12, 1  ;;  %p972_p13 = scmp.ge.s32.totalorder %s1490_s21, 8 }
  0x58   : > { %s278_s24 = sadd.s32 %s952_s11, %s951_s10 }
  0x59   : > { %s953_s29 = sshll.u32 %s278_s24, 3  ;;  %v383_v5 = vld [vmem:[%s1968_s2 + $0x30] sm:$0xff]  ;;  %v377_v6 = vld [vmem:[%s1968_s2] sm:$0xff]  ;;  %v384_v10 = vld [vmem:[%s1968_s2 + $0x38] sm:$0xff] }
  0x5a   : > { %s280_s23 = scalar_lea.vmem %s1967_s0, %s953_s29  ;;  %1184 = vmatprep.mubr.msk.f32.mxu1 %vm295_vm0, %v383_v5  ;;  %v378_v11 = vld [vmem:[%s1968_s2 + $0x8] sm:$0xff]  ;;  %v385_v12 = vld [vmem:[%s1968_s2 + $0x40] sm:$0xff]  ;;  %v379_v13 = vld [vmem:[%s1968_s2 + $0x10] sm:$0xff]  ;;  %s1786_s29 = scalar_lea.vmem [#allocation5], %s1706_s28 }
  0x5b   : > { %v291_v3 = vld [vmem:[%s280_s23] sm:$0xff]  ;;  %v292_v4 = vld [vmem:[%s280_s23 + $0x8] sm:$0xff]  ;;  %v380_v15 = vld [vmem:[%s1968_s2 + $0x18] sm:$0xff] }
  0x5c   : > { %1168 = vmatprep.mubr.msk.f32.mxu0 %vm295_vm0, %v291_v3  ;;  %v386_v14 = vld [vmem:[%s1968_s2 + $0x48] sm:$0xff]  ;;  %v387_v16 = vld [vmem:[%s1968_s2 + $0x50] sm:$0xff]  ;;  %v381_v17 = vld [vmem:[%s1968_s2 + $0x20] sm:$0xff] }
  0x5d   : > { %1169 = vmatmul.mubr.msk.f32.vlgmr.msra.gmra.mrb[0].mxu0 %vm295_vm0, %v292_v4  ;;  %v388_v18 = vld [vmem:[%s1968_s2 + $0x58] sm:$0xff]  ;;  %v382_v19 = vld [vmem:[%s1968_s2 + $0x28] sm:$0xff]  ;;  %v389_v20 = vld [vmem:[%s1968_s2 + $0x60] sm:$0xff] }
  0x5e   : > { %1175 = vmatprep.mubr.msk.f32.mxu0 %vm295_vm0, %v377_v6  ;;  %v390_v21 = vld [vmem:[%s1968_s2 + $0x68] sm:$0xff]  ;;  %v391_v22 = vld [vmem:[%s1968_s2 + $0x70] sm:$0xff]  ;;  %v392_v23 = vld [vmem:[%s1968_s2 + $0x78] sm:$0xff] }
 0x130   : > { %v1170_v7 = vpop.f32.mrb[0].mxu0 }
 0x131   : > { %v368_v8 = vpop.f32.mrb[1].mxu0 }
 0x132   : > { %v1203_v9 = vpack.c.bf16 %v1170_v7, %v368_v8 }
 0x134   : > { %1204 = vmatprep.subr.bf16.mxu0 %v1203_v9  ;;  %1207 = vmatprep.subr.bf16.mxu1 %v1203_v9 }
 0x135   : > { %1206 = vmatpush3.bf16.msra.mxu0 %v1203_v9  ;;  %1208 = vmatpush3.bf16.msra.mxu1 %v1203_v9 }
 0x138   : > { %1185 = vmatmul.mubr.msk.f32.vlgmr.msra.gmra.mrb[0].mxu1 %vm295_vm0, %v384_v10  ;;  %1176 = vmatmul.mubr.msk.f32.vlgmr.msra.gmra.mrb[2].mxu0 %vm295_vm0, %v378_v11 }
 0x139   : > { %1187 = vmatprep.mubr.msk.f32.mxu1 %vm295_vm0, %v385_v12  ;;  %1178 = vmatprep.mubr.msk.f32.mxu0 %vm295_vm0, %v379_v13 }
 0x13c   : > { %1188 = vmatmul.mubr.msk.f32.gmra.mrb[2].mxu1 %vm295_vm0, %v386_v14  ;;  %1179 = vmatmul.mubr.msk.f32.gmra.mrb[4].mxu0 %vm295_vm0, %v380_v15 }
 0x13d   : > { %1190 = vmatprep.mubr.msk.f32.mxu1 %vm295_vm0, %v387_v16  ;;  %1181 = vmatprep.mubr.msk.f32.mxu0 %vm295_vm0, %v381_v17 }
 0x140   : > { %1191 = vmatmul.mubr.msk.f32.gmra.mrb[4].mxu1 %vm295_vm0, %v388_v18  ;;  %1182 = vmatmul.mubr.msk.f32.gmra.mrb[6].mxu0 %vm295_vm0, %v382_v19 }
 0x141   : > { %1193 = vmatprep.mubr.msk.f32.mxu1 %vm295_vm0, %v389_v20 }
 0x144   : > { %1194 = vmatmul.mubr.msk.f32.gmra.mrb[6].mxu1 %vm295_vm0, %v390_v21 }
 0x145   : > { %1196 = vmatprep.mubr.msk.f32.mxu1 %vm295_vm0, %v391_v22 }
 0x148   : > { %1197 = vmatmul.mubr.msk.f32.gmra.mrb[8].mxu1 %vm295_vm0, %v392_v23 }
 0x20b   : > { %v1186_v24 = vpop.f32.mrb[0].mxu1  ;;  %v1177_v25 = vpop.f32.mrb[2].mxu0 }
 0x20c   : > { %v537_v26 = vpop.f32.mrb[1].mxu1  ;;  %v507_v27 = vpop.f32.mrb[3].mxu0 }
 0x20d   : > { %v1051_v40 = vpack.c.bf16 (!%p972_p13), %v1177_v25, %v507_v27  ;;  %v1066_v43 = vpack.c.bf16 (!%p972_p13), %v1186_v24, %v537_v26 }
 0x20f   : > { %v1189_v28 = vpop.f32.mrb[2].mxu1  ;;  %v1180_v29 = vpop.f32.mrb[4].mxu0  ;;  %1052 = vst [vmem:[%s1786_s29] sm:$0xff] (!%p972_p13), %v1051_v40   ;;  %1130 = vst [vmem:[%s1786_s29 + $0x18] sm:$0xff] (!%p972_p13), %v1066_v43  }
 0x210   : > { %v547_v30 = vpop.f32.mrb[3].mxu1  ;;  %v517_v31 = vpop.f32.mrb[5].mxu0 }
 0x211   : > { %v1056_v41 = vpack.c.bf16 (!%p972_p13), %v1180_v29, %v517_v31  ;;  %v1071_v44 = vpack.c.bf16 (!%p972_p13), %v1189_v28, %v547_v30 }
 0x213   : > { %v1192_v32 = vpop.f32.mrb[4].mxu1  ;;  %v1183_v33 = vpop.f32.mrb[6].mxu0  ;;  %1128 = vst [vmem:[%s1786_s29 + $0x8] sm:$0xff] (!%p972_p13), %v1056_v41   ;;  %1131 = vst [vmem:[%s1786_s29 + $0x20] sm:$0xff] (!%p972_p13), %v1071_v44  }
 0x214   : > { %v557_v34 = vpop.f32.mrb[5].mxu1  ;;  %v527_v35 = vpop.f32.mrb[7].mxu0 }
 0x215   : > { %v1061_v42 = vpack.c.bf16 (!%p972_p13), %v1183_v33, %v527_v35  ;;  %v1076_v45 = vpack.c.bf16 (!%p972_p13), %v1192_v32, %v557_v34 }
 0x216   : > { %597 = sbr.rel (%p972_p13) target bundleno = 544 (0x220), region = 40 }
 0x217   : > { %v1195_v36 = vpop.f32.mrb[6].mxu1  ;;  %1129 = vst [vmem:[%s1786_s29 + $0x10] sm:$0xff] (!%p972_p13), %v1061_v42   ;;  %1132 = vst [vmem:[%s1786_s29 + $0x28] sm:$0xff] (!%p972_p13), %v1076_v45  }
 0x218   : > { %v567_v37 = vpop.f32.mrb[7].mxu1 }
 0x219   : > { %v1081_v46 = vpack.c.bf16 (!%p972_p13), %v1195_v36, %v567_v37 }
 0x21b   : > { %v1198_v38 = vpop.f32.mrb[8].mxu1  ;;  %1133 = vst [vmem:[%s1786_s29 + $0x30] sm:$0xff] (!%p972_p13), %v1081_v46  }
 0x21c   : > { %v577_v39 = vpop.f32.mrb[9].mxu1 }
 0x21d   : > { %v1086_v47 = vpack.c.bf16 %v1198_v38, %v577_v39 }
 0x21f   : > { %1134 = vst [vmem:[%s1786_s29 + $0x38] sm:$0xff] %v1086_v47  }
 0x220 PF: > { %p989_p3 = scmp.ne.s32.totalorder %s1490_s21, 8 }
 0x221   : > { %v1091_v48 = vpack.c.bf16 (!%p989_p3), %v1177_v25, %v507_v27  ;;  %v1096_v49 = vpack.c.bf16 (!%p989_p3), %v1180_v29, %v517_v31  ;;  %v1101_v50 = vpack.c.bf16 (!%p989_p3), %v1183_v33, %v527_v35  ;;  %v1106_v51 = vpack.c.bf16 (!%p989_p3), %v1186_v24, %v537_v26 }
 0x222   : > { %673 = sbr.rel (%p989_p3) target bundleno = 553 (0x229), region = 44  ;;  %v1111_v52 = vpack.c.bf16 (!%p989_p3), %v1189_v28, %v547_v30  ;;  %v1116_v53 = vpack.c.bf16 (!%p989_p3), %v1192_v32, %v557_v34  ;;  %v1121_v54 = vpack.c.bf16 (!%p989_p3), %v1195_v36, %v567_v37  ;;  %v1126_v55 = vpack.c.bf16 (!%p989_p3), %v1198_v38, %v577_v39 }
 0x223   : > { %1092 = vst [vmem:[%s1789_s14] sm:$0xff] (!%p989_p3), %v1091_v48   ;;  %1135 = vst [vmem:[%s1789_s14 + $0x8] sm:$0xff] (!%p989_p3), %v1096_v49  }
 0x224   : > { %1136 = vst [vmem:[%s1789_s14 + $0x10] sm:$0xff] (!%p989_p3), %v1101_v50   ;;  %1137 = vst [vmem:[%s1789_s14 + $0x18] sm:$0xff] (!%p989_p3), %v1106_v51  }
 0x225   : > { %1138 = vst [vmem:[%s1789_s14 + $0x20] sm:$0xff] (!%p989_p3), %v1111_v52   ;;  %1139 = vst [vmem:[%s1789_s14 + $0x28] sm:$0xff] (!%p989_p3), %v1116_v53  }
 0x226   : > { %1140 = vst [vmem:[%s1789_s14 + $0x30] sm:$0xff] (!%p989_p3), %v1121_v54   ;;  %1141 = vst [vmem:[%s1789_s14 + $0x38] sm:$0xff] (!%p989_p3), %v1126_v55  }
 0x229 PF: > { %p759_p4 = scmp.lt.s32.totalorder %s1490_s21, 7  ;;  %s1009_s28 = sshll.u32 %s1494_s22, 7 }
 0x22a   : > { %s771_s8 = sshll.u32 %s1786_s29, 4  ;;  %s1047_s23 = sshll.u32 %s1494_s22, 10  ;;  %s1813_s8 = int_to_ptr.vmem [resolvable:$true] %s771_s8 }
 0x22b   : > { %s1993_s21 = smov (!%p759_p4, %s1490_s21), 7  ;;  %s1824_s0 = scalar_lea.hbm %s1931_s4, %s1047_s23 }
 0x22c   : > { %s1008_s30 = sshll.u32 %s1993_s21, 4  ;;  %s1969_s29 = sand.u32 1, %s1482_s19  }
 0x22d   : > { %s768_s6 = sadd.s32 %s1009_s28, %s1008_s30  ;;  %s1828_s2 = scalar_lea.sflag [#allocation4], %s1969_s29 }
 0x22e   : > { %s1010_s12 = sshll.u32 %s768_s6, 6  ;;  %s1352_s20 = scalar_lea.vmem %s1813_s8, 1024 }
 0x22f   : > { %s1819_s26 = scalar_lea.hbm %s1930_s3, %s1010_s12  ;;  %p1353_p6 = scmp.ne.s32.totalorder %s1813_s8, %s1352_s20 }
 0x230   : > { %p1970_p8 = scmp.ne.s32.totalorder %s1954_s9, 0  ;;  %s1511_s21 = smov [#allocation5]  }
 0x231   : > { %s1356_s22 = sshll.u32 %s1511_s21, 4  ;;  %s1357_s22 = int_to_ptr.vmem [resolvable:$false] %s1356_s22 }
 0x232   : > { %p1354_p10 = pnand %p1353_p6, %p1970_p8  ;;  %s1358_s28 = scalar_lea.vmem %s1357_s22, 2048 }
 0x233   : > { %p1359_p1 = scmp.lt.s32.totalorder %s1813_s8, %s1357_s22  ;;  %p1360_p2 = scmp.lt.s32.totalorder %s1358_s28, %s1352_s20 }
 0x234   : > { %p1355_p0 = pneg %p1354_p10 }
 0x235   : > { %p1361_p5 = por %p1360_p2, %p1359_p1 }
 0x237   : > { %p1362_p9 = pnand %p1361_p5, %p1355_p0 }
 0x239   : > { %1365 = shalt.err (!%p1362_p9)
}
 0x23a   : > { %s1366_s30 = scalar_lea.hbm %s1819_s26, 1024  ;;  %s1370_s23 = scalar_lea.hbm %s1930_s3, 16384 }
 0x23b   : > { %p1367_p12 = scmp.ne.s32.totalorder %s1819_s26, %s1366_s30  ;;  %p1371_p13 = scmp.lt.u32.totalorder %s1819_s26, %s1930_s3 }
 0x23c   : > { %p1372_p3 = scmp.lt.u32.totalorder %s1370_s23, %s1366_s30  ;;  %p1374_p6 = scmp.lt.u32.totalorder %s1366_s30, %s1819_s26 }
 0x23d   : > { %p1368_p7 = pnand %p1367_p12, %p1970_p8 }
 0x23e   : > { %p1373_p4 = por %p1372_p3, %p1371_p13 }
 0x23f   : > { %p1369_p11 = pneg %p1368_p7 }
 0x240   : > { %p1375_p10 = por %p1374_p6, %p1373_p4 }
 0x242   : > { %p1376_p0 = pnand %p1375_p10, %p1369_p11 }
 0x244   : > { %1379 = shalt.err (!%p1376_p0)
}
 0x245   : > { %s1512_s20 = smov 64   ;;  %s1513_s10 = smov 4  }
 0x246   : > { %1213 = dma.vmem_to_hbm [thread:$0]  (%p1970_p8), %s1813_s8, 1024, %s1819_s26, %s1828_s2, %s1512_s20, %s1512_s20, %s1513_s10  }
 0x247   : > { %s789_s24 = sshll.u32 %s1789_s14, 4  ;;  %s1971_s29 = sand.u32 1, %s1470_s16   ;;  %s1856_s24 = int_to_ptr.vmem [resolvable:$true] %s789_s24 }
 0x248   : > { %s1860_s21 = scalar_lea.sflag [#allocation7], %s1971_s29  ;;  %s1380_s22 = scalar_lea.vmem %s1856_s24, 1024 }
 0x249   : > { %p1381_p1 = scmp.ne.s32.totalorder %s1856_s24, %s1380_s22  ;;  %p1972_p2 = scmp.ne.s32.totalorder %s1958_s27, 0 }
 0x24a   : > { %s1514_s28 = smov [#allocation6]  }
 0x24b   : > { %p1382_p5 = pnand %p1381_p1, %p1972_p2  ;;  %s1384_s9 = sshll.u32 %s1514_s28, 4  ;;  %s1385_s9 = int_to_ptr.vmem [resolvable:$false] %s1384_s9 }
 0x24c   : > { %s1386_s30 = scalar_lea.vmem %s1385_s9, 2048  ;;  %p1387_p12 = scmp.lt.s32.totalorder %s1856_s24, %s1385_s9 }
 0x24d   : > { %p1383_p9 = pneg %p1382_p5  ;;  %p1388_p8 = scmp.lt.s32.totalorder %s1386_s30, %s1380_s22 }
 0x24f   : > { %p1389_p7 = por %p1388_p8, %p1387_p12 }
 0x251   : > { %p1390_p11 = pnand %p1389_p7, %p1383_p9 }
 0x253   : > { %1393 = shalt.err (!%p1390_p11)
}
 0x254   : > { %s1394_s2 = scalar_lea.hbm %s1824_s0, 1024  ;;  %s1398_s26 = scalar_lea.hbm %s1931_s4, 2048 }
 0x255   : > { %p1395_p13 = scmp.ne.s32.totalorder %s1824_s0, %s1394_s2  ;;  %p1399_p6 = scmp.lt.u32.totalorder %s1824_s0, %s1931_s4 }
 0x256   : > { %p1400_p10 = scmp.lt.u32.totalorder %s1398_s26, %s1394_s2  ;;  %p1402_p1 = scmp.lt.u32.totalorder %s1394_s2, %s1824_s0 }
 0x257   : > { %p1396_p3 = pnand %p1395_p13, %p1972_p2 }
 0x258   : > { %p1401_p0 = por %p1400_p10, %p1399_p6 }
 0x259   : > { %p1397_p4 = pneg %p1396_p3 }
 0x25a   : > { %p1403_p5 = por %p1402_p1, %p1401_p0 }
 0x25c   : > { %p1404_p9 = pnand %p1403_p5, %p1397_p4 }
 0x25e   : > { %1407 = shalt.err (!%p1404_p9)
}
 0x25f   : > { %1214 = dma.vmem_to_hbm [thread:$0]  (%p1972_p2), %s1856_s24, 1024, %s1824_s0, %s1860_s21, %s1512_s20, %s1512_s20, %s1513_s10  }
 0x260 PF: > { %p1230_p12 = scmp.ge.s32.totalorder %s1506_s25, 2  ;;  %s804_s23 = sand.u32 1, %s1478_s18  }
 0x261   : > { %p1973_p8 = scmp.ne.s32.totalorder %s1956_s13, 0  ;;  %s805_s11 = scalar_lea.sflag [#allocation4], %s804_s23 }
 0x263   : > { %p1222_p7 = pnand %p1230_p12, %p1973_p8 }
 0x265   : > { %1457 = dma.done.wait (!%p1222_p7), %s805_s11, 1024  }
 0x266   : > { %1459 = vsyncadd (!%p1222_p7), %s805_s11, 4294966272  ;;  %s813_s27 = sand.u32 1, %s1466_s15   ;;  %p1974_p11 = scmp.ne.s32.totalorder %s1959_s7, 0 }
 0x267   : > { %s814_s1 = scalar_lea.sflag [#allocation7], %s813_s27 }
 0x268   : > { %p1225_p13 = pnand %p1230_p12, %p1974_p11 }
 0x26a   : > { %1461 = dma.done.wait (!%p1225_p13), %s814_s1, 1024  }
 0x26b   : > { %1463 = vsyncadd (!%p1225_p13), %s814_s1, 4294966272  ;;  %s22_s25 = sadd.s32 1, %s1506_s25   ;;  %s1975_s0 = sld [smem:[#allocation11_spill]] }
 0x26c   : > { %p19_p2 = scmp.ge.s32.totalorder %s22_s25, 20   ;;  %s1976_s20 = sld [smem:[#allocation16_spill]] }
 0x26d   : > { %s1977_s21 = sld [smem:[#allocation12_spill]]  ;;  %s1978_s22 = sld [smem:[#allocation13_spill]] }
 0x26e   : > { %s1979_s23 = sld [smem:[#allocation14_spill]]  ;;  %s1980_s24 = sld [smem:[#allocation15_spill]] }
 0x26f   : > { %s1981_s15 = smov %s1470_s16  ;;  %s1982_s16 = smov %s1474_s17 }
 0x270   : > { %s1983_s17 = smov %s1644_s5  ;;  %s1984_s18 = smov %s1482_s19 }
 0x271   : > { %s1985_s19 = smov %s1975_s0  ;;  %21 = sbr.rel (!%p19_p2) target bundleno = 14 (0xe), region = 100 }
 0x278   :  { %819 = vsyncpa [#allocation3], 1 }
 0x279   :  { %821 = vsyncpa [#allocation3 + $0x1], 1 }
 0x27a   :  { %822 = vsyncpa [#allocation4], 1 }
 0x27b   :  { %824 = vsyncpa [#allocation4 + $0x1], 1 }
 0x27c   :  { %825 = vsyncpa [#allocation7], 1 }
 0x27d   :  { %827 = vsyncpa [#allocation7 + $0x1], 1 }

// kernel: _lambda_.2
= control target key start
LH: loop header
LB: loop body
LE: loop exit
PB: predicated region body
PF: predicated region fallthrough
CT: control target
= control target key end

     0   :  { %s6802_s18 = smov 0   ;;  %s6804_s19 = smov 0   ;;  %s8843_s0 = inlined_call_operand.vmem [shape: f32[2,1280,256], index: 0, kind: input, shape index: {}]   ;;  %s8844_s1 = inlined_call_operand.vmem [shape: bf16[512,1280], index: 1, kind: input, shape index: {}]   ;;  %s8845_s2 = inlined_call_operand.vmem [shape: f32[512,1], index: 2, kind: input, shape index: {}]   ;;  %s8846_s3 = inlined_call_operand.vmem [shape: bf16[16,512], index: 3, kind: input, shape index: {}]   ;;  %s8847_s4 = inlined_call_operand.vmem [shape: f32[16,1], index: 4, kind: input, shape index: {}]   ;;  %s8848_s5 = inlined_call_operand.vmem [shape: f32[2,16,256], index: 5, kind: output, shape index: {}]  }
   0x1   :  { %s6806_s20 = smov 0  }
   0x2 LB: > { %s27_s21 = sadd.s32 1, %s6765_s19  ;;  %p5222_p0 = scmp.ge.s32.totalorder %s6769_s20, 1  ;;  %s6769_s20 = sphi %s6806_s20, %s15_s20   ;;  %s6765_s19 = sphi %s6804_s19, %s8926_s19   ;;  %s6761_s18 = sphi %s6802_s18, %s8925_s18  }
   0x3   : > { %p29_p1 = scmp.ge.s32.totalorder %s27_s21, 2  ;;  %p208_p2 = scmp.lt.s32.totalorder %s6769_s20, 3 }
   0x5   : > { %s8928_s21 = smov (%p29_p1, %s27_s21), 0  ;;  %p209_p3 = pnand %p5222_p0, %p208_p2 }
   0x7   : > { %212 = sbr.rel (%p209_p3) target bundleno = 1203 (0x4b3), region = 40 }
   0xe   : > { %p245_p4 = scmp.lt.s32.totalorder %s6761_s18, 1  ;;  %v6263_v0 = vld [vmem:[%s8844_s1 + $0x4] ss:$40 sps:$4 sm:$0xff]   ;;  %v6266_v1 = vld [vmem:[%s8844_s1 + $0x14] ss:$40 sps:$4 sm:$0xff]  }
   0xf   : > { %3080 = vmatprep.mubr.bf16.mxu1 %v6263_v0  ;;  %3786 = vmatprep.mubr.bf16.mxu0 %v6266_v1 }
  0x10   : > { %s8930_s18 = smov (!%p245_p4, %s6761_s18), 1 }
  0x11   : > { %s6233_s26 = smul.u32 2560, %s8930_s18  ;;  %s5552_s23 = sshll.u32 %s8930_s18, 5 }
  0x13   : > { %s6832_s29 = scalar_lea.vmem %s8843_s0, %s6233_s26  ;;  %s262_s26 = scalar_lea.vmem %s8848_s5, %s5552_s23 }
  0x14   : > { %v265_v2 = vld [vmem:[%s6832_s29 + $0x8] sm:$0xff]  ;;  %v267_v3 = vld [vmem:[%s6832_s29 + $0x18] sm:$0xff]  ;;  %v264_v7 = vld [vmem:[%s6832_s29] sm:$0xff] }
  0x15   : > { %v393_v4 = vld [vmem:[%s6832_s29 + $0x408] sm:$0xff]  ;;  %v585_v5 = vpack.c.bf16 %v267_v3, %v265_v2  ;;  %v395_v6 = vld [vmem:[%s6832_s29 + $0x418] sm:$0xff]  ;;  %v266_v8 = vld [vmem:[%s6832_s29 + $0x10] sm:$0xff] }
  0x16   : > { %v6840_v9 = vpack.c.bf16 %v395_v6, %v393_v4  ;;  %v584_v10 = vpack.c.bf16 %v266_v8, %v264_v7  ;;  %v392_v11 = vld [vmem:[%s6832_s29 + $0x400] sm:$0xff]  ;;  %v394_v12 = vld [vmem:[%s6832_s29 + $0x410] sm:$0xff]  ;;  %v269_v13 = vld [vmem:[%s6832_s29 + $0x28] sm:$0xff] }
  0x17   : > { %3048 = vmatprep.subr.bf16.mxu1 %v585_v5  ;;  %v6845_v14 = vpack.c.bf16 %v394_v12, %v392_v11  ;;  %v271_v15 = vld [vmem:[%s6832_s29 + $0x38] sm:$0xff]  ;;  %v397_v16 = vld [vmem:[%s6832_s29 + $0x428] sm:$0xff]  ;;  %v268_v20 = vld [vmem:[%s6832_s29 + $0x20] sm:$0xff] }
  0x18   : > { %v399_v17 = vld [vmem:[%s6832_s29 + $0x438] sm:$0xff]  ;;  %3754 = vmatprep.subr.bf16.mxu0 %v6840_v9  ;;  %3049 = vmatpush1.bf16.msra.mxu1 %v584_v10  ;;  %v587_v18 = vpack.c.bf16 %v271_v15, %v269_v13  ;;  %v270_v21 = vld [vmem:[%s6832_s29 + $0x30] sm:$0xff]  ;;  %v396_v22 = vld [vmem:[%s6832_s29 + $0x420] sm:$0xff] }
  0x19   : > { %v6851_v19 = vpack.c.bf16 %v399_v17, %v397_v16  ;;  %3755 = vmatpush1.bf16.msra.mxu0 %v6845_v14  ;;  %v586_v23 = vpack.c.bf16 %v270_v21, %v268_v20  ;;  %v398_v24 = vld [vmem:[%s6832_s29 + $0x430] sm:$0xff]  ;;  %v273_v25 = vld [vmem:[%s6832_s29 + $0x48] sm:$0xff]  ;;  %v275_v26 = vld [vmem:[%s6832_s29 + $0x58] sm:$0xff] }
  0x1a   : > { %3050 = vmatprep.subr.bf16.mxu1 %v587_v18  ;;  %v6861_v27 = vpack.c.bf16 %v398_v24, %v396_v22  ;;  %v589_v28 = vpack.c.bf16 %v275_v26, %v273_v25  ;;  %v401_v29 = vld [vmem:[%s6832_s29 + $0x448] sm:$0xff]  ;;  %v403_v30 = vld [vmem:[%s6832_s29 + $0x458] sm:$0xff]  ;;  %v272_v31 = vld [vmem:[%s6832_s29 + $0x40] sm:$0xff] }
  0x1b   : > { %3756 = vmatprep.subr.bf16.mxu0 %v6851_v19  ;;  %v6866_v32 = vpack.c.bf16 %v403_v30, %v401_v29  ;;  %v274_v33 = vld [vmem:[%s6832_s29 + $0x50] sm:$0xff]  ;;  %v400_v34 = vld [vmem:[%s6832_s29 + $0x440] sm:$0xff]  ;;  %v277_v37 = vld [vmem:[%s6832_s29 + $0x68] sm:$0xff] }
  0x1c   : > { %v402_v35 = vld [vmem:[%s6832_s29 + $0x450] sm:$0xff]  ;;  %3051 = vmatpush1.bf16.msra.mxu1 %v586_v23  ;;  %v588_v36 = vpack.c.bf16 %v274_v33, %v272_v31  ;;  %v279_v38 = vld [vmem:[%s6832_s29 + $0x78] sm:$0xff]  ;;  %v405_v39 = vld [vmem:[%s6832_s29 + $0x468] sm:$0xff] }
  0x1d   : > { %3757 = vmatpush1.bf16.msra.mxu0 %v6861_v27  ;;  %3052 = vmatprep.subr.bf16.mxu1 %v589_v28  ;;  %v6875_v40 = vpack.c.bf16 %v402_v35, %v400_v34  ;;  %v591_v41 = vpack.c.bf16 %v279_v38, %v277_v37  ;;  %v407_v42 = vld [vmem:[%s6832_s29 + $0x478] sm:$0xff]  ;;  %v276_v43 = vld [vmem:[%s6832_s29 + $0x60] sm:$0xff]  ;;  %v278_v44 = vld [vmem:[%s6832_s29 + $0x70] sm:$0xff] }
  0x1e   : > { %3758 = vmatprep.subr.bf16.mxu0 %v6866_v32  ;;  %v6881_v45 = vpack.c.bf16 %v407_v42, %v405_v39  ;;  %v404_v46 = vld [vmem:[%s6832_s29 + $0x460] sm:$0xff]  ;;  %v406_v47 = vld [vmem:[%s6832_s29 + $0x470] sm:$0xff]  ;;  %v281_v48 = vld [vmem:[%s6832_s29 + $0x88] sm:$0xff]  ;;  %v590_v52 = vpack.c.bf16 %v278_v44, %v276_v43 }
  0x1f   : > { %v283_v49 = vld [vmem:[%s6832_s29 + $0x98] sm:$0xff]  ;;  %v409_v50 = vld [vmem:[%s6832_s29 + $0x488] sm:$0xff]  ;;  %v6890_v53 = vpack.c.bf16 %v406_v47, %v404_v46  ;;  %v280_v55 = vld [vmem:[%s6832_s29 + $0x80] sm:$0xff] }
  0x20   : > { %v411_v51 = vld [vmem:[%s6832_s29 + $0x498] sm:$0xff]  ;;  %3053 = vmatpush1.bf16.msra.mxu1 %v588_v36  ;;  %v593_v54 = vpack.c.bf16 %v283_v49, %v281_v48  ;;  %v282_v56 = vld [vmem:[%s6832_s29 + $0x90] sm:$0xff]  ;;  %v408_v57 = vld [vmem:[%s6832_s29 + $0x480] sm:$0xff] }
  0x21   : > { %3759 = vmatpush1.bf16.msra.mxu0 %v6875_v40  ;;  %3054 = vmatprep.subr.bf16.mxu1 %v591_v41  ;;  %v6896_v58 = vpack.c.bf16 %v411_v51, %v409_v50  ;;  %v410_v59 = vld [vmem:[%s6832_s29 + $0x490] sm:$0xff]  ;;  %v285_v60 = vld [vmem:[%s6832_s29 + $0xa8] sm:$0xff]  ;;  %v287_v61 = vld [vmem:[%s6832_s29 + $0xb8] sm:$0xff]  ;;  %v592_v0 = vpack.c.bf16 %v282_v56, %v280_v55 }
  0x22   : > { %3760 = vmatprep.subr.bf16.mxu0 %v6881_v45  ;;  %v413_v62 = vld [vmem:[%s6832_s29 + $0x4a8] sm:$0xff]  ;;  %v415_v63 = vld [vmem:[%s6832_s29 + $0x4b8] sm:$0xff]  ;;  %v6904_v1 = vpack.c.bf16 %v410_v59, %v408_v57  ;;  %v595_v2 = vpack.c.bf16 %v287_v61, %v285_v60  ;;  %v284_v3 = vld [vmem:[%s6832_s29 + $0xa0] sm:$0xff] }
  0x23   : > { %v286_v4 = vld [vmem:[%s6832_s29 + $0xb0] sm:$0xff]  ;;  %v412_v5 = vld [vmem:[%s6832_s29 + $0x4a0] sm:$0xff]  ;;  %v6910_v6 = vpack.c.bf16 %v415_v63, %v413_v62  ;;  %v289_v8 = vld [vmem:[%s6832_s29 + $0xc8] sm:$0xff] }
  0x24   : > { %3055 = vmatpush1.bf16.msra.mxu1 %v590_v52  ;;  %v414_v7 = vld [vmem:[%s6832_s29 + $0x4b0] sm:$0xff]  ;;  %v291_v10 = vld [vmem:[%s6832_s29 + $0xd8] sm:$0xff]  ;;  %v417_v11 = vld [vmem:[%s6832_s29 + $0x4c8] sm:$0xff]  ;;  %v594_v13 = vpack.c.bf16 %v286_v4, %v284_v3 }
  0x25   : > { %3761 = vmatpush1.bf16.msra.mxu0 %v6890_v53  ;;  %3056 = vmatprep.subr.bf16.mxu1 %v593_v54  ;;  %v419_v12 = vld [vmem:[%s6832_s29 + $0x4d8] sm:$0xff]  ;;  %v6918_v15 = vpack.c.bf16 %v414_v7, %v412_v5  ;;  %v597_v16 = vpack.c.bf16 %v291_v10, %v289_v8  ;;  %v288_v17 = vld [vmem:[%s6832_s29 + $0xc0] sm:$0xff]  ;;  %v290_v18 = vld [vmem:[%s6832_s29 + $0xd0] sm:$0xff] }
  0x26   : > { %3762 = vmatprep.subr.bf16.mxu0 %v6896_v58  ;;  %v416_v20 = vld [vmem:[%s6832_s29 + $0x4c0] sm:$0xff]  ;;  %v6924_v21 = vpack.c.bf16 %v419_v12, %v417_v11  ;;  %v418_v22 = vld [vmem:[%s6832_s29 + $0x4d0] sm:$0xff]  ;;  %v293_v23 = vld [vmem:[%s6832_s29 + $0xe8] sm:$0xff]  ;;  %v596_v28 = vpack.c.bf16 %v290_v18, %v288_v17 }
  0x27   : > { %v295_v24 = vld [vmem:[%s6832_s29 + $0xf8] sm:$0xff]  ;;  %v421_v25 = vld [vmem:[%s6832_s29 + $0x4e8] sm:$0xff]  ;;  %v6932_v29 = vpack.c.bf16 %v418_v22, %v416_v20  ;;  %v292_v31 = vld [vmem:[%s6832_s29 + $0xe0] sm:$0xff] }
  0x28   : > { %3057 = vmatpush1.bf16.msra.mxu1 %v592_v0  ;;  %v423_v26 = vld [vmem:[%s6832_s29 + $0x4f8] sm:$0xff]  ;;  %v599_v30 = vpack.c.bf16 %v295_v24, %v293_v23  ;;  %v294_v33 = vld [vmem:[%s6832_s29 + $0xf0] sm:$0xff]  ;;  %v420_v34 = vld [vmem:[%s6832_s29 + $0x4e0] sm:$0xff] }
  0x29   : > { %3763 = vmatpush1.bf16.msra.mxu0 %v6904_v1  ;;  %3058 = vmatprep.subr.bf16.mxu1 %v595_v2  ;;  %v6938_v35 = vpack.c.bf16 %v423_v26, %v421_v25  ;;  %v422_v36 = vld [vmem:[%s6832_s29 + $0x4f0] sm:$0xff]  ;;  %v297_v37 = vld [vmem:[%s6832_s29 + $0x108] sm:$0xff]  ;;  %v299_v38 = vld [vmem:[%s6832_s29 + $0x118] sm:$0xff]  ;;  %v598_v42 = vpack.c.bf16 %v294_v33, %v292_v31 }
  0x2a   : > { %3764 = vmatprep.subr.bf16.mxu0 %v6910_v6  ;;  %v425_v39 = vld [vmem:[%s6832_s29 + $0x508] sm:$0xff]  ;;  %v427_v41 = vld [vmem:[%s6832_s29 + $0x518] sm:$0xff]  ;;  %v6946_v43 = vpack.c.bf16 %v422_v36, %v420_v34  ;;  %v601_v44 = vpack.c.bf16 %v299_v38, %v297_v37  ;;  %v296_v46 = vld [vmem:[%s6832_s29 + $0x100] sm:$0xff] }
  0x2b   : > { %v298_v47 = vld [vmem:[%s6832_s29 + $0x110] sm:$0xff]  ;;  %v424_v48 = vld [vmem:[%s6832_s29 + $0x500] sm:$0xff]  ;;  %v6952_v49 = vpack.c.bf16 %v427_v41, %v425_v39  ;;  %v301_v51 = vld [vmem:[%s6832_s29 + $0x128] sm:$0xff] }
  0x2c   : > { %3059 = vmatpush1.bf16.msra.mxu1 %v594_v13  ;;  %v426_v50 = vld [vmem:[%s6832_s29 + $0x510] sm:$0xff]  ;;  %v303_v52 = vld [vmem:[%s6832_s29 + $0x138] sm:$0xff]  ;;  %v429_v54 = vld [vmem:[%s6832_s29 + $0x528] sm:$0xff]  ;;  %v600_v56 = vpack.c.bf16 %v298_v47, %v296_v46 }
  0x2d   : > { %3765 = vmatpush1.bf16.msra.mxu0 %v6918_v15  ;;  %3060 = vmatprep.subr.bf16.mxu1 %v597_v16  ;;  %v431_v55 = vld [vmem:[%s6832_s29 + $0x538] sm:$0xff]  ;;  %v6960_v57 = vpack.c.bf16 %v426_v50, %v424_v48  ;;  %v603_v59 = vpack.c.bf16 %v303_v52, %v301_v51  ;;  %v300_v60 = vld [vmem:[%s6832_s29 + $0x120] sm:$0xff]  ;;  %v302_v61 = vld [vmem:[%s6832_s29 + $0x130] sm:$0xff] }
  0x2e   : > { %3766 = vmatprep.subr.bf16.mxu0 %v6924_v21  ;;  %v428_v62 = vld [vmem:[%s6832_s29 + $0x520] sm:$0xff]  ;;  %v6966_v63 = vpack.c.bf16 %v431_v55, %v429_v54  ;;  %v430_v0 = vld [vmem:[%s6832_s29 + $0x530] sm:$0xff]  ;;  %v305_v2 = vld [vmem:[%s6832_s29 + $0x148] sm:$0xff]  ;;  %v602_v7 = vpack.c.bf16 %v302_v61, %v300_v60 }
  0x2f   : > { %v307_v3 = vld [vmem:[%s6832_s29 + $0x158] sm:$0xff]  ;;  %v433_v4 = vld [vmem:[%s6832_s29 + $0x548] sm:$0xff]  ;;  %v6974_v8 = vpack.c.bf16 %v430_v0, %v428_v62  ;;  %v304_v11 = vld [vmem:[%s6832_s29 + $0x140] sm:$0xff] }
  0x30   : > { %3061 = vmatpush1.bf16.msra.mxu1 %v596_v28  ;;  %v435_v5 = vld [vmem:[%s6832_s29 + $0x558] sm:$0xff]  ;;  %v605_v10 = vpack.c.bf16 %v307_v3, %v305_v2  ;;  %v306_v12 = vld [vmem:[%s6832_s29 + $0x150] sm:$0xff]  ;;  %v432_v13 = vld [vmem:[%s6832_s29 + $0x540] sm:$0xff] }
  0x31   : > { %3767 = vmatpush1.bf16.msra.mxu0 %v6932_v29  ;;  %3062 = vmatprep.subr.bf16.mxu1 %v599_v30  ;;  %v6980_v16 = vpack.c.bf16 %v435_v5, %v433_v4  ;;  %v434_v17 = vld [vmem:[%s6832_s29 + $0x550] sm:$0xff]  ;;  %v309_v18 = vld [vmem:[%s6832_s29 + $0x168] sm:$0xff]  ;;  %v311_v20 = vld [vmem:[%s6832_s29 + $0x178] sm:$0xff]  ;;  %v604_v24 = vpack.c.bf16 %v306_v12, %v304_v11 }
  0x32   : > { %3768 = vmatprep.subr.bf16.mxu0 %v6938_v35  ;;  %v437_v22 = vld [vmem:[%s6832_s29 + $0x568] sm:$0xff]  ;;  %v439_v23 = vld [vmem:[%s6832_s29 + $0x578] sm:$0xff]  ;;  %v6988_v25 = vpack.c.bf16 %v434_v17, %v432_v13  ;;  %v607_v26 = vpack.c.bf16 %v311_v20, %v309_v18  ;;  %v308_v28 = vld [vmem:[%s6832_s29 + $0x160] sm:$0xff] }
  0x33   : > { %v310_v30 = vld [vmem:[%s6832_s29 + $0x170] sm:$0xff]  ;;  %v436_v31 = vld [vmem:[%s6832_s29 + $0x560] sm:$0xff]  ;;  %v6994_v33 = vpack.c.bf16 %v439_v23, %v437_v22  ;;  %v313_v36 = vld [vmem:[%s6832_s29 + $0x188] sm:$0xff] }
  0x34   : > { %3063 = vmatpush1.bf16.msra.mxu1 %v598_v42  ;;  %v438_v34 = vld [vmem:[%s6832_s29 + $0x570] sm:$0xff]  ;;  %v315_v37 = vld [vmem:[%s6832_s29 + $0x198] sm:$0xff]  ;;  %v441_v38 = vld [vmem:[%s6832_s29 + $0x588] sm:$0xff]  ;;  %v606_v41 = vpack.c.bf16 %v310_v30, %v308_v28 }
  0x35   : > { %3769 = vmatpush1.bf16.msra.mxu0 %v6946_v43  ;;  %3064 = vmatprep.subr.bf16.mxu1 %v601_v44  ;;  %v443_v39 = vld [vmem:[%s6832_s29 + $0x598] sm:$0xff]  ;;  %v312_v42 = vld [vmem:[%s6832_s29 + $0x180] sm:$0xff]  ;;  %v314_v44 = vld [vmem:[%s6832_s29 + $0x190] sm:$0xff]  ;;  %v7004_v46 = vpack.c.bf16 %v438_v34, %v436_v31  ;;  %v609_v47 = vpack.c.bf16 %v315_v37, %v313_v36 }
  0x36   : > { %3770 = vmatprep.subr.bf16.mxu0 %v6952_v49  ;;  %v440_v48 = vld [vmem:[%s6832_s29 + $0x580] sm:$0xff]  ;;  %v442_v50 = vld [vmem:[%s6832_s29 + $0x590] sm:$0xff]  ;;  %v317_v51 = vld [vmem:[%s6832_s29 + $0x1a8] sm:$0xff]  ;;  %v7010_v52 = vpack.c.bf16 %v443_v39, %v441_v38  ;;  %v608_v61 = vpack.c.bf16 %v314_v44, %v312_v42 }
  0x37   : > { %v319_v54 = vld [vmem:[%s6832_s29 + $0x1b8] sm:$0xff]  ;;  %v445_v55 = vld [vmem:[%s6832_s29 + $0x5a8] sm:$0xff]  ;;  %v318_v60 = vld [vmem:[%s6832_s29 + $0x1b0] sm:$0xff]  ;;  %v7020_v2 = vpack.c.bf16 %v442_v50, %v440_v48 }
  0x38   : > { %3065 = vmatpush1.bf16.msra.mxu1 %v600_v56  ;;  %v447_v56 = vld [vmem:[%s6832_s29 + $0x5b8] sm:$0xff]  ;;  %v444_v62 = vld [vmem:[%s6832_s29 + $0x5a0] sm:$0xff]  ;;  %v446_v0 = vld [vmem:[%s6832_s29 + $0x5b0] sm:$0xff]  ;;  %v611_v3 = vpack.c.bf16 %v319_v54, %v317_v51 }
  0x39   : > { %3771 = vmatpush1.bf16.msra.mxu0 %v6960_v57  ;;  %3066 = vmatprep.subr.bf16.mxu1 %v603_v59  ;;  %v316_v59 = vld [vmem:[%s6832_s29 + $0x1a0] sm:$0xff]  ;;  %v321_v4 = vld [vmem:[%s6832_s29 + $0x1c8] sm:$0xff]  ;;  %v323_v5 = vld [vmem:[%s6832_s29 + $0x1d8] sm:$0xff]  ;;  %v7033_v20 = vpack.c.bf16 %v446_v0, %v444_v62 }
  0x3a   : > { %3772 = vmatprep.subr.bf16.mxu0 %v6966_v63  ;;  %v451_v11 = vld [vmem:[%s6832_s29 + $0x5d8] sm:$0xff]  ;;  %v610_v12 = vpack.c.bf16 %v318_v60, %v316_v59  ;;  %v320_v13 = vld [vmem:[%s6832_s29 + $0x1c0] sm:$0xff]  ;;  %v322_v17 = vld [vmem:[%s6832_s29 + $0x1d0] sm:$0xff]  ;;  %v613_v22 = vpack.c.bf16 %v323_v5, %v321_v4 }
  0x3b   : > { %v448_v18 = vld [vmem:[%s6832_s29 + $0x5c0] sm:$0xff]  ;;  %v450_v23 = vld [vmem:[%s6832_s29 + $0x5d0] sm:$0xff]  ;;  %v453_v30 = vld [vmem:[%s6832_s29 + $0x5e8] sm:$0xff]  ;;  %v612_v34 = vpack.c.bf16 %v322_v17, %v320_v13 }
  0x3c   : > { %3067 = vmatpush1.bf16.msra.mxu1 %v602_v7  ;;  %v7025_v7 = vpack.c.bf16 %v447_v56, %v445_v55  ;;  %v455_v31 = vld [vmem:[%s6832_s29 + $0x5f8] sm:$0xff]  ;;  %v324_v36 = vld [vmem:[%s6832_s29 + $0x1e0] sm:$0xff]  ;;  %v7045_v37 = vpack.c.bf16 %v450_v23, %v448_v18  ;;  %v326_v39 = vld [vmem:[%s6832_s29 + $0x1f0] sm:$0xff] }
  0x3d   : > { %3773 = vmatpush1.bf16.msra.mxu0 %v6974_v8  ;;  %3068 = vmatprep.subr.bf16.mxu1 %v605_v10  ;;  %v449_v10 = vld [vmem:[%s6832_s29 + $0x5c8] sm:$0xff]  ;;  %v454_v42 = vld [vmem:[%s6832_s29 + $0x5f0] sm:$0xff]  ;;  %v7051_v44 = vpack.c.bf16 %v455_v31, %v453_v30  ;;  %v459_v48 = vld [vmem:[%s6832_s29 + $0x618] sm:$0xff]  ;;  %v614_v50 = vpack.c.bf16 %v326_v39, %v324_v36 }
  0x3e   : > { %3774 = vmatprep.subr.bf16.mxu0 %v6980_v16  ;;  %v7039_v28 = vpack.c.bf16 %v451_v11, %v449_v10  ;;  %v6261_v54 = vld [vmem:[%s8844_s1] ss:$40 sps:$4 sm:$0xff]   ;;  %v458_v56 = vld [vmem:[%s6832_s29 + $0x610] sm:$0xff]  ;;  %v467_v13 = vld [vmem:[%s6832_s29 + $0x658] sm:$0xff] }
  0x3f   : > { %v456_v55 = vld [vmem:[%s6832_s29 + $0x600] sm:$0xff]  ;;  %v461_v60 = vld [vmem:[%s6832_s29 + $0x628] sm:$0xff]  ;;  %v6264_v62 = vld [vmem:[%s8844_s1 + $0x10] ss:$40 sps:$4 sm:$0xff]  }
  0x40   : > { %3069 = vmatpush1.bf16.msra.mxu1 %v604_v24  ;;  %v325_v24 = vld [vmem:[%s6832_s29 + $0x1e8] sm:$0xff]  ;;  %v6267_v0 = vld [vmem:[%s8844_s1 + $0x54] ss:$40 sps:$4 sm:$0xff]   ;;  %v680_v4 = vpack.c.bf16 %v458_v56, %v456_v55  ;;  %v460_v5 = vld [vmem:[%s6832_s29 + $0x620] sm:$0xff] }
  0x41   : > { %3775 = vmatpush1.bf16.msra.mxu0 %v6988_v25  ;;  %3070 = vmatprep.subr.bf16.mxu1 %v607_v26  ;;  %v327_v26 = vld [vmem:[%s6832_s29 + $0x1f8] sm:$0xff]  ;;  %v462_v11 = vld [vmem:[%s6832_s29 + $0x630] sm:$0xff]  ;;  %v6272_v23 = vld [vmem:[%s8844_s1 + $0x60] ss:$40 sps:$4 sm:$0xff]  }
  0x42   : > { %3776 = vmatprep.subr.bf16.mxu0 %v6994_v33  ;;  %v615_v38 = vpack.c.bf16 %v327_v26, %v325_v24  ;;  %v6271_v17 = vld [vmem:[%s8844_s1 + $0x50] ss:$40 sps:$4 sm:$0xff]   ;;  %v682_v18 = vpack.c.bf16 %v462_v11, %v460_v5  ;;  %v6273_v30 = vld [vmem:[%s8844_s1 + $0xa4] ss:$40 sps:$4 sm:$0xff]   ;;  %v6275_v36 = vld [vmem:[%s8844_s1 + $0xb4] ss:$40 sps:$4 sm:$0xff]  }
  0x43   : > { %v466_v26 = vld [vmem:[%s6832_s29 + $0x650] sm:$0xff]  ;;  %v469_v31 = vld [vmem:[%s6832_s29 + $0x668] sm:$0xff]  ;;  %v328_v56 = vld [vmem:[%s6832_s29 + $0x200] sm:$0xff] }
  0x44   : > { %3071 = vmatpush1.bf16.msra.mxu1 %v606_v41  ;;  %v452_v41 = vld [vmem:[%s6832_s29 + $0x5e0] sm:$0xff]  ;;  %v470_v39 = vld [vmem:[%s6832_s29 + $0x670] sm:$0xff]  ;;  %v477_v11 = vld [vmem:[%s6832_s29 + $0x6a8] sm:$0xff] }
  0x45   : > { %3777 = vmatpush1.bf16.msra.mxu0 %v7004_v46  ;;  %3072 = vmatprep.subr.bf16.mxu1 %v609_v47  ;;  %v457_v47 = vld [vmem:[%s6832_s29 + $0x608] sm:$0xff]  ;;  %v7056_v51 = vpack.c.bf16 %v454_v42, %v452_v41  ;;  %v6279_v5 = vld [vmem:[%s8844_s1 + $0xf4] ss:$40 sps:$4 sm:$0xff]  }
  0x46   : > { %3778 = vmatprep.subr.bf16.mxu0 %v7010_v52  ;;  %v681_v59 = vpack.c.bf16 %v459_v48, %v457_v47  ;;  %v473_v42 = vld [vmem:[%s6832_s29 + $0x688] sm:$0xff]  ;;  %v331_v48 = vld [vmem:[%s6832_s29 + $0x218] sm:$0xff] }
  0x47   : > { %v329_v47 = vld [vmem:[%s6832_s29 + $0x208] sm:$0xff] }
  0x48   : > { %3073 = vmatpush1.bf16.msra.mxu1 %v608_v61  ;;  %v463_v61 = vld [vmem:[%s6832_s29 + $0x638] sm:$0xff]  ;;  %v617_v55 = vpack.c.bf16 %v331_v48, %v329_v47  ;;  %v480_v47 = vld [vmem:[%s6832_s29 + $0x6c0] sm:$0xff]  ;;  %v482_v48 = vld [vmem:[%s6832_s29 + $0x6d0] sm:$0xff] }
  0x49   : > { %3779 = vmatpush1.bf16.msra.mxu0 %v7020_v2  ;;  %3074 = vmatprep.subr.bf16.mxu1 %v611_v3  ;;  %v6269_v3 = vld [vmem:[%s8844_s1 + $0x64] ss:$40 sps:$4 sm:$0xff]   ;;  %v683_v10 = vpack.c.bf16 %v463_v61, %v461_v60  ;;  %v6277_v61 = vld [vmem:[%s8844_s1 + $0xa0] ss:$40 sps:$4 sm:$0xff]  }
  0x4a   : > { %3780 = vmatprep.subr.bf16.mxu0 %v7025_v7 }
  0x4c   : > { %3075 = vmatpush1.bf16.msra.mxu1 %v610_v12  ;;  %v465_v12 = vld [vmem:[%s6832_s29 + $0x648] sm:$0xff] }
  0x4d   : > { %3781 = vmatpush1.bf16.msra.mxu0 %v7033_v20  ;;  %3076 = vmatprep.subr.bf16.mxu1 %v613_v22  ;;  %v464_v22 = vld [vmem:[%s6832_s29 + $0x640] sm:$0xff]  ;;  %v685_v24 = vpack.c.bf16 %v467_v13, %v465_v12  ;;  %v479_v12 = vld [vmem:[%s6832_s29 + $0x6b8] sm:$0xff] }
  0x4e   : > { %3782 = vmatprep.subr.bf16.mxu0 %v7039_v28  ;;  %v684_v41 = vpack.c.bf16 %v466_v26, %v464_v22  ;;  %v6281_v13 = vld [vmem:[%s8844_s1 + $0x104] ss:$40 sps:$4 sm:$0xff]   ;;  %v335_v26 = vld [vmem:[%s6832_s29 + $0x238] sm:$0xff] }
  0x50   : > { %3077 = vmatpush1.bf16.msra.mxu1 %v612_v34  ;;  %v471_v34 = vld [vmem:[%s6832_s29 + $0x678] sm:$0xff] }
  0x51   : > { %3783 = vmatpush1.bf16.msra.mxu0 %v7045_v37  ;;  %3078 = vmatprep.subr.bf16.mxu1 %v615_v38  ;;  %v468_v38 = vld [vmem:[%s6832_s29 + $0x660] sm:$0xff] }
  0x52   : > { %3784 = vmatprep.subr.bf16.mxu0 %v7051_v44 }
  0x54   : > { %3079 = vmatpush1.bf16.msra.mxu1 %v614_v50  ;;  %v687_v50 = vpack.c.bf16 %v471_v34, %v469_v31  ;;  %v483_v31 = vld [vmem:[%s6832_s29 + $0x6d8] sm:$0xff] }
  0x55   : > { %3785 = vmatpush1.bf16.msra.mxu0 %v7056_v51  ;;  %3401 = vmatprep.subr.bf16.mxu1 %v617_v55  ;;  %v487_v55 = vld [vmem:[%s6832_s29 + $0x6f8] sm:$0xff] }
  0x56   : > { %4107 = vmatprep.subr.bf16.mxu0 %v681_v59  ;;  %v330_v59 = vld [vmem:[%s6832_s29 + $0x210] sm:$0xff] }
  0x57   : > { %3081 = vmatmul.mubr.bf16.vlgmr.msra.gmra.mrb[0].mxu1 %v6261_v54  ;;  %v475_v54 = vld [vmem:[%s6832_s29 + $0x698] sm:$0xff]  ;;  %v616_v60 = vpack.c.bf16 %v330_v59, %v328_v56  ;;  %v6284_v56 = vld [vmem:[%s8844_s1 + $0x100] ss:$40 sps:$4 sm:$0xff]   ;;  %v6285_v59 = vld [vmem:[%s8844_s1 + $0x144] ss:$40 sps:$4 sm:$0xff]  }
  0x58   : > { %3787 = vmatmul.mubr.bf16.vlgmr.msra.gmra.mrb[0].mxu0 %v6264_v62  ;;  %3090 = vmatprep.mubr.bf16.mxu1 %v6267_v0  ;;  %v686_v62 = vpack.c.bf16 %v470_v39, %v468_v38  ;;  %v472_v0 = vld [vmem:[%s6832_s29 + $0x680] sm:$0xff]  ;;  %v334_v38 = vld [vmem:[%s6832_s29 + $0x230] sm:$0xff] }
  0x59   : > { %4108 = vmatpush1.bf16.msra.mxu0 %v680_v4  ;;  %3796 = vmatprep.mubr.bf16.mxu0 %v6269_v3  ;;  %v474_v3 = vld [vmem:[%s6832_s29 + $0x690] sm:$0xff] }
  0x5a   : > { %4109 = vmatprep.subr.bf16.mxu0 %v683_v10  ;;  %v6278_v4 = vld [vmem:[%s8844_s1 + $0xb0] ss:$40 sps:$4 sm:$0xff]   ;;  %v689_v10 = vpack.c.bf16 %v475_v54, %v473_v42  ;;  %3402 = vmatpush1.bf16.msra.mxu1 %v616_v60  ;;  %v688_v22 = vpack.c.bf16 %v474_v3, %v472_v0  ;;  %v485_v54 = vld [vmem:[%s6832_s29 + $0x6e8] sm:$0xff]  ;;  %v6287_v60 = vld [vmem:[%s8844_s1 + $0x154] ss:$40 sps:$4 sm:$0xff]  }
  0x5b   : > { %v486_v0 = vld [vmem:[%s6832_s29 + $0x6f0] sm:$0xff]  ;;  %v695_v3 = vpack.c.bf16 %v487_v55, %v485_v54  ;;  %v343_v54 = vld [vmem:[%s6832_s29 + $0x278] sm:$0xff]  ;;  %v497_v55 = vld [vmem:[%s6832_s29 + $0x748] sm:$0xff] }
  0x5d   : > { %4110 = vmatpush1.bf16.msra.mxu0 %v682_v18  ;;  %v478_v18 = vld [vmem:[%s6832_s29 + $0x6b0] sm:$0xff] }
  0x5e   : > { %4111 = vmatprep.subr.bf16.mxu0 %v685_v24  ;;  %v333_v24 = vld [vmem:[%s6832_s29 + $0x228] sm:$0xff] }
  0x5f   : > { %3091 = vmatmul.mubr.bf16.gmra.mrb[4].mxu1 %v6271_v17  ;;  %v476_v17 = vld [vmem:[%s6832_s29 + $0x6a0] sm:$0xff]  ;;  %v619_v34 = vpack.c.bf16 %v335_v26, %v333_v24  ;;  %v6290_v24 = vld [vmem:[%s8844_s1 + $0x150] ss:$40 sps:$4 sm:$0xff]  }
  0x60   : > { %3797 = vmatmul.mubr.bf16.gmra.mrb[4].mxu0 %v6272_v23  ;;  %3100 = vmatprep.mubr.bf16.mxu1 %v6273_v30  ;;  %v481_v23 = vld [vmem:[%s6832_s29 + $0x6c8] sm:$0xff]  ;;  %v691_v30 = vpack.c.bf16 %v479_v12, %v477_v11  ;;  %v690_v42 = vpack.c.bf16 %v478_v18, %v476_v17  ;;  %v491_v11 = vld [vmem:[%s6832_s29 + $0x718] sm:$0xff]  ;;  %v338_v17 = vld [vmem:[%s6832_s29 + $0x250] sm:$0xff] }
  0x61   : > { %3806 = vmatprep.mubr.bf16.mxu0 %v6275_v36  ;;  %4112 = vmatpush1.bf16.msra.mxu0 %v684_v41  ;;  %v332_v36 = vld [vmem:[%s6832_s29 + $0x220] sm:$0xff]  ;;  %v6283_v41 = vld [vmem:[%s8844_s1 + $0xf0] ss:$40 sps:$4 sm:$0xff]  }
  0x62   : > { %4113 = vmatprep.subr.bf16.mxu0 %v687_v50  ;;  %v618_v39 = vpack.c.bf16 %v334_v38, %v332_v36  ;;  %v693_v50 = vpack.c.bf16 %v483_v31, %v481_v23  ;;  %3403 = vmatprep.subr.bf16.mxu1 %v619_v34  ;;  %v6289_v18 = vld [vmem:[%s8844_s1 + $0x140] ss:$40 sps:$4 sm:$0xff]   ;;  %v490_v31 = vld [vmem:[%s6832_s29 + $0x710] sm:$0xff]  ;;  %v495_v36 = vld [vmem:[%s6832_s29 + $0x738] sm:$0xff] }
  0x63   : > { %v493_v34 = vld [vmem:[%s6832_s29 + $0x728] sm:$0xff]  ;;  %v6291_v38 = vld [vmem:[%s8844_s1 + $0x194] ss:$40 sps:$4 sm:$0xff]  }
  0x64   : > { %3404 = vmatpush1.bf16.msra.mxu1 %v618_v39  ;;  %v6293_v39 = vld [vmem:[%s8844_s1 + $0x1a4] ss:$40 sps:$4 sm:$0xff]  }
  0x65   : > { %4114 = vmatpush1.bf16.msra.mxu0 %v686_v62  ;;  %v484_v62 = vld [vmem:[%s6832_s29 + $0x6e0] sm:$0xff] }
  0x66   : > { %4115 = vmatprep.subr.bf16.mxu0 %v689_v10  ;;  %v339_v10 = vld [vmem:[%s6832_s29 + $0x258] sm:$0xff] }
  0x67   : > { %3101 = vmatmul.mubr.bf16.gmra.mrb[8].mxu1 %v6277_v61  ;;  %v692_v61 = vpack.c.bf16 %v482_v48, %v480_v47  ;;  %v699_v47 = vpack.c.bf16 %v495_v36, %v493_v34  ;;  %v494_v48 = vld [vmem:[%s6832_s29 + $0x730] sm:$0xff]  ;;  %v345_v34 = vld [vmem:[%s6832_s29 + $0x288] sm:$0xff]  ;;  %v347_v36 = vld [vmem:[%s6832_s29 + $0x298] sm:$0xff] }
  0x68   : > { %3807 = vmatmul.mubr.bf16.gmra.mrb[8].mxu0 %v6278_v4  ;;  %3110 = vmatprep.mubr.bf16.mxu1 %v6279_v5  ;;  %v489_v4 = vld [vmem:[%s6832_s29 + $0x708] sm:$0xff] }
  0x69   : > { %3816 = vmatprep.mubr.bf16.mxu0 %v6281_v13  ;;  %4116 = vmatpush1.bf16.msra.mxu0 %v688_v22  ;;  %v337_v5 = vld [vmem:[%s6832_s29 + $0x248] sm:$0xff]  ;;  %v336_v13 = vld [vmem:[%s6832_s29 + $0x240] sm:$0xff]  ;;  %v694_v22 = vpack.c.bf16 %v486_v0, %v484_v62  ;;  %v697_v26 = vpack.c.bf16 %v491_v11, %v489_v4  ;;  %v342_v0 = vld [vmem:[%s6832_s29 + $0x270] sm:$0xff] }
  0x6a   : > { %4117 = vmatprep.subr.bf16.mxu0 %v691_v30  ;;  %v621_v12 = vpack.c.bf16 %v339_v10, %v337_v5  ;;  %v620_v23 = vpack.c.bf16 %v338_v17, %v336_v13  ;;  %v488_v30 = vld [vmem:[%s6832_s29 + $0x700] sm:$0xff]  ;;  %v498_v10 = vld [vmem:[%s6832_s29 + $0x750] sm:$0xff]  ;;  %v503_v13 = vld [vmem:[%s6832_s29 + $0x778] sm:$0xff] }
  0x6b   : > { %v496_v5 = vld [vmem:[%s6832_s29 + $0x740] sm:$0xff] }
  0x6c   : > { %3405 = vmatprep.subr.bf16.mxu1 %v621_v12  ;;  %v501_v12 = vld [vmem:[%s6832_s29 + $0x768] sm:$0xff] }
  0x6d   : > { %4118 = vmatpush1.bf16.msra.mxu0 %v690_v42  ;;  %3406 = vmatpush1.bf16.msra.mxu1 %v620_v23  ;;  %v492_v42 = vld [vmem:[%s6832_s29 + $0x720] sm:$0xff]  ;;  %v703_v23 = vpack.c.bf16 %v503_v13, %v501_v12  ;;  %v349_v12 = vld [vmem:[%s6832_s29 + $0x2a8] sm:$0xff] }
  0x6e   : > { %4119 = vmatprep.subr.bf16.mxu0 %v693_v50  ;;  %v341_v50 = vld [vmem:[%s6832_s29 + $0x268] sm:$0xff]  ;;  %v698_v62 = vpack.c.bf16 %v494_v48, %v492_v42  ;;  %v344_v42 = vld [vmem:[%s6832_s29 + $0x280] sm:$0xff] }
  0x6f   : > { %3111 = vmatmul.mubr.bf16.gmra.mrb[12].mxu1 %v6283_v41  ;;  %v696_v41 = vpack.c.bf16 %v490_v31, %v488_v30  ;;  %v6297_v17 = vld [vmem:[%s8844_s1 + $0x1e4] ss:$40 sps:$4 sm:$0xff]   ;;  %v507_v31 = vld [vmem:[%s6832_s29 + $0x798] sm:$0xff] }
  0x70   : > { %3817 = vmatmul.mubr.bf16.gmra.mrb[12].mxu0 %v6284_v56  ;;  %3120 = vmatprep.mubr.bf16.mxu1 %v6285_v59  ;;  %v499_v56 = vld [vmem:[%s6832_s29 + $0x758] sm:$0xff]  ;;  %v623_v59 = vpack.c.bf16 %v343_v54, %v341_v50  ;;  %v505_v30 = vld [vmem:[%s6832_s29 + $0x788] sm:$0xff]  ;;  %v506_v50 = vld [vmem:[%s6832_s29 + $0x790] sm:$0xff] }
  0x71   : > { %3826 = vmatprep.mubr.bf16.mxu0 %v6287_v60  ;;  %4120 = vmatpush1.bf16.msra.mxu0 %v692_v61  ;;  %v340_v60 = vld [vmem:[%s6832_s29 + $0x260] sm:$0xff]  ;;  %v6295_v61 = vld [vmem:[%s8844_s1 + $0x190] ss:$40 sps:$4 sm:$0xff]   ;;  %v701_v4 = vpack.c.bf16 %v499_v56, %v497_v55  ;;  %v705_v48 = vpack.c.bf16 %v507_v31, %v505_v30  ;;  %v509_v56 = vld [vmem:[%s6832_s29 + $0x7a8] sm:$0xff] }
  0x72   : > { %4121 = vmatprep.subr.bf16.mxu0 %v695_v3  ;;  %v6296_v3 = vld [vmem:[%s8844_s1 + $0x1a0] ss:$40 sps:$4 sm:$0xff]   ;;  %3407 = vmatprep.subr.bf16.mxu1 %v623_v59  ;;  %v622_v11 = vpack.c.bf16 %v342_v0, %v340_v60  ;;  %v511_v59 = vld [vmem:[%s6832_s29 + $0x7b8] sm:$0xff]  ;;  %v350_v31 = vld [vmem:[%s6832_s29 + $0x2b0] sm:$0xff] }
  0x73   : > { %v6301_v55 = vld [vmem:[%s8844_s1 + $0x1e0] ss:$40 sps:$4 sm:$0xff]   ;;  %v6302_v60 = vld [vmem:[%s8844_s1 + $0x1f0] ss:$40 sps:$4 sm:$0xff]  }
  0x74   : > { %3408 = vmatpush1.bf16.msra.mxu1 %v622_v11  ;;  %v515_v11 = vld [vmem:[%s6832_s29 + $0x7d8] sm:$0xff]  ;;  %v512_v13 = vld [vmem:[%s6832_s29 + $0x7c0] sm:$0xff] }
  0x75   : > { %4122 = vmatpush1.bf16.msra.mxu0 %v694_v22  ;;  %v700_v22 = vpack.c.bf16 %v498_v10, %v496_v5  ;;  %v510_v5 = vld [vmem:[%s6832_s29 + $0x7b0] sm:$0xff]  ;;  %v513_v10 = vld [vmem:[%s6832_s29 + $0x7c8] sm:$0xff]  ;;  %v348_v30 = vld [vmem:[%s6832_s29 + $0x2a0] sm:$0xff] }
  0x76   : > { %4123 = vmatprep.subr.bf16.mxu0 %v697_v26  ;;  %v502_v26 = vld [vmem:[%s6832_s29 + $0x770] sm:$0xff] }
  0x77   : > { %3121 = vmatmul.mubr.bf16.gmra.mrb[16].mxu1 %v6289_v18  ;;  %v6299_v18 = vld [vmem:[%s8844_s1 + $0x1f4] ss:$40 sps:$4 sm:$0xff]  }
  0x78   : > { %3827 = vmatmul.mubr.bf16.gmra.mrb[16].mxu0 %v6290_v24  ;;  %3130 = vmatprep.mubr.bf16.mxu1 %v6291_v38  ;;  %v500_v24 = vld [vmem:[%s6832_s29 + $0x760] sm:$0xff] }
  0x79   : > { %3836 = vmatprep.mubr.bf16.mxu0 %v6293_v39  ;;  %4124 = vmatpush1.bf16.msra.mxu0 %v696_v41  ;;  %v702_v38 = vpack.c.bf16 %v502_v26, %v500_v24  ;;  %v504_v39 = vld [vmem:[%s6832_s29 + $0x780] sm:$0xff]  ;;  %v625_v41 = vpack.c.bf16 %v347_v36, %v345_v34  ;;  %v709_v26 = vpack.c.bf16 %v515_v11, %v513_v10  ;;  %v517_v34 = vld [vmem:[%s6832_s29 + $0x7e8] sm:$0xff]  ;;  %v519_v36 = vld [vmem:[%s6832_s29 + $0x7f8] sm:$0xff] }
  0x7a   : > { %4125 = vmatprep.subr.bf16.mxu0 %v699_v47  ;;  %v346_v47 = vld [vmem:[%s6832_s29 + $0x290] sm:$0xff]  ;;  %v704_v0 = vpack.c.bf16 %v506_v50, %v504_v39  ;;  %v6308_v39 = vld [vmem:[%s8844_s1 + $0x240] ss:$40 sps:$4 sm:$0xff]   ;;  %v711_v50 = vpack.c.bf16 %v519_v36, %v517_v34 }
  0x7b   : > { %v624_v54 = vpack.c.bf16 %v346_v47, %v344_v42  ;;  %3409 = vmatprep.subr.bf16.mxu1 %v625_v41  ;;  %v6309_v41 = vld [vmem:[%s8844_s1 + $0x284] ss:$40 sps:$4 sm:$0xff]   ;;  %v6311_v42 = vld [vmem:[%s8844_s1 + $0x294] ss:$40 sps:$4 sm:$0xff]   ;;  %v6314_v10 = vld [vmem:[%s8844_s1 + $0x290] ss:$40 sps:$4 sm:$0xff]  }
  0x7c   : > { %v6315_v11 = vld [vmem:[%s8844_s1 + $0x2d4] ss:$40 sps:$4 sm:$0xff]  }
  0x7d   : > { %4126 = vmatpush1.bf16.msra.mxu0 %v698_v62  ;;  %v6305_v62 = vld [vmem:[%s8844_s1 + $0x244] ss:$40 sps:$4 sm:$0xff]   ;;  %3410 = vmatpush1.bf16.msra.mxu1 %v624_v54  ;;  %v518_v54 = vld [vmem:[%s6832_s29 + $0x7f0] sm:$0xff] }
  0x7e   : > { %4127 = vmatprep.subr.bf16.mxu0 %v701_v4  ;;  %v707_v4 = vpack.c.bf16 %v511_v59, %v509_v56  ;;  %v523_v56 = vld [vmem:[%s6832_s29 + $0x818] sm:$0xff] }
  0x7f   : > { %3131 = vmatmul.mubr.bf16.gmra.mrb[20].mxu1 %v6295_v61  ;;  %v6303_v61 = vld [vmem:[%s8844_s1 + $0x234] ss:$40 sps:$4 sm:$0xff]  }
  0x80   : > { %3837 = vmatmul.mubr.bf16.gmra.mrb[20].mxu0 %v6296_v3  ;;  %3140 = vmatprep.mubr.bf16.mxu1 %v6297_v17  ;;  %v508_v3 = vld [vmem:[%s6832_s29 + $0x7a0] sm:$0xff]  ;;  %v351_v17 = vld [vmem:[%s6832_s29 + $0x2b8] sm:$0xff] }
  0x81   : > { %3846 = vmatprep.mubr.bf16.mxu0 %v6299_v18  ;;  %4128 = vmatpush1.bf16.msra.mxu0 %v700_v22  ;;  %v6307_v18 = vld [vmem:[%s8844_s1 + $0x230] ss:$40 sps:$4 sm:$0xff]   ;;  %v706_v22 = vpack.c.bf16 %v510_v5, %v508_v3  ;;  %v627_v24 = vpack.c.bf16 %v351_v17, %v349_v12  ;;  %v357_v17 = vld [vmem:[%s6832_s29 + $0x2e8] sm:$0xff]  ;;  %v6323_v36 = vld [vmem:[%s8844_s1 + $0x334] ss:$40 sps:$4 sm:$0xff]  }
  0x82   : > { %4129 = vmatprep.subr.bf16.mxu0 %v703_v23  ;;  %v514_v23 = vld [vmem:[%s6832_s29 + $0x7d0] sm:$0xff] }
  0x83   : > { %3411 = vmatprep.subr.bf16.mxu1 %v627_v24  ;;  %v708_v47 = vpack.c.bf16 %v514_v23, %v512_v13  ;;  %v354_v5 = vld [vmem:[%s6832_s29 + $0x2d0] sm:$0xff]  ;;  %v6317_v13 = vld [vmem:[%s8844_s1 + $0x2e4] ss:$40 sps:$4 sm:$0xff]  }
  0x84   : > { %v356_v24 = vld [vmem:[%s6832_s29 + $0x2e0] sm:$0xff] }
  0x85   : > { %4130 = vmatpush1.bf16.msra.mxu0 %v702_v38  ;;  %v626_v38 = vpack.c.bf16 %v350_v31, %v348_v30  ;;  %v6320_v30 = vld [vmem:[%s8844_s1 + $0x2e0] ss:$40 sps:$4 sm:$0xff]   ;;  %v6321_v31 = vld [vmem:[%s8844_s1 + $0x324] ss:$40 sps:$4 sm:$0xff]  }
  0x86   : > { %4131 = vmatprep.subr.bf16.mxu0 %v705_v48  ;;  %v516_v48 = vld [vmem:[%s6832_s29 + $0x7e0] sm:$0xff] }
  0x87   : > { %3141 = vmatmul.mubr.bf16.gmra.mrb[24].mxu1 %v6301_v55  ;;  %v521_v55 = vld [vmem:[%s6832_s29 + $0x808] sm:$0xff]  ;;  %v710_v59 = vpack.c.bf16 %v518_v54, %v516_v48  ;;  %v360_v48 = vld [vmem:[%s6832_s29 + $0x300] sm:$0xff]  ;;  %v6327_v54 = vld [vmem:[%s8844_s1 + $0x374] ss:$40 sps:$4 sm:$0xff]  }
  0x88   : > { %3847 = vmatmul.mubr.bf16.gmra.mrb[24].mxu0 %v6302_v60  ;;  %3150 = vmatprep.mubr.bf16.mxu1 %v6303_v61  ;;  %v353_v60 = vld [vmem:[%s6832_s29 + $0x2c8] sm:$0xff]  ;;  %v355_v61 = vld [vmem:[%s6832_s29 + $0x2d8] sm:$0xff] }
  0x89   : > { %3856 = vmatprep.mubr.bf16.mxu0 %v6305_v62  ;;  %4132 = vmatpush1.bf16.msra.mxu0 %v704_v0  ;;  %v6313_v62 = vld [vmem:[%s8844_s1 + $0x280] ss:$40 sps:$4 sm:$0xff]   ;;  %v713_v0 = vpack.c.bf16 %v523_v56, %v521_v55  ;;  %v629_v3 = vpack.c.bf16 %v355_v61, %v353_v60  ;;  %v6329_v55 = vld [vmem:[%s8844_s1 + $0x384] ss:$40 sps:$4 sm:$0xff]  }
  0x8a   : > { %4133 = vmatprep.subr.bf16.mxu0 %v707_v4  ;;  %3412 = vmatpush1.bf16.msra.mxu1 %v626_v38  ;;  %v352_v4 = vld [vmem:[%s6832_s29 + $0x2c0] sm:$0xff] }
  0x8b   : > { %3413 = vmatprep.subr.bf16.mxu1 %v629_v3  ;;  %v628_v12 = vpack.c.bf16 %v354_v5, %v352_v4  ;;  %v6325_v38 = vld [vmem:[%s8844_s1 + $0x320] ss:$40 sps:$4 sm:$0xff]   ;;  %v6333_v61 = vld [vmem:[%s8844_s1 + $0x3c4] ss:$40 sps:$4 sm:$0xff]   ;;  %v367_v4 = vld [vmem:[%s6832_s29 + $0x338] sm:$0xff] }
  0x8c   : > { %v6332_v60 = vld [vmem:[%s8844_s1 + $0x380] ss:$40 sps:$4 sm:$0xff]   ;;  %v6338_v5 = vld [vmem:[%s8844_s1 + $0x3d0] ss:$40 sps:$4 sm:$0xff]  }
  0x8d   : > { %4134 = vmatpush1.bf16.msra.mxu0 %v706_v22  ;;  %v6319_v22 = vld [vmem:[%s8844_s1 + $0x2d0] ss:$40 sps:$4 sm:$0xff]   ;;  %v365_v3 = vld [vmem:[%s6832_s29 + $0x328] sm:$0xff] }
  0x8e   : > { %4135 = vmatprep.subr.bf16.mxu0 %v709_v26  ;;  %3414 = vmatpush1.bf16.msra.mxu1 %v628_v12  ;;  %v358_v26 = vld [vmem:[%s6832_s29 + $0x2f0] sm:$0xff] }
  0x8f   : > { %3151 = vmatmul.mubr.bf16.gmra.mrb[28].mxu1 %v6307_v18  ;;  %v359_v18 = vld [vmem:[%s6832_s29 + $0x2f8] sm:$0xff]  ;;  %v630_v34 = vpack.c.bf16 %v358_v26, %v356_v24  ;;  %v366_v12 = vld [vmem:[%s6832_s29 + $0x330] sm:$0xff]  ;;  %v6345_v24 = vld [vmem:[%s8844_s1 + $0x464] ss:$40 sps:$4 sm:$0xff]  }
  0x90   : > { %3857 = vmatmul.mubr.bf16.gmra.mrb[28].mxu0 %v6308_v39  ;;  %3160 = vmatprep.mubr.bf16.mxu1 %v6309_v41  ;;  %v631_v23 = vpack.c.bf16 %v359_v18, %v357_v17  ;;  %v361_v39 = vld [vmem:[%s6832_s29 + $0x308] sm:$0xff]  ;;  %v363_v41 = vld [vmem:[%s6832_s29 + $0x318] sm:$0xff] }
  0x91   : > { %3866 = vmatprep.mubr.bf16.mxu0 %v6311_v42  ;;  %4136 = vmatpush1.bf16.msra.mxu0 %v708_v47  ;;  %v6326_v42 = vld [vmem:[%s8844_s1 + $0x330] ss:$40 sps:$4 sm:$0xff]   ;;  %v633_v47 = vpack.c.bf16 %v363_v41, %v361_v39  ;;  %v6341_v17 = vld [vmem:[%s8844_s1 + $0x424] ss:$40 sps:$4 sm:$0xff]   ;;  %v6347_v26 = vld [vmem:[%s8844_s1 + $0x474] ss:$40 sps:$4 sm:$0xff]  }
  0x92   : > { %4137 = vmatprep.subr.bf16.mxu0 %v711_v50  ;;  %3415 = vmatprep.subr.bf16.mxu1 %v631_v23  ;;  %v362_v50 = vld [vmem:[%s6832_s29 + $0x310] sm:$0xff]  ;;  %v6344_v23 = vld [vmem:[%s8844_s1 + $0x420] ss:$40 sps:$4 sm:$0xff]  }
  0x93   : > { %3416 = vmatpush1.bf16.msra.mxu1 %v630_v34  ;;  %v632_v56 = vpack.c.bf16 %v362_v50, %v360_v48  ;;  %v6349_v41 = vld [vmem:[%s8844_s1 + $0x460] ss:$40 sps:$4 sm:$0xff]   ;;  %v6350_v48 = vld [vmem:[%s8844_s1 + $0x470] ss:$40 sps:$4 sm:$0xff]  }
  0x94   : > { %3417 = vmatprep.subr.bf16.mxu1 %v633_v47  ;;  %v375_v47 = vld [vmem:[%s6832_s29 + $0x378] sm:$0xff] }
  0x95   : > { %4138 = vmatpush1.bf16.msra.mxu0 %v710_v59  ;;  %v6331_v59 = vld [vmem:[%s8844_s1 + $0x370] ss:$40 sps:$4 sm:$0xff]  }
  0x96   : > { %4460 = vmatprep.subr.bf16.mxu0 %v713_v0  ;;  %v6337_v0 = vld [vmem:[%s8844_s1 + $0x3c0] ss:$40 sps:$4 sm:$0xff]  }
  0x97   : > { %3161 = vmatmul.mubr.bf16.gmra.mrb[32].mxu1 %v6313_v62  ;;  %v6335_v62 = vld [vmem:[%s8844_s1 + $0x3d4] ss:$40 sps:$4 sm:$0xff]  }
  0x98   : > { %3867 = vmatmul.mubr.bf16.gmra.mrb[32].mxu0 %v6314_v10  ;;  %3170 = vmatprep.mubr.bf16.mxu1 %v6315_v11  ;;  %v635_v10 = vpack.c.bf16 %v367_v4, %v365_v3  ;;  %v364_v11 = vld [vmem:[%s6832_s29 + $0x320] sm:$0xff]  ;;  %v378_v4 = vld [vmem:[%s6832_s29 + $0x390] sm:$0xff] }
  0x99   : > { %3876 = vmatprep.mubr.bf16.mxu0 %v6317_v13  ;;  %3418 = vmatpush1.bf16.msra.mxu1 %v632_v56  ;;  %v6339_v13 = vld [vmem:[%s8844_s1 + $0x414] ss:$40 sps:$4 sm:$0xff]   ;;  %v634_v18 = vpack.c.bf16 %v366_v12, %v364_v11  ;;  %v376_v3 = vld [vmem:[%s6832_s29 + $0x380] sm:$0xff] }
  0x9a   : > { %3419 = vmatprep.subr.bf16.mxu1 %v635_v10  ;;  %v6351_v56 = vld [vmem:[%s8844_s1 + $0x4b4] ss:$40 sps:$4 sm:$0xff]   ;;  %v381_v10 = vld [vmem:[%s6832_s29 + $0x3a8] sm:$0xff]  ;;  %v380_v12 = vld [vmem:[%s6832_s29 + $0x3a0] sm:$0xff] }
  0x9b   : > { %v383_v11 = vld [vmem:[%s6832_s29 + $0x3b8] sm:$0xff] }
  0x9d   : > { %3420 = vmatpush1.bf16.msra.mxu1 %v634_v18  ;;  %v382_v18 = vld [vmem:[%s6832_s29 + $0x3b0] sm:$0xff] }
  0x9f   : > { %3171 = vmatmul.mubr.bf16.gmra.mrb[36].mxu1 %v6319_v22  ;;  %v6343_v22 = vld [vmem:[%s8844_s1 + $0x410] ss:$40 sps:$4 sm:$0xff]  }
  0xa0   : > { %3877 = vmatmul.mubr.bf16.gmra.mrb[36].mxu0 %v6320_v30  ;;  %3180 = vmatprep.mubr.bf16.mxu1 %v6321_v31  ;;  %v369_v30 = vld [vmem:[%s6832_s29 + $0x348] sm:$0xff]  ;;  %v371_v31 = vld [vmem:[%s6832_s29 + $0x358] sm:$0xff] }
  0xa1   : > { %3886 = vmatprep.mubr.bf16.mxu0 %v6323_v36  ;;  %v637_v34 = vpack.c.bf16 %v371_v31, %v369_v30  ;;  %v368_v36 = vld [vmem:[%s6832_s29 + $0x340] sm:$0xff]  ;;  %v385_v30 = vld [vmem:[%s6832_s29 + $0x3c8] sm:$0xff]  ;;  %v387_v31 = vld [vmem:[%s6832_s29 + $0x3d8] sm:$0xff] }
  0xa3   : > { %3421 = vmatprep.subr.bf16.mxu1 %v637_v34  ;;  %v645_v34 = vpack.c.bf16 %v387_v31, %v385_v30  ;;  %v522_v30 = vld [vmem:[%s6832_s29 + $0x810] sm:$0xff] }
  0xa4   : > { %v6392_v31 = vld [vmem:[%s8844_s1 + $0x690] ss:$40 sps:$4 sm:$0xff]  }
  0xa7   : > { %3181 = vmatmul.mubr.bf16.gmra.mrb[40].mxu1 %v6325_v38  ;;  %v370_v38 = vld [vmem:[%s6832_s29 + $0x350] sm:$0xff] }
  0xa8   : > { %3887 = vmatmul.mubr.bf16.gmra.mrb[40].mxu0 %v6326_v42  ;;  %3190 = vmatprep.mubr.bf16.mxu1 %v6327_v54  ;;  %v636_v39 = vpack.c.bf16 %v370_v38, %v368_v36  ;;  %v373_v42 = vld [vmem:[%s6832_s29 + $0x368] sm:$0xff]  ;;  %v372_v54 = vld [vmem:[%s6832_s29 + $0x360] sm:$0xff]  ;;  %v386_v38 = vld [vmem:[%s6832_s29 + $0x3d0] sm:$0xff] }
  0xa9   : > { %3896 = vmatprep.mubr.bf16.mxu0 %v6329_v55  ;;  %v639_v50 = vpack.c.bf16 %v375_v47, %v373_v42  ;;  %v374_v55 = vld [vmem:[%s6832_s29 + $0x370] sm:$0xff]  ;;  %v384_v36 = vld [vmem:[%s6832_s29 + $0x3c0] sm:$0xff]  ;;  %v389_v42 = vld [vmem:[%s6832_s29 + $0x3e8] sm:$0xff] }
  0xaa   : > { %3422 = vmatpush1.bf16.msra.mxu1 %v636_v39  ;;  %v644_v39 = vpack.c.bf16 %v386_v38, %v384_v36  ;;  %v391_v47 = vld [vmem:[%s6832_s29 + $0x3f8] sm:$0xff] }
  0xab   : > { %3423 = vmatprep.subr.bf16.mxu1 %v639_v50  ;;  %v647_v50 = vpack.c.bf16 %v391_v47, %v389_v42  ;;  %v527_v36 = vld [vmem:[%s6832_s29 + $0x838] sm:$0xff]  ;;  %v524_v42 = vld [vmem:[%s6832_s29 + $0x820] sm:$0xff]  ;;  %v526_v47 = vld [vmem:[%s6832_s29 + $0x830] sm:$0xff] }
  0xac   : > { %v6389_v38 = vld [vmem:[%s8844_s1 + $0x18] ss:$40 sps:$4 sm:$0xff]  }
  0xaf   : > { %3191 = vmatmul.mubr.bf16.gmra.mrb[44].mxu1 %v6331_v59  ;;  %v6353_v59 = vld [vmem:[%s8844_s1 + $0x4c4] ss:$40 sps:$4 sm:$0xff]  }
  0xb0   : > { %3897 = vmatmul.mubr.bf16.gmra.mrb[44].mxu0 %v6332_v60  ;;  %3200 = vmatprep.mubr.bf16.mxu1 %v6333_v61  ;;  %v638_v60 = vpack.c.bf16 %v374_v55, %v372_v54  ;;  %v377_v61 = vld [vmem:[%s6832_s29 + $0x388] sm:$0xff]  ;;  %v388_v54 = vld [vmem:[%s6832_s29 + $0x3e0] sm:$0xff]  ;;  %v390_v55 = vld [vmem:[%s6832_s29 + $0x3f0] sm:$0xff] }
  0xb1   : > { %3906 = vmatprep.mubr.bf16.mxu0 %v6335_v62  ;;  %v379_v62 = vld [vmem:[%s6832_s29 + $0x398] sm:$0xff] }
  0xb2   : > { %3424 = vmatpush1.bf16.msra.mxu1 %v638_v60  ;;  %v646_v60 = vpack.c.bf16 %v390_v55, %v388_v54  ;;  %v531_v55 = vld [vmem:[%s6832_s29 + $0x858] sm:$0xff] }
  0xb7   : > { %3201 = vmatmul.mubr.bf16.gmra.mrb[48].mxu1 %v6337_v0  ;;  %v641_v0 = vpack.c.bf16 %v379_v62, %v377_v61  ;;  %v6367_v61 = vld [vmem:[%s8844_s1 + $0x550] ss:$40 sps:$4 sm:$0xff]   ;;  %v6368_v62 = vld [vmem:[%s8844_s1 + $0x560] ss:$40 sps:$4 sm:$0xff]  }
  0xb8   : > { %3907 = vmatmul.mubr.bf16.gmra.mrb[48].mxu0 %v6338_v5  ;;  %3210 = vmatprep.mubr.bf16.mxu1 %v6339_v13  ;;  %v640_v5 = vpack.c.bf16 %v378_v4, %v376_v3  ;;  %v6355_v13 = vld [vmem:[%s8844_s1 + $0x4b0] ss:$40 sps:$4 sm:$0xff]   ;;  %v6371_v3 = vld [vmem:[%s8844_s1 + $0x5b4] ss:$40 sps:$4 sm:$0xff]  }
  0xb9   : > { %3916 = vmatprep.mubr.bf16.mxu0 %v6341_v17  ;;  %3425 = vmatprep.subr.bf16.mxu1 %v641_v0  ;;  %v643_v17 = vpack.c.bf16 %v383_v11, %v381_v10  ;;  %v6369_v0 = vld [vmem:[%s8844_s1 + $0x5a4] ss:$40 sps:$4 sm:$0xff]   ;;  %v6374_v4 = vld [vmem:[%s8844_s1 + $0x5b0] ss:$40 sps:$4 sm:$0xff]  }
  0xba   : > { %3426 = vmatpush1.bf16.msra.mxu1 %v640_v5  ;;  %v6375_v5 = vld [vmem:[%s8844_s1 + $0x5f4] ss:$40 sps:$4 sm:$0xff]   ;;  %v6377_v10 = vld [vmem:[%s8844_s1 + $0x604] ss:$40 sps:$4 sm:$0xff]   ;;  %v6379_v11 = vld [vmem:[%s8844_s1 + $0x5f0] ss:$40 sps:$4 sm:$0xff]  }
  0xbb   : > { %3427 = vmatprep.subr.bf16.mxu1 %v643_v17  ;;  %v6383_v17 = vld [vmem:[%s8844_s1 + $0x654] ss:$40 sps:$4 sm:$0xff]  }
  0xbf   : > { %3211 = vmatmul.mubr.bf16.gmra.mrb[52].mxu1 %v6343_v22  ;;  %v6356_v22 = vld [vmem:[%s8844_s1 + $0x4c0] ss:$40 sps:$4 sm:$0xff]  }
  0xc0   : > { %3917 = vmatmul.mubr.bf16.gmra.mrb[52].mxu0 %v6344_v23  ;;  %3220 = vmatprep.mubr.bf16.mxu1 %v6345_v24  ;;  %v6357_v23 = vld [vmem:[%s8844_s1 + $0x504] ss:$40 sps:$4 sm:$0xff]   ;;  %v642_v24 = vpack.c.bf16 %v382_v18, %v380_v12  ;;  %v6380_v12 = vld [vmem:[%s8844_s1 + $0x600] ss:$40 sps:$4 sm:$0xff]  }
  0xc1   : > { %3926 = vmatprep.mubr.bf16.mxu0 %v6347_v26  ;;  %v6359_v26 = vld [vmem:[%s8844_s1 + $0x514] ss:$40 sps:$4 sm:$0xff]   ;;  %v6385_v18 = vld [vmem:[%s8844_s1 + $0x640] ss:$40 sps:$4 sm:$0xff]  }
  0xc2   : > { %3428 = vmatpush1.bf16.msra.mxu1 %v642_v24  ;;  %v6391_v24 = vld [vmem:[%s8844_s1 + $0x1c] ss:$40 sps:$4 sm:$0xff]  }
  0xc3   : > { %3429 = vmatprep.subr.bf16.mxu1 %v645_v34  ;;  %v525_v34 = vld [vmem:[%s6832_s29 + $0x828] sm:$0xff] }
  0xc4   : > { %v715_v54 = vpack.c.bf16 %v527_v36, %v525_v34  ;;  %v6404_v34 = vld [vmem:[%s8844_s1 + $0xb8] ss:$40 sps:$4 sm:$0xff]   ;;  %v6405_v36 = vld [vmem:[%s8844_s1 + $0x784] ss:$40 sps:$4 sm:$0xff]  }
  0xc6   : > { %3430 = vmatpush1.bf16.msra.mxu1 %v644_v39  ;;  %v6393_v39 = vld [vmem:[%s8844_s1 + $0x6e4] ss:$40 sps:$4 sm:$0xff]  }
  0xc7   : > { %3221 = vmatmul.mubr.bf16.gmra.mrb[56].mxu1 %v6349_v41  ;;  %v6361_v41 = vld [vmem:[%s8844_s1 + $0x500] ss:$40 sps:$4 sm:$0xff]   ;;  %3431 = vmatprep.subr.bf16.mxu1 %v647_v50 }
  0xc8   : > { %3927 = vmatmul.mubr.bf16.gmra.mrb[56].mxu0 %v6350_v48  ;;  %3230 = vmatprep.mubr.bf16.mxu1 %v6351_v56  ;;  %v6362_v48 = vld [vmem:[%s8844_s1 + $0x510] ss:$40 sps:$4 sm:$0xff]   ;;  %v6363_v56 = vld [vmem:[%s8844_s1 + $0x554] ss:$40 sps:$4 sm:$0xff]   ;;  %v529_v50 = vld [vmem:[%s6832_s29 + $0x848] sm:$0xff] }
  0xc9   : > { %3936 = vmatprep.mubr.bf16.mxu0 %v6353_v59  ;;  %v6365_v59 = vld [vmem:[%s8844_s1 + $0x564] ss:$40 sps:$4 sm:$0xff]  }
  0xca   : > { %3432 = vmatpush1.bf16.msra.mxu1 %v646_v60  ;;  %v528_v60 = vld [vmem:[%s6832_s29 + $0x840] sm:$0xff] }
  0xcb   : > { %5553 = vmatprep.subr.bf16.mxu1 %v6840_v9  ;;  %v6373_v9 = vld [vmem:[%s8844_s1 + $0x5a0] ss:$40 sps:$4 sm:$0xff]  }
  0xcf   : > { %3231 = vmatmul.mubr.bf16.gmra.mrb[60].mxu1 %v6355_v13  ;;  %v6381_v13 = vld [vmem:[%s8844_s1 + $0x644] ss:$40 sps:$4 sm:$0xff]  }
  0xd0   : > { %3937 = vmatmul.mubr.bf16.gmra.mrb[60].mxu0 %v6356_v22  ;;  %3240 = vmatprep.mubr.bf16.mxu1 %v6357_v23  ;;  %v6386_v22 = vld [vmem:[%s8844_s1 + $0x650] ss:$40 sps:$4 sm:$0xff]   ;;  %v6387_v23 = vld [vmem:[%s8844_s1 + $0x694] ss:$40 sps:$4 sm:$0xff]  }
  0xd1   : > { %3946 = vmatprep.mubr.bf16.mxu0 %v6359_v26  ;;  %v520_v26 = vld [vmem:[%s6832_s29 + $0x800] sm:$0xff] }
  0xd7   : > { %3241 = vmatmul.mubr.bf16.gmra.mrb[64].mxu1 %v6361_v41  ;;  %v6395_v41 = vld [vmem:[%s8844_s1 + $0x6c] ss:$40 sps:$4 sm:$0xff]  }
  0xd8   : > { %3947 = vmatmul.mubr.bf16.gmra.mrb[64].mxu0 %v6362_v48  ;;  %3250 = vmatprep.mubr.bf16.mxu1 %v6363_v56  ;;  %v712_v48 = vpack.c.bf16 %v522_v30, %v520_v26  ;;  %v6397_v56 = vld [vmem:[%s8844_s1 + $0x6e0] ss:$40 sps:$4 sm:$0xff]  }
  0xd9   : > { %3956 = vmatprep.mubr.bf16.mxu0 %v6365_v59  ;;  %v714_v59 = vpack.c.bf16 %v526_v47, %v524_v42  ;;  %v541_v30 = vld [vmem:[%s6832_s29 + $0x8a8] sm:$0xff]  ;;  %v542_v42 = vld [vmem:[%s6832_s29 + $0x8b0] sm:$0xff] }
  0xdf   : > { %3251 = vmatmul.mubr.bf16.gmra.mrb[68].mxu1 %v6367_v61  ;;  %v530_v61 = vld [vmem:[%s6832_s29 + $0x850] sm:$0xff] }
  0xe0   : > { %3957 = vmatmul.mubr.bf16.gmra.mrb[68].mxu0 %v6368_v62  ;;  %3260 = vmatprep.mubr.bf16.mxu1 %v6369_v0  ;;  %v533_v62 = vld [vmem:[%s6832_s29 + $0x868] sm:$0xff] }
  0xe1   : > { %3966 = vmatprep.mubr.bf16.mxu0 %v6371_v3  ;;  %v6398_v0 = vld [vmem:[%s8844_s1 + $0x68] ss:$40 sps:$4 sm:$0xff]   ;;  %v6399_v3 = vld [vmem:[%s8844_s1 + $0x734] ss:$40 sps:$4 sm:$0xff]  }
  0xe7   : > { %3261 = vmatmul.mubr.bf16.gmra.mrb[72].mxu1 %v6373_v9  ;;  %v717_v9 = vpack.c.bf16 %v531_v55, %v529_v50  ;;  %v545_v50 = vld [vmem:[%s6832_s29 + $0x8c8] sm:$0xff] }
  0xe8   : > { %3967 = vmatmul.mubr.bf16.gmra.mrb[72].mxu0 %v6374_v4  ;;  %3270 = vmatprep.mubr.bf16.mxu1 %v6375_v5  ;;  %v535_v4 = vld [vmem:[%s6832_s29 + $0x878] sm:$0xff] }
  0xe9   : > { %3976 = vmatprep.mubr.bf16.mxu0 %v6377_v10  ;;  %v6401_v5 = vld [vmem:[%s8844_s1 + $0xbc] ss:$40 sps:$4 sm:$0xff]  }
  0xea   : > { %v532_v10 = vld [vmem:[%s6832_s29 + $0x860] sm:$0xff] }
  0xef   : > { %3271 = vmatmul.mubr.bf16.gmra.mrb[76].mxu1 %v6379_v11  ;;  %v534_v11 = vld [vmem:[%s6832_s29 + $0x870] sm:$0xff] }
  0xf0   : > { %3977 = vmatmul.mubr.bf16.gmra.mrb[76].mxu0 %v6380_v12  ;;  %3280 = vmatprep.mubr.bf16.mxu1 %v6381_v13  ;;  %v716_v12 = vpack.c.bf16 %v530_v61, %v528_v60  ;;  %v537_v13 = vld [vmem:[%s6832_s29 + $0x888] sm:$0xff]  ;;  %v718_v26 = vpack.c.bf16 %v534_v11, %v532_v10  ;;  %v546_v60 = vld [vmem:[%s6832_s29 + $0x8d0] sm:$0xff]  ;;  %v548_v11 = vld [vmem:[%s6832_s29 + $0x8e0] sm:$0xff] }
  0xf1   : > { %3986 = vmatprep.mubr.bf16.mxu0 %v6383_v17  ;;  %v719_v17 = vpack.c.bf16 %v535_v4, %v533_v62  ;;  %v6409_v61 = vld [vmem:[%s8844_s1 + $0x780] ss:$40 sps:$4 sm:$0xff]   ;;  %v6413_v4 = vld [vmem:[%s8844_s1 + $0x15c] ss:$40 sps:$4 sm:$0xff]  }
  0xf2   : > { %v549_v62 = vld [vmem:[%s6832_s29 + $0x8e8] sm:$0xff] }
  0xf7   : > { %3281 = vmatmul.mubr.bf16.gmra.mrb[80].mxu1 %v6385_v18  ;;  %v539_v18 = vld [vmem:[%s6832_s29 + $0x898] sm:$0xff] }
  0xf8   : > { %3987 = vmatmul.mubr.bf16.gmra.mrb[80].mxu0 %v6386_v22  ;;  %3290 = vmatprep.mubr.bf16.mxu1 %v6387_v23  ;;  %v536_v22 = vld [vmem:[%s6832_s29 + $0x880] sm:$0xff]  ;;  %v538_v23 = vld [vmem:[%s6832_s29 + $0x890] sm:$0xff] }
  0xf9   : > { %4139 = vmatprep.mubr.bf16.mxu0 %v6391_v24  ;;  %v6403_v24 = vld [vmem:[%s8844_s1 + $0x730] ss:$40 sps:$4 sm:$0xff]   ;;  %v720_v47 = vpack.c.bf16 %v538_v23, %v536_v22  ;;  %v552_v23 = vld [vmem:[%s6832_s29 + $0x900] sm:$0xff] }
  0xff   : > { %3291 = vmatmul.mubr.bf16.gmra.mrb[84].mxu1 %v6392_v31  ;;  %v543_v31 = vld [vmem:[%s6832_s29 + $0x8b8] sm:$0xff] }
 0x100   : > { %4140 = vmatmul.mubr.bf16.vlgmr.msra.gmra.mrb[0].mxu0 %v6389_v38  ;;  %3300 = vmatprep.mubr.bf16.mxu1 %v6393_v39  ;;  %v721_v38 = vpack.c.bf16 %v539_v18, %v537_v13  ;;  %v6407_v39 = vld [vmem:[%s8844_s1 + $0x10c] ss:$40 sps:$4 sm:$0xff]  }
 0x101   : > { %4461 = vmatpush1.bf16.msra.mxu0 %v712_v48  ;;  %4149 = vmatprep.mubr.bf16.mxu0 %v6395_v41  ;;  %v540_v41 = vld [vmem:[%s6832_s29 + $0x8a0] sm:$0xff]  ;;  %v723_v48 = vpack.c.bf16 %v543_v31, %v541_v30  ;;  %v553_v13 = vld [vmem:[%s6832_s29 + $0x908] sm:$0xff]  ;;  %v559_v31 = vld [vmem:[%s6832_s29 + $0x938] sm:$0xff] }
 0x102   : > { %4462 = vmatprep.subr.bf16.mxu0 %v715_v54  ;;  %v547_v54 = vld [vmem:[%s6832_s29 + $0x8d8] sm:$0xff]  ;;  %v722_v55 = vpack.c.bf16 %v542_v42, %v540_v41  ;;  %v557_v30 = vld [vmem:[%s6832_s29 + $0x928] sm:$0xff]  ;;  %v556_v42 = vld [vmem:[%s6832_s29 + $0x920] sm:$0xff] }
 0x103   : > { %v731_v41 = vpack.c.bf16 %v559_v31, %v557_v30  ;;  %v6433_v31 = vld [vmem:[%s8844_s1 + $0x8c0] ss:$40 sps:$4 sm:$0xff]  }
 0x105   : > { %4463 = vmatpush1.bf16.msra.mxu0 %v714_v59  ;;  %v544_v59 = vld [vmem:[%s6832_s29 + $0x8c0] sm:$0xff] }
 0x106   : > { %4464 = vmatprep.subr.bf16.mxu0 %v717_v9  ;;  %v6411_v9 = vld [vmem:[%s8844_s1 + $0x7d4] ss:$40 sps:$4 sm:$0xff]  }
 0x107   : > { %3301 = vmatmul.mubr.bf16.gmra.mrb[88].mxu1 %v6397_v56  ;;  %v725_v56 = vpack.c.bf16 %v547_v54, %v545_v50  ;;  %v563_v50 = vld [vmem:[%s6832_s29 + $0x958] sm:$0xff] }
 0x108   : > { %4150 = vmatmul.mubr.bf16.gmra.mrb[4].mxu0 %v6398_v0  ;;  %3310 = vmatprep.mubr.bf16.mxu1 %v6399_v3  ;;  %v551_v0 = vld [vmem:[%s6832_s29 + $0x8f8] sm:$0xff]  ;;  %v6410_v3 = vld [vmem:[%s8844_s1 + $0x108] ss:$40 sps:$4 sm:$0xff]  }
 0x109   : > { %4159 = vmatprep.mubr.bf16.mxu0 %v6401_v5  ;;  %4465 = vmatpush1.bf16.msra.mxu0 %v716_v12  ;;  %v724_v5 = vpack.c.bf16 %v546_v60, %v544_v59  ;;  %v727_v10 = vpack.c.bf16 %v551_v0, %v549_v62  ;;  %v550_v12 = vld [vmem:[%s6832_s29 + $0x8f0] sm:$0xff]  ;;  %v6421_v60 = vld [vmem:[%s8844_s1 + $0x820] ss:$40 sps:$4 sm:$0xff]   ;;  %v6425_v0 = vld [vmem:[%s8844_s1 + $0x1fc] ss:$40 sps:$4 sm:$0xff]  }
 0x10a   : > { %4466 = vmatprep.subr.bf16.mxu0 %v719_v17  ;;  %v555_v17 = vld [vmem:[%s6832_s29 + $0x918] sm:$0xff]  ;;  %v726_v18 = vpack.c.bf16 %v550_v12, %v548_v11  ;;  %v562_v59 = vld [vmem:[%s6832_s29 + $0x950] sm:$0xff]  ;;  %v6429_v11 = vld [vmem:[%s8844_s1 + $0x8c4] ss:$40 sps:$4 sm:$0xff]  }
 0x10b   : > { %v729_v22 = vpack.c.bf16 %v555_v17, %v553_v13  ;;  %v6423_v62 = vld [vmem:[%s8844_s1 + $0x874] ss:$40 sps:$4 sm:$0xff]   ;;  %v1065_v12 = vld [vmem:[%s8845_s2 + $0x8] sm:$0xff] }
 0x10c   : > { %v6431_v13 = vld [vmem:[%s8844_s1 + $0x24c] ss:$40 sps:$4 sm:$0xff]  }
 0x10d   : > { %4467 = vmatpush1.bf16.msra.mxu0 %v718_v26  ;;  %v6415_v26 = vld [vmem:[%s8844_s1 + $0x7d0] ss:$40 sps:$4 sm:$0xff]   ;;  %v565_v17 = vld [vmem:[%s6832_s29 + $0x968] sm:$0xff] }
 0x10e   : > { %4468 = vmatprep.subr.bf16.mxu0 %v721_v38  ;;  %v6419_v38 = vld [vmem:[%s8844_s1 + $0x1ac] ss:$40 sps:$4 sm:$0xff]  }
 0x10f   : > { %3311 = vmatmul.mubr.bf16.gmra.mrb[92].mxu1 %v6403_v24  ;;  %v554_v24 = vld [vmem:[%s6832_s29 + $0x910] sm:$0xff] }
 0x110   : > { %4160 = vmatmul.mubr.bf16.gmra.mrb[8].mxu0 %v6404_v34  ;;  %3320 = vmatprep.mubr.bf16.mxu1 %v6405_v36  ;;  %v6416_v34 = vld [vmem:[%s8844_s1 + $0x158] ss:$40 sps:$4 sm:$0xff]   ;;  %v6417_v36 = vld [vmem:[%s8844_s1 + $0x824] ss:$40 sps:$4 sm:$0xff]  }
 0x111   : > { %4169 = vmatprep.mubr.bf16.mxu0 %v6407_v39  ;;  %4469 = vmatpush1.bf16.msra.mxu0 %v720_v47  ;;  %v728_v39 = vpack.c.bf16 %v554_v24, %v552_v23  ;;  %v558_v47 = vld [vmem:[%s6832_s29 + $0x930] sm:$0xff] }
 0x112   : > { %4470 = vmatprep.subr.bf16.mxu0 %v723_v48  ;;  %v561_v48 = vld [vmem:[%s6832_s29 + $0x948] sm:$0xff]  ;;  %v730_v54 = vpack.c.bf16 %v558_v47, %v556_v42  ;;  %v566_v24 = vld [vmem:[%s6832_s29 + $0x970] sm:$0xff] }
 0x113   : > { %v1069_v42 = vld [vmem:[%s8845_s2 + $0x28] sm:$0xff]  ;;  %v6439_v47 = vld [vmem:[%s8844_s1 + $0x910] ss:$40 sps:$4 sm:$0xff]  }
 0x115   : > { %4471 = vmatpush1.bf16.msra.mxu0 %v722_v55  ;;  %v733_v55 = vpack.c.bf16 %v563_v50, %v561_v48  ;;  %v6440_v48 = vld [vmem:[%s8844_s1 + $0x298] ss:$40 sps:$4 sm:$0xff]   ;;  %v6441_v50 = vld [vmem:[%s8844_s1 + $0x964] ss:$40 sps:$4 sm:$0xff]  }
 0x116   : > { %4472 = vmatprep.subr.bf16.mxu0 %v725_v56  ;;  %v560_v56 = vld [vmem:[%s6832_s29 + $0x940] sm:$0xff] }
 0x117   : > { %3321 = vmatmul.mubr.bf16.gmra.mrb[96].mxu1 %v6409_v61  ;;  %v6422_v61 = vld [vmem:[%s8844_s1 + $0x1a8] ss:$40 sps:$4 sm:$0xff]  }
 0x118   : > { %4170 = vmatmul.mubr.bf16.gmra.mrb[12].mxu0 %v6410_v3  ;;  %3330 = vmatprep.mubr.bf16.mxu1 %v6411_v9  ;;  %v732_v3 = vpack.c.bf16 %v562_v59, %v560_v56  ;;  %v1064_v9 = vld [vmem:[%s8845_s2] sm:$0xff]  ;;  %v571_v56 = vld [vmem:[%s6832_s29 + $0x998] sm:$0xff] }
 0x119   : > { %4179 = vmatprep.mubr.bf16.mxu0 %v6413_v4  ;;  %4473 = vmatpush1.bf16.msra.mxu0 %v724_v5  ;;  %v6771_v4 = vmov 0   ;;  %v6427_v5 = vld [vmem:[%s8844_s1 + $0x870] ss:$40 sps:$4 sm:$0xff]   ;;  %v568_v59 = vld [vmem:[%s6832_s29 + $0x980] sm:$0xff] }
 0x11a   : > { %4474 = vmatprep.subr.bf16.mxu0 %v727_v10  ;;  %6259 = vset.pattern.permute.xlu0 %v6771_v4  ;;  %v6428_v10 = vld [vmem:[%s8844_s1 + $0x1f8] ss:$40 sps:$4 sm:$0xff]  }
 0x11b   : > { %6260 = vset.pattern.permute.xlu1 %v6771_v4  ;;  %1130 = vperm.xlu0 %6259, %v1064_v9   ;;  %v6445_v9 = vld [vmem:[%s8844_s1 + $0x960] ss:$40 sps:$4 sm:$0xff]  }
 0x11c   : > { %v6446_v4 = vld [vmem:[%s8844_s1 + $0x2e8] ss:$40 sps:$4 sm:$0xff]  }
 0x11d   : > { %4475 = vmatpush1.bf16.msra.mxu0 %v726_v18  ;;  %v567_v18 = vld [vmem:[%s6832_s29 + $0x978] sm:$0xff] }
 0x11e   : > { %4476 = vmatprep.subr.bf16.mxu0 %v729_v22  ;;  %v564_v22 = vld [vmem:[%s6832_s29 + $0x960] sm:$0xff]  ;;  %v735_v23 = vpack.c.bf16 %v567_v18, %v565_v17  ;;  %v6455_v18 = vld [vmem:[%s8844_s1 + $0xc] ss:$40 sps:$4 sm:$0xff]  }
 0x11f   : > { %3331 = vmatmul.mubr.bf16.gmra.mrb[100].mxu1 %v6415_v26  ;;  %1135 = vperm.xlu0 %6259, %v1065_v12   ;;  %v1066_v26 = vld [vmem:[%s8845_s2 + $0x10] sm:$0xff]  ;;  %v734_v30 = vpack.c.bf16 %v566_v24, %v564_v22  ;;  %v1073_v12 = vld [vmem:[%s8845_s2 + $0x48] sm:$0xff]  ;;  %v6452_v17 = vld [vmem:[%s8844_s1 + $0x338] ss:$40 sps:$4 sm:$0xff]  }
 0x120   : > { %4180 = vmatmul.mubr.bf16.gmra.mrb[16].mxu0 %v6416_v34  ;;  %3340 = vmatprep.mubr.bf16.mxu1 %v6417_v36  ;;  %v1067_v34 = vld [vmem:[%s8845_s2 + $0x18] sm:$0xff]  ;;  %v6434_v36 = vld [vmem:[%s8844_s1 + $0x248] ss:$40 sps:$4 sm:$0xff]   ;;  %v6456_v22 = vld [vmem:[%s8844_s1 + $0x38c] ss:$40 sps:$4 sm:$0xff]  }
 0x121   : > { %4189 = vmatprep.mubr.bf16.mxu0 %v6419_v38  ;;  %4477 = vmatpush1.bf16.msra.mxu0 %v728_v39  ;;  %v6435_v38 = vld [vmem:[%s8844_s1 + $0x914] ss:$40 sps:$4 sm:$0xff]  }
 0x122   : > { %4478 = vmatprep.subr.bf16.mxu0 %v731_v41  ;;  %1140 = vperm.xlu1 %6260, %v1066_v26   ;;  %v6437_v39 = vld [vmem:[%s8844_s1 + $0x29c] ss:$40 sps:$4 sm:$0xff]  }
 0x123   : > { %v1068_v41 = vld [vmem:[%s8845_s2 + $0x20] sm:$0xff]  ;;  %v575_v24 = vld [vmem:[%s6832_s29 + $0x9b8] sm:$0xff] }
 0x124   : > { %1150 = vperm.xlu0 %6259, %v1068_v41   ;;  %v572_v26 = vld [vmem:[%s6832_s29 + $0x9a0] sm:$0xff]  ;;  %v6458_v41 = vld [vmem:[%s8844_s1 + $0x388] ss:$40 sps:$4 sm:$0xff]  }
 0x125   : > { %4479 = vmatpush1.bf16.msra.mxu0 %v730_v54  ;;  %v6443_v54 = vld [vmem:[%s8844_s1 + $0x2ec] ss:$40 sps:$4 sm:$0xff]  }
 0x126   : > { %4480 = vmatprep.subr.bf16.mxu0 %v733_v55  ;;  %1145 = vperm.xlu1 %6260, %v1067_v34   ;;  %v569_v55 = vld [vmem:[%s6832_s29 + $0x988] sm:$0xff]  ;;  %v1074_v34 = vld [vmem:[%s8845_s2 + $0x50] sm:$0xff] }
 0x127   : > { %3341 = vmatmul.mubr.bf16.gmra.mrb[104].mxu1 %v6421_v60  ;;  %v737_v60 = vpack.c.bf16 %v571_v56, %v569_v55  ;;  %v6464_v55 = vld [vmem:[%s8844_s1 + $0x3d8] ss:$40 sps:$4 sm:$0xff]   ;;  %v6465_v56 = vld [vmem:[%s8844_s1 + $0xac] ss:$40 sps:$4 sm:$0xff]  }
 0x128   : > { %4190 = vmatmul.mubr.bf16.gmra.mrb[20].mxu0 %v6422_v61  ;;  %3350 = vmatprep.mubr.bf16.mxu1 %v6423_v62  ;;  %v570_v61 = vld [vmem:[%s6832_s29 + $0x990] sm:$0xff] }
 0x129   : > { %4199 = vmatprep.mubr.bf16.mxu0 %v6425_v0  ;;  %4481 = vmatpush1.bf16.msra.mxu0 %v732_v3  ;;  %v1070_v62 = vld [vmem:[%s8845_s2 + $0x30] sm:$0xff]  ;;  %v1071_v0 = vld [vmem:[%s8845_s2 + $0x38] sm:$0xff]  ;;  %v736_v3 = vpack.c.bf16 %v570_v61, %v568_v59 }
 0x12a   : > { %4482 = vmatprep.subr.bf16.mxu0 %v735_v23  ;;  %1155 = vperm.xlu1 %6260, %v1069_v42   ;;  %v573_v23 = vld [vmem:[%s6832_s29 + $0x9a8] sm:$0xff]  ;;  %v6459_v42 = vld [vmem:[%s8844_s1 + $0x5c] ss:$40 sps:$4 sm:$0xff]  }
 0x12b   : > { %1160 = vperm.xlu0 %6259, %v1070_v62   ;;  %v579_v59 = vld [vmem:[%s6832_s29 + $0x9d8] sm:$0xff]  ;;  %v578_v62 = vld [vmem:[%s6832_s29 + $0x9d0] sm:$0xff] }
 0x12d   : > { %4483 = vmatpush1.bf16.msra.mxu0 %v734_v30  ;;  %v739_v30 = vpack.c.bf16 %v575_v24, %v573_v23  ;;  %v6482_v23 = vld [vmem:[%s8844_s1 + $0x4c8] ss:$40 sps:$4 sm:$0xff]   ;;  %v6483_v24 = vld [vmem:[%s8844_s1 + $0x19c] ss:$40 sps:$4 sm:$0xff]  }
 0x12e   : > { %1165 = vperm.xlu1 %6260, %v1071_v0   ;;  %4484 = vmatprep.subr.bf16.mxu0 %v737_v60  ;;  %v576_v60 = vld [vmem:[%s6832_s29 + $0x9c0] sm:$0xff]  ;;  %v1078_v0 = vld [vmem:[%s8845_s2 + $0x70] sm:$0xff] }
 0x12f   : > { %3351 = vmatmul.mubr.bf16.gmra.mrb[108].mxu1 %v6427_v5  ;;  %v6447_v5 = vld [vmem:[%s8844_s1 + $0x9b4] ss:$40 sps:$4 sm:$0xff]  }
 0x130   : > { %4200 = vmatmul.mubr.bf16.gmra.mrb[24].mxu0 %v6428_v10  ;;  %3360 = vmatprep.mubr.bf16.mxu1 %v6429_v11  ;;  %v6449_v10 = vld [vmem:[%s8844_s1 + $0x33c] ss:$40 sps:$4 sm:$0xff]  }
 0x131   : > { %4209 = vmatprep.mubr.bf16.mxu0 %v6431_v13  ;;  %4485 = vmatpush1.bf16.msra.mxu0 %v736_v3  ;;  %v1072_v11 = vld [vmem:[%s8845_s2 + $0x40] sm:$0xff]  ;;  %v6451_v13 = vld [vmem:[%s8844_s1 + $0x9b0] ss:$40 sps:$4 sm:$0xff]  }
 0x132   : > { %1170 = vperm.xlu0 %6259, %v1072_v11   ;;  %1175 = vperm.xlu1 %6260, %v1073_v12   ;;  %v6469_v3 = vld [vmem:[%s8844_s1 + $0xa8] ss:$40 sps:$4 sm:$0xff]   ;;  %v583_v11 = vld [vmem:[%s6832_s29 + $0x9f8] sm:$0xff]  ;;  %v580_v12 = vld [vmem:[%s6832_s29 + $0x9e0] sm:$0xff] }
 0x133   : > { %4486 = vmatprep.subr.bf16.mxu0 %v739_v30  ;;  %v6489_v30 = vld [vmem:[%s8844_s1 + $0x1ec] ss:$40 sps:$4 sm:$0xff]  }
 0x136   : > { %1180 = vperm.xlu0 %6259, %v1074_v34   ;;  %v6495_v34 = vld [vmem:[%s8844_s1 + $0x23c] ss:$40 sps:$4 sm:$0xff]  }
 0x137   : > { %3361 = vmatmul.mubr.bf16.gmra.mrb[112].mxu1 %v6433_v31  ;;  %v574_v31 = vld [vmem:[%s6832_s29 + $0x9b0] sm:$0xff] }
 0x138   : > { %4210 = vmatmul.mubr.bf16.gmra.mrb[28].mxu0 %v6434_v36  ;;  %3370 = vmatprep.mubr.bf16.mxu1 %v6435_v38  ;;  %v1075_v36 = vld [vmem:[%s8845_s2 + $0x58] sm:$0xff]  ;;  %v738_v38 = vpack.c.bf16 %v574_v31, %v572_v26  ;;  %v1085_v26 = vld [vmem:[%s8845_s2 + $0xa8] sm:$0xff] }
 0x139   : > { %4219 = vmatprep.mubr.bf16.mxu0 %v6437_v39  ;;  %1185 = vperm.xlu1 %6260, %v1075_v36   ;;  %v6453_v39 = vld [vmem:[%s8844_s1 + $0x8] ss:$40 sps:$4 sm:$0xff]   ;;  %v6491_v31 = vld [vmem:[%s8844_s1 + $0x56c] ss:$40 sps:$4 sm:$0xff]   ;;  %v6497_v36 = vld [vmem:[%s8844_s1 + $0x5bc] ss:$40 sps:$4 sm:$0xff]  }
 0x13a   : > { %4487 = vmatpush1.bf16.msra.mxu0 %v738_v38  ;;  %v6501_v38 = vld [vmem:[%s8844_s1 + $0x28c] ss:$40 sps:$4 sm:$0xff]  }
 0x13f   : > { %3371 = vmatmul.mubr.bf16.gmra.mrb[116].mxu1 %v6439_v47  ;;  %v6461_v47 = vld [vmem:[%s8844_s1 + $0x3dc] ss:$40 sps:$4 sm:$0xff]  }
 0x140   : > { %4220 = vmatmul.mubr.bf16.gmra.mrb[32].mxu0 %v6440_v48  ;;  %3380 = vmatprep.mubr.bf16.mxu1 %v6441_v50  ;;  %v1076_v48 = vld [vmem:[%s8845_s2 + $0x60] sm:$0xff]  ;;  %v1077_v50 = vld [vmem:[%s8845_s2 + $0x68] sm:$0xff] }
 0x141   : > { %4229 = vmatprep.mubr.bf16.mxu0 %v6443_v54  ;;  %1190 = vperm.xlu0 %6259, %v1076_v48   ;;  %v6463_v54 = vld [vmem:[%s8844_s1 + $0x58] ss:$40 sps:$4 sm:$0xff]   ;;  %v6513_v48 = vld [vmem:[%s8844_s1 + $0x32c] ss:$40 sps:$4 sm:$0xff]  }
 0x142   : > { %1195 = vperm.xlu1 %6260, %v1077_v50   ;;  %v6515_v50 = vld [vmem:[%s8844_s1 + $0x6ac] ss:$40 sps:$4 sm:$0xff]  }
 0x145   : > { %1200 = vperm.xlu0 %6259, %v1078_v0   ;;  %v6525_v0 = vld [vmem:[%s8844_s1 + $0x3cc] ss:$40 sps:$4 sm:$0xff]  }
 0x147   : > { %3381 = vmatmul.mubr.bf16.gmra.mrb[120].mxu1 %v6445_v9  ;;  %v6471_v9 = vld [vmem:[%s8844_s1 + $0xfc] ss:$40 sps:$4 sm:$0xff]  }
 0x148   : > { %4230 = vmatmul.mubr.bf16.gmra.mrb[36].mxu0 %v6446_v4  ;;  %3390 = vmatprep.mubr.bf16.mxu1 %v6447_v5  ;;  %v1080_v4 = vld [vmem:[%s8845_s2 + $0x80] sm:$0xff]  ;;  %v1081_v5 = vld [vmem:[%s8845_s2 + $0x88] sm:$0xff] }
 0x149   : > { %4239 = vmatprep.mubr.bf16.mxu0 %v6449_v10  ;;  %1210 = vperm.xlu0 %6259, %v1080_v4   ;;  %v6477_v10 = vld [vmem:[%s8844_s1 + $0x14c] ss:$40 sps:$4 sm:$0xff]   ;;  %v6533_v4 = vld [vmem:[%s8844_s1 + $0x79c] ss:$40 sps:$4 sm:$0xff]  }
 0x14f   : > { %3391 = vmatmul.mubr.bf16.gmra.mrb[124].mxu1 %v6451_v13 }
 0x150   : > { %4240 = vmatmul.mubr.bf16.gmra.mrb[40].mxu0 %v6452_v17  ;;  %3433 = vmatprep.mubr.bf16.mxu1 %v6455_v18  ;;  %v582_v17 = vld [vmem:[%s6832_s29 + $0x9f0] sm:$0xff] }
 0x151   : > { %4249 = vmatprep.mubr.bf16.mxu0 %v6456_v22  ;;  %v1082_v18 = vld [vmem:[%s8845_s2 + $0x90] sm:$0xff]  ;;  %v1083_v22 = vld [vmem:[%s8845_s2 + $0x98] sm:$0xff] }
 0x152   : > { %1220 = vperm.xlu0 %6259, %v1082_v18   ;;  %v6543_v18 = vld [vmem:[%s8844_s1 + $0x4bc] ss:$40 sps:$4 sm:$0xff]  }
 0x157   : > { %3434 = vmatmul.mubr.bf16.vlgmr.msra.gmra.mrb[0].mxu1 %v6453_v39  ;;  %v6503_v39 = vld [vmem:[%s8844_s1 + $0x60c] ss:$40 sps:$4 sm:$0xff]  }
 0x158   : > { %4250 = vmatmul.mubr.bf16.gmra.mrb[44].mxu0 %v6458_v41  ;;  %3443 = vmatprep.mubr.bf16.mxu1 %v6459_v42  ;;  %v6507_v41 = vld [vmem:[%s8844_s1 + $0x2dc] ss:$40 sps:$4 sm:$0xff]  }
 0x159   : > { %4259 = vmatprep.mubr.bf16.mxu0 %v6461_v47  ;;  %5569 = vmatpush1.bf16.msra.mxu1 %v6845_v14  ;;  %v6467_v14 = vld [vmem:[%s8844_s1 + $0x42c] ss:$40 sps:$4 sm:$0xff]   ;;  %v6509_v42 = vld [vmem:[%s8844_s1 + $0x65c] ss:$40 sps:$4 sm:$0xff]   ;;  %v6511_v47 = vld [vmem:[%s8844_s1 + $0x2d8] ss:$40 sps:$4 sm:$0xff]  }
 0x15a   : > { %5554 = vmatprep.subr.bf16.mxu1 %v6851_v19  ;;  %v577_v19 = vld [vmem:[%s6832_s29 + $0x9c8] sm:$0xff] }
 0x15b   : > { %v741_v61 = vpack.c.bf16 %v579_v59, %v577_v19  ;;  %v6519_v19 = vld [vmem:[%s8844_s1 + $0x37c] ss:$40 sps:$4 sm:$0xff]  }
 0x15c   : > { %v6521_v59 = vld [vmem:[%s8844_s1 + $0x6fc] ss:$40 sps:$4 sm:$0xff]  }
 0x15d   : > { %5570 = vmatpush1.bf16.msra.mxu1 %v6861_v27  ;;  %v1079_v27 = vld [vmem:[%s8845_s2 + $0x78] sm:$0xff]  ;;  %4488 = vmatprep.subr.bf16.mxu0 %v741_v61  ;;  %v1096_v61 = vld [vmem:[%s8845_s2 + $0x100] sm:$0xff] }
 0x15e   : > { %5555 = vmatprep.subr.bf16.mxu1 %v6866_v32  ;;  %v740_v32 = vpack.c.bf16 %v578_v62, %v576_v60  ;;  %1205 = vperm.xlu1 %6260, %v1079_v27   ;;  %v6523_v60 = vld [vmem:[%s8844_s1 + $0x378] ss:$40 sps:$4 sm:$0xff]   ;;  %v6527_v27 = vld [vmem:[%s8844_s1 + $0x74c] ss:$40 sps:$4 sm:$0xff]  }
 0x15f   : > { %3444 = vmatmul.mubr.bf16.gmra.mrb[4].mxu1 %v6463_v54  ;;  %v1094_v54 = vld [vmem:[%s8845_s2 + $0xf0] sm:$0xff]  ;;  %v6524_v62 = vld [vmem:[%s8844_s1 + $0x6f8] ss:$40 sps:$4 sm:$0xff]  }
 0x160   : > { %4260 = vmatmul.mubr.bf16.gmra.mrb[48].mxu0 %v6464_v55  ;;  %3453 = vmatprep.mubr.bf16.mxu1 %v6465_v56  ;;  %v1095_v55 = vld [vmem:[%s8845_s2 + $0xf8] sm:$0xff]  ;;  %v6517_v56 = vld [vmem:[%s8844_s1 + $0x328] ss:$40 sps:$4 sm:$0xff]  }
 0x161   : > { %4269 = vmatprep.mubr.bf16.mxu0 %v6467_v14  ;;  %5571 = vmatpush1.bf16.msra.mxu1 %v6875_v40  ;;  %v6470_v40 = vld [vmem:[%s8844_s1 + $0x428] ss:$40 sps:$4 sm:$0xff]  }
 0x162   : > { %5556 = vmatprep.subr.bf16.mxu1 %v6881_v45  ;;  %4489 = vmatpush1.bf16.msra.mxu0 %v740_v32  ;;  %v6473_v45 = vld [vmem:[%s8844_s1 + $0x47c] ss:$40 sps:$4 sm:$0xff]   ;;  %v6518_v14 = vld [vmem:[%s8844_s1 + $0x6a8] ss:$40 sps:$4 sm:$0xff]  }
 0x163   : > { %1215 = vperm.xlu1 %6260, %v1081_v5   ;;  %v1097_v32 = vld [vmem:[%s8845_s2 + $0x108] sm:$0xff]  ;;  %v1099_v5 = vld [vmem:[%s8845_s2 + $0x118] sm:$0xff] }
 0x165   : > { %5572 = vmatpush1.bf16.msra.mxu1 %v6890_v53  ;;  %v6475_v53 = vld [vmem:[%s8844_s1 + $0xf8] ss:$40 sps:$4 sm:$0xff]  }
 0x166   : > { %5557 = vmatprep.subr.bf16.mxu1 %v6896_v58  ;;  %v6476_v58 = vld [vmem:[%s8844_s1 + $0x478] ss:$40 sps:$4 sm:$0xff]  }
 0x167   : > { %3454 = vmatmul.mubr.bf16.gmra.mrb[8].mxu1 %v6469_v3  ;;  %1225 = vperm.xlu1 %6260, %v1083_v22   ;;  %v6529_v3 = vld [vmem:[%s8844_s1 + $0x3c8] ss:$40 sps:$4 sm:$0xff]   ;;  %v6545_v22 = vld [vmem:[%s8844_s1 + $0x83c] ss:$40 sps:$4 sm:$0xff]  }
 0x168   : > { %4270 = vmatmul.mubr.bf16.gmra.mrb[52].mxu0 %v6470_v40  ;;  %3463 = vmatprep.mubr.bf16.mxu1 %v6471_v9  ;;  %v1098_v40 = vld [vmem:[%s8845_s2 + $0x110] sm:$0xff] }
 0x169   : > { %4279 = vmatprep.mubr.bf16.mxu0 %v6473_v45  ;;  %5573 = vmatpush1.bf16.msra.mxu1 %v6904_v1  ;;  %v6479_v1 = vld [vmem:[%s8844_s1 + $0x4cc] ss:$40 sps:$4 sm:$0xff]   ;;  %v6530_v9 = vld [vmem:[%s8844_s1 + $0x748] ss:$40 sps:$4 sm:$0xff]   ;;  %v6531_v45 = vld [vmem:[%s8844_s1 + $0x41c] ss:$40 sps:$4 sm:$0xff]  }
 0x16a   : > { %5558 = vmatprep.subr.bf16.mxu1 %v6910_v6  ;;  %v581_v6 = vld [vmem:[%s6832_s29 + $0x9e8] sm:$0xff] }
 0x16b   : > { %v743_v13 = vpack.c.bf16 %v583_v11, %v581_v6  ;;  %1235 = vperm.xlu1 %6260, %v1085_v26   ;;  %v6539_v6 = vld [vmem:[%s8844_s1 + $0x7ec] ss:$40 sps:$4 sm:$0xff]  }
 0x16c   : > { %v1101_v11 = vld [vmem:[%s8845_s2 + $0x128] sm:$0xff] }
 0x16d   : > { %5574 = vmatpush1.bf16.msra.mxu1 %v6918_v15  ;;  %v742_v15 = vpack.c.bf16 %v582_v17, %v580_v12  ;;  %4490 = vmatprep.subr.bf16.mxu0 %v743_v13  ;;  %v6541_v12 = vld [vmem:[%s8844_s1 + $0x468] ss:$40 sps:$4 sm:$0xff]  }
 0x16e   : > { %5559 = vmatprep.subr.bf16.mxu1 %v6924_v21  ;;  %v6481_v21 = vld [vmem:[%s8844_s1 + $0x148] ss:$40 sps:$4 sm:$0xff]  }
 0x16f   : > { %3464 = vmatmul.mubr.bf16.gmra.mrb[12].mxu1 %v6475_v53  ;;  %4491 = vmatpush1.bf16.msra.mxu0 %v742_v15  ;;  %v6535_v53 = vld [vmem:[%s8844_s1 + $0x418] ss:$40 sps:$4 sm:$0xff]   ;;  %v1102_v13 = vld [vmem:[%s8845_s2 + $0x130] sm:$0xff]  ;;  %v1105_v26 = vld [vmem:[%s8845_s2 + $0x148] sm:$0xff] }
 0x170   : > { %4280 = vmatmul.mubr.bf16.gmra.mrb[56].mxu0 %v6476_v58  ;;  %3473 = vmatprep.mubr.bf16.mxu1 %v6477_v10  ;;  %v1100_v58 = vld [vmem:[%s8845_s2 + $0x120] sm:$0xff]  ;;  %v6542_v17 = vld [vmem:[%s8844_s1 + $0x7e8] ss:$40 sps:$4 sm:$0xff]   ;;  %v1103_v15 = vld [vmem:[%s8845_s2 + $0x138] sm:$0xff] }
 0x171   : > { %4289 = vmatprep.mubr.bf16.mxu0 %v6479_v1  ;;  %5575 = vmatpush1.bf16.msra.mxu1 %v6932_v29  ;;  %v6485_v29 = vld [vmem:[%s8844_s1 + $0x51c] ss:$40 sps:$4 sm:$0xff]   ;;  %v6536_v10 = vld [vmem:[%s8844_s1 + $0x798] ss:$40 sps:$4 sm:$0xff]   ;;  %v6537_v1 = vld [vmem:[%s8844_s1 + $0x46c] ss:$40 sps:$4 sm:$0xff]  }
 0x172   : > { %5560 = vmatprep.subr.bf16.mxu1 %v6938_v35  ;;  %v1084_v35 = vld [vmem:[%s8845_s2 + $0xa0] sm:$0xff] }
 0x173   : > { %1230 = vperm.xlu0 %6259, %v1084_v35   ;;  %v6551_v35 = vld [vmem:[%s8844_s1 + $0x88c] ss:$40 sps:$4 sm:$0xff]  }
 0x175   : > { %5576 = vmatpush1.bf16.msra.mxu1 %v6946_v43  ;;  %v6487_v43 = vld [vmem:[%s8844_s1 + $0x198] ss:$40 sps:$4 sm:$0xff]  }
 0x176   : > { %5561 = vmatprep.subr.bf16.mxu1 %v6952_v49  ;;  %v6488_v49 = vld [vmem:[%s8844_s1 + $0x518] ss:$40 sps:$4 sm:$0xff]  }
 0x177   : > { %3474 = vmatmul.mubr.bf16.gmra.mrb[16].mxu1 %v6481_v21  ;;  %v6547_v21 = vld [vmem:[%s8844_s1 + $0x4b8] ss:$40 sps:$4 sm:$0xff]  }
 0x178   : > { %4290 = vmatmul.mubr.bf16.gmra.mrb[60].mxu0 %v6482_v23  ;;  %3483 = vmatprep.mubr.bf16.mxu1 %v6483_v24  ;;  %v1104_v23 = vld [vmem:[%s8845_s2 + $0x140] sm:$0xff] }
 0x179   : > { %4299 = vmatprep.mubr.bf16.mxu0 %v6485_v29  ;;  %5577 = vmatpush1.bf16.msra.mxu1 %v6960_v57  ;;  %v1086_v57 = vld [vmem:[%s8845_s2 + $0xb0] sm:$0xff]  ;;  %v6548_v24 = vld [vmem:[%s8844_s1 + $0x838] ss:$40 sps:$4 sm:$0xff]  }
 0x17a   : > { %5562 = vmatprep.subr.bf16.mxu1 %v6966_v63  ;;  %v1087_v63 = vld [vmem:[%s8845_s2 + $0xb8] sm:$0xff]  ;;  %1240 = vperm.xlu0 %6259, %v1086_v57   ;;  %v6549_v29 = vld [vmem:[%s8844_s1 + $0x50c] ss:$40 sps:$4 sm:$0xff]  }
 0x17b   : > { %1245 = vperm.xlu1 %6260, %v1087_v63   ;;  %v6559_v57 = vld [vmem:[%s8844_s1 + $0x558] ss:$40 sps:$4 sm:$0xff]  }
 0x17c   : > { %v6560_v63 = vld [vmem:[%s8844_s1 + $0x8d8] ss:$40 sps:$4 sm:$0xff]  }
 0x17d   : > { %5578 = vmatpush1.bf16.msra.mxu1 %v6974_v8  ;;  %v6493_v8 = vld [vmem:[%s8844_s1 + $0x1e8] ss:$40 sps:$4 sm:$0xff]  }
 0x17e   : > { %5563 = vmatprep.subr.bf16.mxu1 %v6980_v16  ;;  %v6494_v16 = vld [vmem:[%s8844_s1 + $0x568] ss:$40 sps:$4 sm:$0xff]  }
 0x17f   : > { %3484 = vmatmul.mubr.bf16.gmra.mrb[20].mxu1 %v6487_v43  ;;  %v6553_v43 = vld [vmem:[%s8844_s1 + $0x508] ss:$40 sps:$4 sm:$0xff]  }
 0x180   : > { %4300 = vmatmul.mubr.bf16.gmra.mrb[64].mxu0 %v6488_v49  ;;  %3493 = vmatprep.mubr.bf16.mxu1 %v6489_v30  ;;  %v6554_v49 = vld [vmem:[%s8844_s1 + $0x888] ss:$40 sps:$4 sm:$0xff]   ;;  %v6555_v30 = vld [vmem:[%s8844_s1 + $0x55c] ss:$40 sps:$4 sm:$0xff]  }
 0x181   : > { %4309 = vmatprep.mubr.bf16.mxu0 %v6491_v31  ;;  %5579 = vmatpush1.bf16.msra.mxu1 %v6988_v25  ;;  %v1088_v25 = vld [vmem:[%s8845_s2 + $0xc0] sm:$0xff] }
 0x182   : > { %5564 = vmatprep.subr.bf16.mxu1 %v6994_v33  ;;  %v1089_v33 = vld [vmem:[%s8845_s2 + $0xc8] sm:$0xff]  ;;  %1250 = vperm.xlu0 %6259, %v1088_v25   ;;  %v6557_v31 = vld [vmem:[%s8844_s1 + $0x8dc] ss:$40 sps:$4 sm:$0xff]  }
 0x183   : > { %1255 = vperm.xlu1 %6260, %v1089_v33   ;;  %v6567_v25 = vld [vmem:[%s8844_s1 + $0x5fc] ss:$40 sps:$4 sm:$0xff]  }
 0x184   : > { %v6569_v33 = vld [vmem:[%s8844_s1 + $0x97c] ss:$40 sps:$4 sm:$0xff]  }
 0x185   : > { %5580 = vmatpush1.bf16.msra.mxu1 %v7004_v46  ;;  %v6499_v46 = vld [vmem:[%s8844_s1 + $0x238] ss:$40 sps:$4 sm:$0xff]  }
 0x186   : > { %5565 = vmatprep.subr.bf16.mxu1 %v7010_v52  ;;  %v6500_v52 = vld [vmem:[%s8844_s1 + $0x5b8] ss:$40 sps:$4 sm:$0xff]  }
 0x187   : > { %3494 = vmatmul.mubr.bf16.gmra.mrb[24].mxu1 %v6493_v8  ;;  %v6561_v8 = vld [vmem:[%s8844_s1 + $0x5ac] ss:$40 sps:$4 sm:$0xff]  }
 0x188   : > { %4310 = vmatmul.mubr.bf16.gmra.mrb[68].mxu0 %v6494_v16  ;;  %3503 = vmatprep.mubr.bf16.mxu1 %v6495_v34  ;;  %v6563_v16 = vld [vmem:[%s8844_s1 + $0x92c] ss:$40 sps:$4 sm:$0xff]   ;;  %v6565_v34 = vld [vmem:[%s8844_s1 + $0x5a8] ss:$40 sps:$4 sm:$0xff]  }
 0x189   : > { %4319 = vmatprep.mubr.bf16.mxu0 %v6497_v36  ;;  %5581 = vmatpush1.bf16.msra.mxu1 %v7020_v2  ;;  %v1090_v2 = vld [vmem:[%s8845_s2 + $0xd0] sm:$0xff] }
 0x18a   : > { %5566 = vmatprep.subr.bf16.mxu1 %v7025_v7  ;;  %v1091_v7 = vld [vmem:[%s8845_s2 + $0xd8] sm:$0xff]  ;;  %1260 = vperm.xlu0 %6259, %v1090_v2   ;;  %v6566_v36 = vld [vmem:[%s8844_s1 + $0x928] ss:$40 sps:$4 sm:$0xff]  }
 0x18b   : > { %1265 = vperm.xlu1 %6260, %v1091_v7   ;;  %v6577_v2 = vld [vmem:[%s8844_s1 + $0x648] ss:$40 sps:$4 sm:$0xff]  }
 0x18c   : > { %v6578_v7 = vld [vmem:[%s8844_s1 + $0x9c8] ss:$40 sps:$4 sm:$0xff]  }
 0x18d   : > { %5582 = vmatpush1.bf16.msra.mxu1 %v7033_v20  ;;  %v6505_v20 = vld [vmem:[%s8844_s1 + $0x288] ss:$40 sps:$4 sm:$0xff]  }
 0x18e   : > { %5567 = vmatprep.subr.bf16.mxu1 %v7039_v28  ;;  %v6506_v28 = vld [vmem:[%s8844_s1 + $0x608] ss:$40 sps:$4 sm:$0xff]  }
 0x18f   : > { %3504 = vmatmul.mubr.bf16.gmra.mrb[28].mxu1 %v6499_v46  ;;  %v6571_v46 = vld [vmem:[%s8844_s1 + $0x5f8] ss:$40 sps:$4 sm:$0xff]  }
 0x190   : > { %4320 = vmatmul.mubr.bf16.gmra.mrb[72].mxu0 %v6500_v52  ;;  %3513 = vmatprep.mubr.bf16.mxu1 %v6501_v38  ;;  %v6572_v52 = vld [vmem:[%s8844_s1 + $0x978] ss:$40 sps:$4 sm:$0xff]   ;;  %v6573_v38 = vld [vmem:[%s8844_s1 + $0x64c] ss:$40 sps:$4 sm:$0xff]  }
 0x191   : > { %4329 = vmatprep.mubr.bf16.mxu0 %v6503_v39  ;;  %5583 = vmatpush1.bf16.msra.mxu1 %v7045_v37  ;;  %v1092_v37 = vld [vmem:[%s8845_s2 + $0xe0] sm:$0xff]  ;;  %v6575_v39 = vld [vmem:[%s8844_s1 + $0x9cc] ss:$40 sps:$4 sm:$0xff]  }
 0x192   : > { %5568 = vmatprep.subr.bf16.mxu1 %v7051_v44  ;;  %v1093_v44 = vld [vmem:[%s8845_s2 + $0xe8] sm:$0xff]  ;;  %1270 = vperm.xlu0 %6259, %v1092_v37  }
 0x193   : > { %1275 = vperm.xlu1 %6260, %v1093_v44   ;;  %v6585_v37 = vld [vmem:[%s8844_s1 + $0x6ec] ss:$40 sps:$4 sm:$0xff]  }
 0x194   : > { %v6587_v44 = vld [vmem:[%s8844_s1 + $0x74] ss:$40 sps:$4 sm:$0xff]  }
 0x195   : > { %5584 = vmatpush1.bf16.msra.mxu1 %v7056_v51  ;;  %v6512_v51 = vld [vmem:[%s8844_s1 + $0x658] ss:$40 sps:$4 sm:$0xff]  }
 0x196   : > { %1280 = vperm.xlu0 %6259, %v1094_v54   ;;  %v1106_v54 = vld [vmem:[%s8845_s2 + $0x150] sm:$0xff] }
 0x197   : > { %3514 = vmatmul.mubr.bf16.gmra.mrb[32].mxu1 %v6505_v20  ;;  %1285 = vperm.xlu1 %6260, %v1095_v55   ;;  %v6579_v20 = vld [vmem:[%s8844_s1 + $0x69c] ss:$40 sps:$4 sm:$0xff]   ;;  %v6595_v55 = vld [vmem:[%s8844_s1 + $0x738] ss:$40 sps:$4 sm:$0xff]  }
 0x198   : > { %4330 = vmatmul.mubr.bf16.gmra.mrb[76].mxu0 %v6506_v28  ;;  %3523 = vmatprep.mubr.bf16.mxu1 %v6507_v41  ;;  %v6583_v28 = vld [vmem:[%s8844_s1 + $0x24] ss:$40 sps:$4 sm:$0xff]   ;;  %v6584_v41 = vld [vmem:[%s8844_s1 + $0x698] ss:$40 sps:$4 sm:$0xff]  }
 0x199   : > { %4339 = vmatprep.mubr.bf16.mxu0 %v6509_v42  ;;  %v6581_v42 = vld [vmem:[%s8844_s1 + $0x20] ss:$40 sps:$4 sm:$0xff]  }
 0x19a   : > { %1290 = vperm.xlu0 %6259, %v1096_v61   ;;  %v1110_v61 = vld [vmem:[%s8845_s2 + $0x170] sm:$0xff] }
 0x19b   : > { %1295 = vperm.xlu1 %6260, %v1097_v32   ;;  %v6603_v32 = vld [vmem:[%s8844_s1 + $0x7dc] ss:$40 sps:$4 sm:$0xff]  }
 0x19e   : > { %1300 = vperm.xlu0 %6259, %v1098_v40   ;;  %v1112_v40 = vld [vmem:[%s8845_s2 + $0x180] sm:$0xff] }
 0x19f   : > { %3524 = vmatmul.mubr.bf16.gmra.mrb[36].mxu1 %v6511_v47  ;;  %1305 = vperm.xlu1 %6260, %v1099_v5   ;;  %v6589_v47 = vld [vmem:[%s8844_s1 + $0x6e8] ss:$40 sps:$4 sm:$0xff]  }
 0x1a0   : > { %4340 = vmatmul.mubr.bf16.gmra.mrb[80].mxu0 %v6512_v51  ;;  %3533 = vmatprep.mubr.bf16.mxu1 %v6513_v48  ;;  %v6590_v51 = vld [vmem:[%s8844_s1 + $0x70] ss:$40 sps:$4 sm:$0xff]   ;;  %v6591_v48 = vld [vmem:[%s8844_s1 + $0x73c] ss:$40 sps:$4 sm:$0xff]   ;;  %v1113_v5 = vld [vmem:[%s8845_s2 + $0x188] sm:$0xff] }
 0x1a1   : > { %4349 = vmatprep.mubr.bf16.mxu0 %v6515_v50  ;;  %v6593_v50 = vld [vmem:[%s8844_s1 + $0xc4] ss:$40 sps:$4 sm:$0xff]  }
 0x1a2   : > { %1310 = vperm.xlu0 %6259, %v1100_v58   ;;  %v6609_v58 = vld [vmem:[%s8844_s1 + $0x82c] ss:$40 sps:$4 sm:$0xff]  }
 0x1a3   : > { %1315 = vperm.xlu1 %6260, %v1101_v11   ;;  %v1118_v11 = vld [vmem:[%s8845_s2 + $0x1b0] sm:$0xff] }
 0x1a6   : > { %1320 = vperm.xlu0 %6259, %v1102_v13   ;;  %v1117_v13 = vld [vmem:[%s8845_s2 + $0x1a8] sm:$0xff] }
 0x1a7   : > { %3534 = vmatmul.mubr.bf16.gmra.mrb[40].mxu1 %v6517_v56  ;;  %1325 = vperm.xlu1 %6260, %v1103_v15   ;;  %v6596_v56 = vld [vmem:[%s8844_s1 + $0xc0] ss:$40 sps:$4 sm:$0xff]  }
 0x1a8   : > { %4350 = vmatmul.mubr.bf16.gmra.mrb[84].mxu0 %v6518_v14  ;;  %3543 = vmatprep.mubr.bf16.mxu1 %v6519_v19  ;;  %v6597_v14 = vld [vmem:[%s8844_s1 + $0x78c] ss:$40 sps:$4 sm:$0xff]   ;;  %v1120_v15 = vld [vmem:[%s8845_s2 + $0x1c0] sm:$0xff] }
 0x1a9   : > { %4359 = vmatprep.mubr.bf16.mxu0 %v6521_v59  ;;  %v6599_v19 = vld [vmem:[%s8844_s1 + $0x114] ss:$40 sps:$4 sm:$0xff]   ;;  %v1108_v59 = vld [vmem:[%s8845_s2 + $0x160] sm:$0xff] }
 0x1aa   : > { %1330 = vperm.xlu0 %6259, %v1104_v23   ;;  %v1122_v23 = vld [vmem:[%s8845_s2 + $0x1d0] sm:$0xff] }
 0x1ab   : > { %1335 = vperm.xlu1 %6260, %v1105_v26   ;;  %v1121_v26 = vld [vmem:[%s8845_s2 + $0x1c8] sm:$0xff] }
 0x1ae   : > { %1340 = vperm.xlu0 %6259, %v1106_v54  }
 0x1af   : > { %3544 = vmatmul.mubr.bf16.gmra.mrb[44].mxu1 %v6523_v60  ;;  %v1107_v60 = vld [vmem:[%s8845_s2 + $0x158] sm:$0xff] }
 0x1b0   : > { %4360 = vmatmul.mubr.bf16.gmra.mrb[88].mxu0 %v6524_v62  ;;  %3553 = vmatprep.mubr.bf16.mxu1 %v6525_v0  ;;  %v6601_v62 = vld [vmem:[%s8844_s1 + $0x788] ss:$40 sps:$4 sm:$0xff]  }
 0x1b1   : > { %4369 = vmatprep.mubr.bf16.mxu0 %v6527_v27  ;;  %1345 = vperm.xlu1 %6260, %v1107_v60   ;;  %v1109_v0 = vld [vmem:[%s8845_s2 + $0x168] sm:$0xff]  ;;  %v6602_v27 = vld [vmem:[%s8844_s1 + $0x110] ss:$40 sps:$4 sm:$0xff]  }
 0x1b2   : > { %1350 = vperm.xlu0 %6259, %v1108_v59   ;;  %v6639_v59 = vld [vmem:[%s8844_s1 + $0x9bc] ss:$40 sps:$4 sm:$0xff]  }
 0x1b5   : > { %1355 = vperm.xlu1 %6260, %v1109_v0  }
 0x1b6   : > { %1360 = vperm.xlu0 %6259, %v1110_v61   ;;  %v6641_v61 = vld [vmem:[%s8844_s1 + $0x344] ss:$40 sps:$4 sm:$0xff]  }
 0x1b7   : > { %3554 = vmatmul.mubr.bf16.gmra.mrb[48].mxu1 %v6529_v3  ;;  %v6605_v3 = vld [vmem:[%s8844_s1 + $0x164] ss:$40 sps:$4 sm:$0xff]  }
 0x1b8   : > { %4370 = vmatmul.mubr.bf16.gmra.mrb[92].mxu0 %v6530_v9  ;;  %3563 = vmatprep.mubr.bf16.mxu1 %v6531_v45  ;;  %v1111_v9 = vld [vmem:[%s8845_s2 + $0x178] sm:$0xff]  ;;  %v1114_v45 = vld [vmem:[%s8845_s2 + $0x190] sm:$0xff] }
 0x1b9   : > { %4379 = vmatprep.mubr.bf16.mxu0 %v6533_v4  ;;  %1365 = vperm.xlu1 %6260, %v1111_v9   ;;  %v6607_v4 = vld [vmem:[%s8844_s1 + $0x7d8] ss:$40 sps:$4 sm:$0xff]  }
 0x1ba   : > { %1370 = vperm.xlu0 %6259, %v1112_v40   ;;  %v6647_v40 = vld [vmem:[%s8844_s1 + $0x6a4] ss:$40 sps:$4 sm:$0xff]  }
 0x1bd   : > { %1375 = vperm.xlu1 %6260, %v1113_v5  }
 0x1be   : > { %1380 = vperm.xlu0 %6259, %v1114_v45   ;;  %v6648_v45 = vld [vmem:[%s8844_s1 + $0x394] ss:$40 sps:$4 sm:$0xff]  }
 0x1bf   : > { %3564 = vmatmul.mubr.bf16.gmra.mrb[52].mxu1 %v6535_v53  ;;  %v6608_v53 = vld [vmem:[%s8844_s1 + $0x160] ss:$40 sps:$4 sm:$0xff]  }
 0x1c0   : > { %4380 = vmatmul.mubr.bf16.gmra.mrb[96].mxu0 %v6536_v10  ;;  %3573 = vmatprep.mubr.bf16.mxu1 %v6537_v1  ;;  %v6611_v10 = vld [vmem:[%s8844_s1 + $0x1b4] ss:$40 sps:$4 sm:$0xff]   ;;  %v1116_v1 = vld [vmem:[%s8845_s2 + $0x1a0] sm:$0xff] }
 0x1c1   : > { %4389 = vmatprep.mubr.bf16.mxu0 %v6539_v6  ;;  %v1115_v6 = vld [vmem:[%s8845_s2 + $0x198] sm:$0xff] }
 0x1c2   : > { %1390 = vperm.xlu0 %6259, %v1116_v1   ;;  %1385 = vperm.xlu1 %6260, %v1115_v6   ;;  %v6651_v1 = vld [vmem:[%s8844_s1 + $0x6f4] ss:$40 sps:$4 sm:$0xff]  }
 0x1c6   : > { %1400 = vperm.xlu0 %6259, %v1118_v11   ;;  %1395 = vperm.xlu1 %6260, %v1117_v13   ;;  %v6653_v11 = vld [vmem:[%s8844_s1 + $0x3e4] ss:$40 sps:$4 sm:$0xff]  }
 0x1c7   : > { %3574 = vmatmul.mubr.bf16.gmra.mrb[56].mxu1 %v6541_v12  ;;  %v6613_v12 = vld [vmem:[%s8844_s1 + $0x828] ss:$40 sps:$4 sm:$0xff]  }
 0x1c8   : > { %4390 = vmatmul.mubr.bf16.gmra.mrb[100].mxu0 %v6542_v17  ;;  %3583 = vmatprep.mubr.bf16.mxu1 %v6543_v18  ;;  %v6614_v17 = vld [vmem:[%s8844_s1 + $0x1b0] ss:$40 sps:$4 sm:$0xff]   ;;  %v6615_v18 = vld [vmem:[%s8844_s1 + $0x87c] ss:$40 sps:$4 sm:$0xff]  }
 0x1c9   : > { %4399 = vmatprep.mubr.bf16.mxu0 %v6545_v22  ;;  %v6617_v22 = vld [vmem:[%s8844_s1 + $0x204] ss:$40 sps:$4 sm:$0xff]  }
 0x1ca   : > { %1410 = vperm.xlu0 %6259, %v1120_v15   ;;  %v6657_v15 = vld [vmem:[%s8844_s1 + $0x744] ss:$40 sps:$4 sm:$0xff]  }
 0x1ce   : > { %1420 = vperm.xlu0 %6259, %v1122_v23   ;;  %v6659_v23 = vld [vmem:[%s8844_s1 + $0x434] ss:$40 sps:$4 sm:$0xff]  }
 0x1cf   : > { %3584 = vmatmul.mubr.bf16.gmra.mrb[60].mxu1 %v6547_v21  ;;  %v1119_v21 = vld [vmem:[%s8845_s2 + $0x1b8] sm:$0xff] }
 0x1d0   : > { %4400 = vmatmul.mubr.bf16.gmra.mrb[104].mxu0 %v6548_v24  ;;  %3593 = vmatprep.mubr.bf16.mxu1 %v6549_v29 }
 0x1d1   : > { %4409 = vmatprep.mubr.bf16.mxu0 %v6551_v35  ;;  %1405 = vperm.xlu1 %6260, %v1119_v21   ;;  %v6619_v35 = vld [vmem:[%s8844_s1 + $0x878] ss:$40 sps:$4 sm:$0xff]  }
 0x1d5   : > { %1415 = vperm.xlu1 %6260, %v1121_v26  }
 0x1d7   : > { %3594 = vmatmul.mubr.bf16.gmra.mrb[64].mxu1 %v6553_v43 }
 0x1d8   : > { %4410 = vmatmul.mubr.bf16.gmra.mrb[108].mxu0 %v6554_v49  ;;  %3603 = vmatprep.mubr.bf16.mxu1 %v6555_v30  ;;  %v6620_v49 = vld [vmem:[%s8844_s1 + $0x200] ss:$40 sps:$4 sm:$0xff]   ;;  %v6621_v30 = vld [vmem:[%s8844_s1 + $0x8cc] ss:$40 sps:$4 sm:$0xff]  }
 0x1d9   : > { %4419 = vmatprep.mubr.bf16.mxu0 %v6557_v31 }
 0x1df   : > { %3604 = vmatmul.mubr.bf16.gmra.mrb[68].mxu1 %v6559_v57  ;;  %v6623_v57 = vld [vmem:[%s8844_s1 + $0x254] ss:$40 sps:$4 sm:$0xff]  }
 0x1e0   : > { %4420 = vmatmul.mubr.bf16.gmra.mrb[112].mxu0 %v6560_v63  ;;  %3613 = vmatprep.mubr.bf16.mxu1 %v6561_v8  ;;  %v1124_v63 = vld [vmem:[%s8845_s2 + $0x1e0] sm:$0xff]  ;;  %v1123_v8 = vld [vmem:[%s8845_s2 + $0x1d8] sm:$0xff] }
 0x1e1   : > { %4429 = vmatprep.mubr.bf16.mxu0 %v6563_v16  ;;  %1430 = vperm.xlu0 %6259, %v1124_v63   ;;  %v1126_v16 = vld [vmem:[%s8845_s2 + $0x1f0] sm:$0xff] }
 0x1e2   : > { %1425 = vperm.xlu1 %6260, %v1123_v8   ;;  %v6663_v63 = vld [vmem:[%s8844_s1 + $0x794] ss:$40 sps:$4 sm:$0xff]  }
 0x1e5   : > { %1440 = vperm.xlu0 %6259, %v1126_v16   ;;  %v6665_v16 = vld [vmem:[%s8844_s1 + $0x484] ss:$40 sps:$4 sm:$0xff]  }
 0x1e7   : > { %3614 = vmatmul.mubr.bf16.gmra.mrb[72].mxu1 %v6565_v34 }
 0x1e8   : > { %4430 = vmatmul.mubr.bf16.gmra.mrb[116].mxu0 %v6566_v36  ;;  %3623 = vmatprep.mubr.bf16.mxu1 %v6567_v25  ;;  %v6625_v25 = vld [vmem:[%s8844_s1 + $0x8c8] ss:$40 sps:$4 sm:$0xff]  }
 0x1e9   : > { %4439 = vmatprep.mubr.bf16.mxu0 %v6569_v33  ;;  %v1125_v33 = vld [vmem:[%s8845_s2 + $0x1e8] sm:$0xff] }
 0x1ea   : > { %1435 = vperm.xlu1 %6260, %v1125_v33  }
 0x1ef   : > { %3624 = vmatmul.mubr.bf16.gmra.mrb[76].mxu1 %v6571_v46 }
 0x1f0   : > { %4440 = vmatmul.mubr.bf16.gmra.mrb[120].mxu0 %v6572_v52  ;;  %3633 = vmatprep.mubr.bf16.mxu1 %v6573_v38  ;;  %v6626_v52 = vld [vmem:[%s8844_s1 + $0x250] ss:$40 sps:$4 sm:$0xff]   ;;  %v6627_v38 = vld [vmem:[%s8844_s1 + $0x91c] ss:$40 sps:$4 sm:$0xff]  }
 0x1f1   : > { %4449 = vmatprep.mubr.bf16.mxu0 %v6575_v39 }
 0x1f7   : > { %3634 = vmatmul.mubr.bf16.gmra.mrb[80].mxu1 %v6577_v2  ;;  %v6629_v2 = vld [vmem:[%s8844_s1 + $0x2a4] ss:$40 sps:$4 sm:$0xff]  }
 0x1f8   : > { %4450 = vmatmul.mubr.bf16.gmra.mrb[124].mxu0 %v6578_v7  ;;  %3643 = vmatprep.mubr.bf16.mxu1 %v6579_v20  ;;  %v5009_v7 = vld [vmem:[%s8847_s4] sm:$0xff]  ;;  %v1127_v20 = vld [vmem:[%s8845_s2 + $0x1f8] sm:$0xff] }
 0x1f9   : > { %4492 = vmatprep.mubr.bf16.mxu0 %v6583_v28  ;;  %5013 = vperm.xlu0 %6259, %v5009_v7   ;;  %v6669_v7 = vld [vmem:[%s8844_s1 + $0x7e4] ss:$40 sps:$4 sm:$0xff]  }
 0x1fa   : > { %1445 = vperm.xlu1 %6260, %v1127_v20  }
 0x1ff   : > { %3644 = vmatmul.mubr.bf16.gmra.mrb[84].mxu1 %v6584_v41 }
 0x200   : > { %4493 = vmatmul.mubr.bf16.vlgmr.msra.gmra.mrb[0].mxu0 %v6581_v42  ;;  %3653 = vmatprep.mubr.bf16.mxu1 %v6585_v37  ;;  %v6631_v42 = vld [vmem:[%s8844_s1 + $0x918] ss:$40 sps:$4 sm:$0xff]   ;;  %v5010_v37 = vld [vmem:[%s8847_s4 + $0x8] sm:$0xff] }
 0x201   : > { %4502 = vmatprep.mubr.bf16.mxu0 %v6587_v44  ;;  %5018 = vperm.xlu1 %6260, %v5010_v37  }
 0x207   : > { %3654 = vmatmul.mubr.bf16.gmra.mrb[88].mxu1 %v6589_v47  ;;  %v6632_v47 = vld [vmem:[%s8844_s1 + $0x2a0] ss:$40 sps:$4 sm:$0xff]  }
 0x208   : > { %4503 = vmatmul.mubr.bf16.gmra.mrb[4].mxu0 %v6590_v51  ;;  %3663 = vmatprep.mubr.bf16.mxu1 %v6591_v48  ;;  %v6633_v51 = vld [vmem:[%s8844_s1 + $0x96c] ss:$40 sps:$4 sm:$0xff]  }
 0x209   : > { %4512 = vmatprep.mubr.bf16.mxu0 %v6593_v50  ;;  %v6635_v50 = vld [vmem:[%s8844_s1 + $0x2f4] ss:$40 sps:$4 sm:$0xff]  }
 0x20f   : > { %3664 = vmatmul.mubr.bf16.gmra.mrb[92].mxu1 %v6595_v55 }
 0x210   : > { %4513 = vmatmul.mubr.bf16.gmra.mrb[8].mxu0 %v6596_v56  ;;  %3673 = vmatprep.mubr.bf16.mxu1 %v6597_v14  ;;  %v6637_v56 = vld [vmem:[%s8844_s1 + $0x968] ss:$40 sps:$4 sm:$0xff]  }
 0x211   : > { %4522 = vmatprep.mubr.bf16.mxu0 %v6599_v19  ;;  %v6638_v19 = vld [vmem:[%s8844_s1 + $0x2f0] ss:$40 sps:$4 sm:$0xff]  }
 0x217   : > { %3674 = vmatmul.mubr.bf16.gmra.mrb[96].mxu1 %v6601_v62 }
 0x218   : > { %4523 = vmatmul.mubr.bf16.gmra.mrb[12].mxu0 %v6602_v27  ;;  %3683 = vmatprep.mubr.bf16.mxu1 %v6603_v32  ;;  %v6643_v27 = vld [vmem:[%s8844_s1 + $0x9b8] ss:$40 sps:$4 sm:$0xff]  }
 0x219   : > { %4532 = vmatprep.mubr.bf16.mxu0 %v6605_v3  ;;  %v6644_v3 = vld [vmem:[%s8844_s1 + $0x340] ss:$40 sps:$4 sm:$0xff]  }
 0x21f   : > { %3684 = vmatmul.mubr.bf16.gmra.mrb[100].mxu1 %v6607_v4 }
 0x220   : > { %4533 = vmatmul.mubr.bf16.gmra.mrb[16].mxu0 %v6608_v53  ;;  %3693 = vmatprep.mubr.bf16.mxu1 %v6609_v58  ;;  %v6645_v53 = vld [vmem:[%s8844_s1 + $0x6a0] ss:$40 sps:$4 sm:$0xff]  }
 0x221   : > { %4542 = vmatprep.mubr.bf16.mxu0 %v6611_v10  ;;  %v6650_v10 = vld [vmem:[%s8844_s1 + $0x390] ss:$40 sps:$4 sm:$0xff]  }
 0x227   : > { %3694 = vmatmul.mubr.bf16.gmra.mrb[104].mxu1 %v6613_v12 }
 0x228   : > { %4543 = vmatmul.mubr.bf16.gmra.mrb[20].mxu0 %v6614_v17  ;;  %3703 = vmatprep.mubr.bf16.mxu1 %v6615_v18  ;;  %v6655_v17 = vld [vmem:[%s8844_s1 + $0x6f0] ss:$40 sps:$4 sm:$0xff]  }
 0x229   : > { %4552 = vmatprep.mubr.bf16.mxu0 %v6617_v22  ;;  %v6656_v22 = vld [vmem:[%s8844_s1 + $0x3e0] ss:$40 sps:$4 sm:$0xff]  }
 0x22a   : > { %v8164_v24 = vpop.f32.mrb[0].mxu1 }
 0x22b   : > { %v8166_v29 = vpop.f32.mrb[1].mxu1 }
 0x22c   : > { %v8174_v43 = vpop.f32.mrb[2].mxu1 }
 0x22d   : > { %v8182_v31 = vpop.f32.mrb[3].mxu1 }
 0x22f   : > { %3704 = vmatmul.mubr.bf16.gmra.mrb[108].mxu1 %v6619_v35 }
 0x230   : > { %4553 = vmatmul.mubr.bf16.gmra.mrb[24].mxu0 %v6620_v49  ;;  %3713 = vmatprep.mubr.bf16.mxu1 %v6621_v30  ;;  %v6661_v49 = vld [vmem:[%s8844_s1 + $0x740] ss:$40 sps:$4 sm:$0xff]  }
 0x231   : > { %4562 = vmatprep.mubr.bf16.mxu0 %v6623_v57  ;;  %v6662_v57 = vld [vmem:[%s8844_s1 + $0x430] ss:$40 sps:$4 sm:$0xff]  }
 0x232   : > { %v8196_v34 = vpop.f32.mrb[4].mxu1 }
 0x233   : > { %v8198_v36 = vpop.f32.mrb[5].mxu1 }
 0x234   : > { %v8206_v46 = vpop.f32.mrb[6].mxu1 }
 0x235   : > { %v8214_v39 = vpop.f32.mrb[7].mxu1 }
 0x237   : > { %3714 = vmatmul.mubr.bf16.gmra.mrb[112].mxu1 %v6625_v25 }
 0x238   : > { %4563 = vmatmul.mubr.bf16.gmra.mrb[28].mxu0 %v6626_v52  ;;  %3723 = vmatprep.mubr.bf16.mxu1 %v6627_v38  ;;  %v6667_v52 = vld [vmem:[%s8844_s1 + $0x790] ss:$40 sps:$4 sm:$0xff]  }
 0x239   : > { %4572 = vmatprep.mubr.bf16.mxu0 %v6629_v2  ;;  %v6668_v2 = vld [vmem:[%s8844_s1 + $0x480] ss:$40 sps:$4 sm:$0xff]  }
 0x23a   : > { %v8225_v28 = vpop.f32.mrb[8].mxu1 }
 0x23b   : > { %v8227_v41 = vpop.f32.mrb[9].mxu1 }
 0x23c   : > { %v8235_v44 = vpop.f32.mrb[10].mxu1 }
 0x23d   : > { %v8243_v48 = vpop.f32.mrb[11].mxu1 }
 0x23f   : > { %3724 = vmatmul.mubr.bf16.gmra.mrb[116].mxu1 %v6631_v42  ;;  %v6671_v42 = vld [vmem:[%s8844_s1 + $0x4d4] ss:$40 sps:$4 sm:$0xff]  }
 0x240   : > { %4573 = vmatmul.mubr.bf16.gmra.mrb[32].mxu0 %v6632_v47  ;;  %3733 = vmatprep.mubr.bf16.mxu1 %v6633_v51  ;;  %v6673_v51 = vld [vmem:[%s8844_s1 + $0x7e0] ss:$40 sps:$4 sm:$0xff]  }
 0x241   : > { %4582 = vmatprep.mubr.bf16.mxu0 %v6635_v50 }
 0x242   : > { %v8248_v54 = vpop.f32.mrb[12].mxu1 }
 0x243   : > { %v8250_v55 = vpop.f32.mrb[13].mxu1 }
 0x244   : > { %v8255_v14 = vpop.f32.mrb[14].mxu1 }
 0x245   : > { %v8263_v60 = vpop.f32.mrb[15].mxu1 }
 0x247   : > { %3734 = vmatmul.mubr.bf16.gmra.mrb[120].mxu1 %v6637_v56  ;;  %v6674_v56 = vld [vmem:[%s8844_s1 + $0x4d0] ss:$40 sps:$4 sm:$0xff]  }
 0x248   : > { %4583 = vmatmul.mubr.bf16.gmra.mrb[36].mxu0 %v6638_v19  ;;  %3743 = vmatprep.mubr.bf16.mxu1 %v6639_v59  ;;  %v6675_v19 = vld [vmem:[%s8844_s1 + $0x834] ss:$40 sps:$4 sm:$0xff]  }
 0x249   : > { %4592 = vmatprep.mubr.bf16.mxu0 %v6641_v61  ;;  %v6677_v61 = vld [vmem:[%s8844_s1 + $0x524] ss:$40 sps:$4 sm:$0xff]  }
 0x24a   : > { %v8268_v62 = vpop.f32.mrb[16].mxu1 }
 0x24b   : > { %v8270_v0 = vpop.f32.mrb[17].mxu1 }
 0x24c   : > { %v8275_v32 = vpop.f32.mrb[18].mxu1 }
 0x24d   : > { %v8283_v9 = vpop.f32.mrb[19].mxu1 }
 0x24f   : > { %3744 = vmatmul.mubr.bf16.gmra.mrb[124].mxu1 %v6643_v27 }
 0x250   : > { %4593 = vmatmul.mubr.bf16.gmra.mrb[40].mxu0 %v6644_v3  ;;  %3996 = vmatprep.mubr.bf16.mxu1 %v6647_v40  ;;  %v6679_v40 = vld [vmem:[%s8844_s1 + $0x830] ss:$40 sps:$4 sm:$0xff]  }
 0x251   : > { %4602 = vmatprep.mubr.bf16.mxu0 %v6648_v45 }
 0x252   : > { %v8288_v4 = vpop.f32.mrb[20].mxu1 }
 0x253   : > { %v8290_v5 = vpop.f32.mrb[21].mxu1 }
 0x254   : > { %v8295_v58 = vpop.f32.mrb[22].mxu1 }
 0x255   : > { %v8303_v6 = vpop.f32.mrb[23].mxu1 }
 0x257   : > { %3997 = vmatmul.mubr.bf16.vlgmr.msra.gmra.mrb[84].mxu1 %v6645_v53  ;;  %v6680_v53 = vld [vmem:[%s8844_s1 + $0x520] ss:$40 sps:$4 sm:$0xff]  }
 0x258   : > { %4603 = vmatmul.mubr.bf16.gmra.mrb[44].mxu0 %v6650_v10  ;;  %4006 = vmatprep.mubr.bf16.mxu1 %v6651_v1  ;;  %v6681_v10 = vld [vmem:[%s8844_s1 + $0x884] ss:$40 sps:$4 sm:$0xff]  }
 0x259   : > { %4612 = vmatprep.mubr.bf16.mxu0 %v6653_v11  ;;  %v6683_v11 = vld [vmem:[%s8844_s1 + $0x574] ss:$40 sps:$4 sm:$0xff]  }
 0x25a   : > { %v8308_v12 = vpop.f32.mrb[24].mxu1 }
 0x25b   : > { %v8310_v13 = vpop.f32.mrb[25].mxu1 }
 0x25c   : > { %v8315_v18 = vpop.f32.mrb[26].mxu1 }
 0x25d   : > { %v8323_v21 = vpop.f32.mrb[27].mxu1 }
 0x25f   : > { %4007 = vmatmul.mubr.bf16.gmra.mrb[88].mxu1 %v6655_v17 }
 0x260   : > { %4613 = vmatmul.mubr.bf16.gmra.mrb[48].mxu0 %v6656_v22  ;;  %4016 = vmatprep.mubr.bf16.mxu1 %v6657_v15  ;;  %v6685_v15 = vld [vmem:[%s8844_s1 + $0x880] ss:$40 sps:$4 sm:$0xff]  }
 0x261   : > { %4622 = vmatprep.mubr.bf16.mxu0 %v6659_v23 }
 0x262   : > { %v8328_v35 = vpop.f32.mrb[28].mxu1 }
 0x263   : > { %v8330_v26 = vpop.f32.mrb[29].mxu1 }
 0x264   : > { %v8335_v30 = vpop.f32.mrb[30].mxu1 }
 0x265   : > { %v8343_v8 = vpop.f32.mrb[31].mxu1 }
 0x267   : > { %4017 = vmatmul.mubr.bf16.gmra.mrb[92].mxu1 %v6661_v49  ;;  %v6686_v49 = vld [vmem:[%s8844_s1 + $0x570] ss:$40 sps:$4 sm:$0xff]  }
 0x268   : > { %4623 = vmatmul.mubr.bf16.gmra.mrb[52].mxu0 %v6662_v57  ;;  %4026 = vmatprep.mubr.bf16.mxu1 %v6663_v63  ;;  %v6687_v57 = vld [vmem:[%s8844_s1 + $0x8d4] ss:$40 sps:$4 sm:$0xff]  }
 0x269   : > { %4632 = vmatprep.mubr.bf16.mxu0 %v6665_v16  ;;  %v6689_v16 = vld [vmem:[%s8844_s1 + $0x5c4] ss:$40 sps:$4 sm:$0xff]  }
 0x26a   : > { %v8348_v25 = vpop.f32.mrb[32].mxu1 }
 0x26b   : > { %v8350_v33 = vpop.f32.mrb[33].mxu1 }
 0x26c   : > { %v8355_v38 = vpop.f32.mrb[34].mxu1 }
 0x26d   : > { %v8363_v20 = vpop.f32.mrb[35].mxu1 }
 0x26f   : > { %4027 = vmatmul.mubr.bf16.gmra.mrb[96].mxu1 %v6667_v52 }
 0x270   : > { %4633 = vmatmul.mubr.bf16.gmra.mrb[56].mxu0 %v6668_v2  ;;  %4036 = vmatprep.mubr.bf16.mxu1 %v6669_v7  ;;  %v6691_v7 = vld [vmem:[%s8844_s1 + $0x8d0] ss:$40 sps:$4 sm:$0xff]  }
 0x271   : > { %4642 = vmatprep.mubr.bf16.mxu0 %v6671_v42 }
 0x272   : > { %v8368_v37 = vpop.f32.mrb[36].mxu1 }
 0x273   : > { %v8370_v47 = vpop.f32.mrb[37].mxu1 }
 0x274   : > { %v8375_v50 = vpop.f32.mrb[38].mxu1 }
 0x275   : > { %v8383_v59 = vpop.f32.mrb[39].mxu1 }
 0x277   : > { %4037 = vmatmul.mubr.bf16.gmra.mrb[100].mxu1 %v6673_v51  ;;  %v6692_v51 = vld [vmem:[%s8844_s1 + $0x5c0] ss:$40 sps:$4 sm:$0xff]  }
 0x278   : > { %4643 = vmatmul.mubr.bf16.gmra.mrb[60].mxu0 %v6674_v56  ;;  %4046 = vmatprep.mubr.bf16.mxu1 %v6675_v19  ;;  %v6693_v56 = vld [vmem:[%s8844_s1 + $0x924] ss:$40 sps:$4 sm:$0xff]  }
 0x279   : > { %4652 = vmatprep.mubr.bf16.mxu0 %v6677_v61  ;;  %v6695_v61 = vld [vmem:[%s8844_s1 + $0x614] ss:$40 sps:$4 sm:$0xff]  }
 0x27a   : > { %v8388_v27 = vpop.f32.mrb[40].mxu1 }
 0x27b   : > { %v8390_v3 = vpop.f32.mrb[41].mxu1 }
 0x27c   : > { %v8395_v45 = vpop.f32.mrb[42].mxu1 }
 0x27d   : > { %v8403_v1 = vpop.f32.mrb[43].mxu1 }
 0x27f   : > { %4047 = vmatmul.mubr.bf16.gmra.mrb[104].mxu1 %v6679_v40 }
 0x280   : > { %4653 = vmatmul.mubr.bf16.gmra.mrb[64].mxu0 %v6680_v53  ;;  %4056 = vmatprep.mubr.bf16.mxu1 %v6681_v10  ;;  %v6697_v10 = vld [vmem:[%s8844_s1 + $0x920] ss:$40 sps:$4 sm:$0xff]  }
 0x281   : > { %4662 = vmatprep.mubr.bf16.mxu0 %v6683_v11 }
 0x282   : > { %v8408_v17 = vpop.f32.mrb[44].mxu1 }
 0x283   : > { %v8410_v22 = vpop.f32.mrb[45].mxu1 }
 0x284   : > { %v8415_v23 = vpop.f32.mrb[46].mxu1 }
 0x285   : > { %8849 = vst [vmem:[#allocation2_spill] sm:$0xff] %v8415_v23  ;;  %v8423_v63 = vpop.f32.mrb[47].mxu1 }
 0x286   : > { %8850 = vst [vmem:[#allocation3_spill] sm:$0xff] %v8423_v63 }
 0x287   : > { %4057 = vmatmul.mubr.bf16.gmra.mrb[108].mxu1 %v6685_v15  ;;  %v6698_v15 = vld [vmem:[%s8844_s1 + $0x610] ss:$40 sps:$4 sm:$0xff]  }
 0x288   : > { %4663 = vmatmul.mubr.bf16.gmra.mrb[68].mxu0 %v6686_v49  ;;  %4066 = vmatprep.mubr.bf16.mxu1 %v6687_v57  ;;  %v6699_v49 = vld [vmem:[%s8844_s1 + $0x974] ss:$40 sps:$4 sm:$0xff]  }
 0x289   : > { %4672 = vmatprep.mubr.bf16.mxu0 %v6689_v16  ;;  %v6701_v16 = vld [vmem:[%s8844_s1 + $0x664] ss:$40 sps:$4 sm:$0xff]  }
 0x28a   : > { %v8428_v52 = vpop.f32.mrb[48].mxu1 }
 0x28b   : > { %8851 = vst [vmem:[#allocation4_spill] sm:$0xff] %v8428_v52  ;;  %v8430_v2 = vpop.f32.mrb[49].mxu1 }
 0x28c   : > { %8852 = vst [vmem:[#allocation5_spill] sm:$0xff] %v8430_v2  ;;  %v8435_v42 = vpop.f32.mrb[50].mxu1 }
 0x28d   : > { %8853 = vst [vmem:[#allocation6_spill] sm:$0xff] %v8435_v42  ;;  %v8443_v19 = vpop.f32.mrb[51].mxu1 }
 0x28e   : > { %8854 = vst [vmem:[#allocation7_spill] sm:$0xff] %v8443_v19 }
 0x28f   : > { %4067 = vmatmul.mubr.bf16.gmra.mrb[112].mxu1 %v6691_v7 }
 0x290   : > { %4673 = vmatmul.mubr.bf16.gmra.mrb[72].mxu0 %v6692_v51  ;;  %4076 = vmatprep.mubr.bf16.mxu1 %v6693_v56  ;;  %v6703_v56 = vld [vmem:[%s8844_s1 + $0x970] ss:$40 sps:$4 sm:$0xff]  }
 0x291   : > { %4682 = vmatprep.mubr.bf16.mxu0 %v6695_v61 }
 0x292   : > { %v8448_v40 = vpop.f32.mrb[52].mxu1 }
 0x293   : > { %8855 = vst [vmem:[#allocation8_spill] sm:$0xff] %v8448_v40  ;;  %v8450_v53 = vpop.f32.mrb[53].mxu1 }
 0x294   : > { %8856 = vst [vmem:[#allocation9_spill] sm:$0xff] %v8450_v53  ;;  %v8455_v11 = vpop.f32.mrb[54].mxu1 }
 0x295   : > { %8857 = vst [vmem:[#allocation10_spill] sm:$0xff] %v8455_v11  ;;  %v8463_v57 = vpop.f32.mrb[55].mxu1 }
 0x296   : > { %8858 = vst [vmem:[#allocation11_spill] sm:$0xff] %v8463_v57  ;;  %v6704_v57 = vld [vmem:[%s8844_s1 + $0x660] ss:$40 sps:$4 sm:$0xff]  }
 0x297   : > { %4077 = vmatmul.mubr.bf16.gmra.mrb[116].mxu1 %v6697_v10  ;;  %v6705_v10 = vld [vmem:[%s8844_s1 + $0x9c4] ss:$40 sps:$4 sm:$0xff]  }
 0x298   : > { %4683 = vmatmul.mubr.bf16.gmra.mrb[76].mxu0 %v6698_v15  ;;  %4086 = vmatprep.mubr.bf16.mxu1 %v6699_v49  ;;  %v6707_v49 = vld [vmem:[%s8844_s1 + $0x6b4] ss:$40 sps:$4 sm:$0xff]  }
 0x299   : > { %4692 = vmatprep.mubr.bf16.mxu0 %v6701_v16 }
 0x29a   : > { %v8468_v7 = vpop.f32.mrb[56].mxu1 }
 0x29b   : > { %8859 = vst [vmem:[#allocation12_spill] sm:$0xff] %v8468_v7  ;;  %v8470_v51 = vpop.f32.mrb[57].mxu1 }
 0x29c   : > { %8860 = vst [vmem:[#allocation13_spill] sm:$0xff] %v8470_v51  ;;  %v8475_v61 = vpop.f32.mrb[58].mxu1  ;;  %v6709_v51 = vld [vmem:[%s8844_s1 + $0x9c0] ss:$40 sps:$4 sm:$0xff]  }
 0x29d   : > { %8861 = vst [vmem:[#allocation14_spill] sm:$0xff] %v8475_v61  ;;  %v8483_v15 = vpop.f32.mrb[59].mxu1 }
 0x29e   : > { %8862 = vst [vmem:[#allocation15_spill] sm:$0xff] %v8483_v15  ;;  %v6710_v15 = vld [vmem:[%s8844_s1 + $0x6b0] ss:$40 sps:$4 sm:$0xff]  }
 0x29f   : > { %4087 = vmatmul.mubr.bf16.gmra.mrb[120].mxu1 %v6703_v56 }
 0x2a0   : > { %4693 = vmatmul.mubr.bf16.gmra.mrb[80].mxu0 %v6704_v57  ;;  %4096 = vmatprep.mubr.bf16.mxu1 %v6705_v10  ;;  %v6711_v57 = vld [vmem:[%s8844_s1 + $0x704] ss:$40 sps:$4 sm:$0xff]  }
 0x2a1   : > { %4702 = vmatprep.mubr.bf16.mxu0 %v6707_v49 }
 0x2a2   : > { %v8488_v16 = vpop.f32.mrb[60].mxu1 }
 0x2a3   : > { %8863 = vst [vmem:[#allocation16_spill] sm:$0xff] %v8488_v16  ;;  %v8490_v61 = vpop.f32.mrb[61].mxu1 }
 0x2a4   : > { %8864 = vst [vmem:[#allocation17_spill] sm:$0xff] %v8490_v61  ;;  %v8495_v7 = vpop.f32.mrb[62].mxu1 }
 0x2a5   : > { %8865 = vst [vmem:[#allocation18_spill] sm:$0xff] %v8495_v7  ;;  %v8500_v11 = vpop.f32.mrb[63].mxu1  ;;  %v6713_v7 = vld [vmem:[%s8844_s1 + $0x700] ss:$40 sps:$4 sm:$0xff]  }
 0x2a6   : > { %8866 = vst [vmem:[#allocation19_spill] sm:$0xff] %v8500_v11  ;;  %v6714_v11 = vld [vmem:[%s8844_s1 + $0x754] ss:$40 sps:$4 sm:$0xff]  }
 0x2a7   : > { %4097 = vmatmul.mubr.bf16.gmra.mrb[124].mxu1 %v6709_v51 }
 0x2a8   : > { %4703 = vmatmul.mubr.bf16.gmra.mrb[84].mxu0 %v6710_v15 }
 0x2a9   : > { %4712 = vmatprep.mubr.bf16.mxu0 %v6711_v57 }
 0x2aa   : > { %v8505_v56 = vpop.f32.mrb[64].mxu1 }
 0x2ab   : > { %8867 = vst [vmem:[#allocation20_spill] sm:$0xff] %v8505_v56  ;;  %v8507_v10 = vpop.f32.mrb[65].mxu1 }
 0x2ac   : > { %8868 = vst [vmem:[#allocation21_spill] sm:$0xff] %v8507_v10  ;;  %v8509_v49 = vpop.f32.mrb[66].mxu1 }
 0x2ad   : > { %8869 = vst [vmem:[#allocation22_spill] sm:$0xff] %v8509_v49  ;;  %v8514_v61 = vpop.f32.mrb[67].mxu1  ;;  %v6716_v49 = vld [vmem:[%s8844_s1 + $0x750] ss:$40 sps:$4 sm:$0xff]  }
 0x2ae   : > { %8870 = vst [vmem:[#allocation23_spill] sm:$0xff] %v8514_v61  ;;  %v6717_v61 = vld [vmem:[%s8844_s1 + $0x7a4] ss:$40 sps:$4 sm:$0xff]  }
 0x2b0   : > { %4713 = vmatmul.mubr.bf16.gmra.mrb[88].mxu0 %v6713_v7 }
 0x2b1   : > { %4722 = vmatprep.mubr.bf16.mxu0 %v6714_v11 }
 0x2b2   : > { %v8519_v51 = vpop.f32.mrb[68].mxu1 }
 0x2b3   : > { %8871 = vst [vmem:[#allocation24_spill] sm:$0xff] %v8519_v51  ;;  %v8521_v15 = vpop.f32.mrb[69].mxu1 }
 0x2b4   : > { %8872 = vst [vmem:[#allocation25_spill] sm:$0xff] %v8521_v15  ;;  %v8523_v57 = vpop.f32.mrb[70].mxu1 }
 0x2b5   : > { %8873 = vst [vmem:[#allocation26_spill] sm:$0xff] %v8523_v57  ;;  %v8528_v10 = vpop.f32.mrb[71].mxu1  ;;  %v6719_v57 = vld [vmem:[%s8844_s1 + $0x7a0] ss:$40 sps:$4 sm:$0xff]  }
 0x2b6   : > { %8874 = vst [vmem:[#allocation27_spill] sm:$0xff] %v8528_v10  ;;  %v6720_v10 = vld [vmem:[%s8844_s1 + $0x7f4] ss:$40 sps:$4 sm:$0xff]  }
 0x2b8   : > { %4723 = vmatmul.mubr.bf16.gmra.mrb[92].mxu0 %v6716_v49 }
 0x2b9   : > { %4732 = vmatprep.mubr.bf16.mxu0 %v6717_v61 }
 0x2ba   : > { %v8533_v7 = vpop.f32.mrb[72].mxu1 }
 0x2bb   : > { %8875 = vst [vmem:[#allocation28_spill] sm:$0xff] %v8533_v7  ;;  %v8535_v11 = vpop.f32.mrb[73].mxu1 }
 0x2bc   : > { %8876 = vst [vmem:[#allocation29_spill] sm:$0xff] %v8535_v11  ;;  %v8537_v51 = vpop.f32.mrb[74].mxu1 }
 0x2bd   : > { %8877 = vst [vmem:[#allocation30_spill] sm:$0xff] %v8537_v51  ;;  %v8542_v15 = vpop.f32.mrb[75].mxu1  ;;  %v6722_v51 = vld [vmem:[%s8844_s1 + $0x7f0] ss:$40 sps:$4 sm:$0xff]  }
 0x2be   : > { %8878 = vst [vmem:[#allocation31_spill] sm:$0xff] %v8542_v15  ;;  %v6723_v15 = vld [vmem:[%s8844_s1 + $0x844] ss:$40 sps:$4 sm:$0xff]  }
 0x2c0   : > { %4733 = vmatmul.mubr.bf16.gmra.mrb[96].mxu0 %v6719_v57 }
 0x2c1   : > { %4742 = vmatprep.mubr.bf16.mxu0 %v6720_v10  ;;  %v1131_v10 = vpop.permute.xlu0 %1130 }
 0x2c2   : > { %v8547_v49 = vpop.f32.mrb[76].mxu1 }
 0x2c3   : > { %8879 = vst [vmem:[#allocation32_spill] sm:$0xff] %v8547_v49  ;;  %v8549_v61 = vpop.f32.mrb[77].mxu1 }
 0x2c4   : > { %8880 = vst [vmem:[#allocation33_spill] sm:$0xff] %v8549_v61  ;;  %v8551_v7 = vpop.f32.mrb[78].mxu1 }
 0x2c5   : > { %8881 = vst [vmem:[#allocation34_spill] sm:$0xff] %v8551_v7  ;;  %v8556_v11 = vpop.f32.mrb[79].mxu1  ;;  %v6725_v7 = vld [vmem:[%s8844_s1 + $0x840] ss:$40 sps:$4 sm:$0xff]  }
 0x2c6   : > { %8882 = vst [vmem:[#allocation35_spill] sm:$0xff] %v8556_v11  ;;  %v6726_v11 = vld [vmem:[%s8844_s1 + $0x894] ss:$40 sps:$4 sm:$0xff]  }
 0x2c8   : > { %4743 = vmatmul.mubr.bf16.gmra.mrb[100].mxu0 %v6722_v51  ;;  %v1136_v51 = vpop.permute.xlu0 %1135 }
 0x2c9   : > { %4752 = vmatprep.mubr.bf16.mxu0 %v6723_v15  ;;  %v5585_v15 = vadd.f32 %v8164_v24, %v1131_v10  ;;  %v5591_v19 = vadd.f32 %v8182_v31, %v1136_v51  ;;  %v6729_v24 = vld [vmem:[%s8844_s1 + $0x8e4] ss:$40 sps:$4 sm:$0xff]  }
 0x2ca   : > { %v8561_v57 = vpop.f32.mrb[80].mxu1 }
 0x2cb   : > { %8883 = vst [vmem:[#allocation36_spill] sm:$0xff] %v8561_v57  ;;  %v8563_v49 = vpop.f32.mrb[81].mxu1  ;;  %v5587_v57 = vadd.f32 %v8166_v29, %v1131_v10 }
 0x2cc   : > { %8884 = vst [vmem:[#allocation37_spill] sm:$0xff] %v8563_v49  ;;  %v8565_v61 = vpop.f32.mrb[82].mxu1  ;;  %v1141_v49 = vpop.permute.xlu1 %1140 }
 0x2cd   : > { %8885 = vst [vmem:[#allocation38_spill] sm:$0xff] %v8565_v61  ;;  %v8570_v56 = vpop.f32.mrb[83].mxu1  ;;  %v5589_v61 = vadd.f32 %v8174_v43, %v1136_v51  ;;  %v5593_v63 = vadd.f32 %v8196_v34, %v1141_v49  ;;  %v5595_v31 = vadd.f32 %v8198_v36, %v1141_v49  ;;  %v6732_v36 = vld [vmem:[%s8844_s1 + $0x934] ss:$40 sps:$4 sm:$0xff]  }
 0x2ce   : > { %8886 = vst [vmem:[#allocation39_spill] sm:$0xff] %v8570_v56  ;;  %v6728_v56 = vld [vmem:[%s8844_s1 + $0x890] ss:$40 sps:$4 sm:$0xff]  }
 0x2d0   : > { %4753 = vmatmul.mubr.bf16.gmra.mrb[104].mxu0 %v6725_v7  ;;  %v1146_v43 = vpop.permute.xlu1 %1145 }
 0x2d1   : > { %4762 = vmatprep.mubr.bf16.mxu0 %v6726_v11 }
 0x2d3   : > { %v4494_v16 = vpop.f32.mrb[0].mxu0 }
 0x2d4   : > { %v5586_v53 = vadd.f32 %v5585_v15, %v4494_v16  ;;  %v4496_v40 = vpop.f32.mrb[1].mxu0 }
 0x2d5   : > { %v5588_v42 = vadd.f32 %v5587_v57, %v4496_v40  ;;  %v4498_v7 = vpop.f32.mrb[2].mxu0 }
 0x2d6   : > { %v5590_v11 = vadd.f32 %v5589_v61, %v4498_v7  ;;  %v4500_v29 = vpop.f32.mrb[3].mxu0  ;;  %v4813_v2 = vmax.f32 %v5586_v53, 0.0  ;;  %v6743_v61 = vld [vmem:[%s8846_s3 + $0x4] ss:$16 sps:$4 sm:$0xff]  }
 0x2d7   : > { %v5592_v10 = vadd.f32 %v5591_v19, %v4500_v29  ;;  %v4814_v16 = vmax.f32 %v5588_v42, 0.0  ;;  %v5597_v19 = vadd.f32 %v8206_v46, %v1146_v43  ;;  %v6731_v42 = vld [vmem:[%s8844_s1 + $0x8e0] ss:$40 sps:$4 sm:$0xff]   ;;  %5073 = vmatprep.mubr.bf16.mxu1 %v6743_v61  ;;  %v1151_v46 = vpop.permute.xlu0 %1150  ;;  %v6734_v61 = vld [vmem:[%s8844_s1 + $0x930] ss:$40 sps:$4 sm:$0xff]  }
 0x2d8   : > { %v4815_v52 = vmax.f32 %v5590_v11, 0.0  ;;  %4763 = vmatmul.mubr.bf16.gmra.mrb[108].mxu0 %v6728_v56  ;;  %v5599_v56 = vadd.f32 %v8214_v39, %v1146_v43  ;;  %v1156_v11 = vpop.permute.xlu1 %1155  ;;  %v5601_v39 = vadd.f32 %v8225_v28, %v1151_v46  ;;  %v6735_v28 = vld [vmem:[%s8844_s1 + $0x984] ss:$40 sps:$4 sm:$0xff]  }
 0x2d9   : > { %v4816_v15 = vmax.f32 %v5592_v10, 0.0  ;;  %4772 = vmatprep.mubr.bf16.mxu0 %v6729_v24 }
 0x2da   : > { %v4945_v23 = vpack.c.bf16 %v4815_v52, %v4813_v2 }
 0x2db   : > { %v4946_v40 = vpack.c.bf16 %v4816_v15, %v4814_v16  ;;  %v4504_v57 = vpop.f32.mrb[4].mxu0  ;;  %v5603_v16 = vadd.f32 %v8227_v41, %v1151_v46 }
 0x2dc   : > { %v5594_v53 = vadd.f32 %v5593_v63, %v4504_v57  ;;  %v4506_v51 = vpop.f32.mrb[5].mxu0 }
 0x2dd   : > { %v5596_v34 = vadd.f32 %v5595_v31, %v4506_v51  ;;  %v4508_v52 = vpop.f32.mrb[6].mxu0  ;;  %5041 = vmatprep.subr.bf16.mxu1 %v4946_v40  ;;  %v5605_v40 = vadd.f32 %v8235_v44, %v1156_v11 }
 0x2de   : > { %v5598_v2 = vadd.f32 %v5597_v19, %v4508_v52  ;;  %v4510_v49 = vpop.f32.mrb[7].mxu0  ;;  %5042 = vmatpush1.bf16.msra.mxu1 %v4945_v23  ;;  %v4817_v7 = vmax.f32 %v5594_v53, 0.0  ;;  %v5607_v19 = vadd.f32 %v8243_v48, %v1156_v11 }
 0x2df   : > { %v5600_v63 = vadd.f32 %v5599_v56, %v4510_v49  ;;  %v4818_v29 = vmax.f32 %v5596_v34, 0.0  ;;  %v1161_v56 = vpop.permute.xlu0 %1160 }
 0x2e0   : > { %v4819_v24 = vmax.f32 %v5598_v2, 0.0  ;;  %4773 = vmatmul.mubr.bf16.gmra.mrb[112].mxu0 %v6731_v42  ;;  %v5609_v48 = vadd.f32 %v8248_v54, %v1161_v56  ;;  %v6738_v54 = vld [vmem:[%s8844_s1 + $0x9d4] ss:$40 sps:$4 sm:$0xff]  }
 0x2e1   : > { %v4820_v10 = vmax.f32 %v5600_v63, 0.0  ;;  %4782 = vmatprep.mubr.bf16.mxu0 %v6732_v36  ;;  %v1166_v36 = vpop.permute.xlu1 %1165  ;;  %v5611_v63 = vadd.f32 %v8250_v55, %v1161_v56 }
 0x2e2   : > { %v4947_v43 = vpack.c.bf16 %v4819_v24, %v4817_v7  ;;  %v5613_v11 = vadd.f32 %v8255_v14, %v1166_v36 }
 0x2e3   : > { %v4948_v15 = vpack.c.bf16 %v4820_v10, %v4818_v29  ;;  %v4514_v31 = vpop.f32.mrb[8].mxu0 }
 0x2e4   : > { %v5602_v57 = vadd.f32 %v5601_v39, %v4514_v31  ;;  %v4516_v23 = vpop.f32.mrb[9].mxu0  ;;  %v6737_v39 = vld [vmem:[%s8844_s1 + $0x980] ss:$40 sps:$4 sm:$0xff]  }
 0x2e5   : > { %v5604_v53 = vadd.f32 %v5603_v16, %v4516_v23  ;;  %v4518_v51 = vpop.f32.mrb[10].mxu0  ;;  %5043 = vmatprep.subr.bf16.mxu1 %v4948_v15 }
 0x2e6   : > { %v5606_v41 = vadd.f32 %v5605_v40, %v4518_v51  ;;  %v4520_v42 = vpop.f32.mrb[11].mxu0  ;;  %5044 = vmatpush1.bf16.msra.mxu1 %v4947_v43  ;;  %v4821_v34 = vmax.f32 %v5602_v57, 0.0  ;;  %v5615_v43 = vadd.f32 %v8263_v60, %v1166_v36  ;;  %v1171_v40 = vpop.permute.xlu0 %1170 }
 0x2e7   : > { %v5608_v44 = vadd.f32 %v5607_v19, %v4520_v42  ;;  %v4822_v2 = vmax.f32 %v5604_v53, 0.0  ;;  %v5617_v60 = vadd.f32 %v8268_v62, %v1171_v40 }
 0x2e8   : > { %v4823_v52 = vmax.f32 %v5606_v41, 0.0  ;;  %4783 = vmatmul.mubr.bf16.gmra.mrb[116].mxu0 %v6734_v61  ;;  %v1176_v61 = vpop.permute.xlu1 %1175 }
 0x2e9   : > { %v4824_v49 = vmax.f32 %v5608_v44, 0.0  ;;  %4792 = vmatprep.mubr.bf16.mxu0 %v6735_v28  ;;  %v5619_v28 = vadd.f32 %v8270_v0, %v1171_v40  ;;  %v5621_v56 = vadd.f32 %v8275_v32, %v1176_v61  ;;  %v5623_v36 = vadd.f32 %v8283_v9, %v1176_v61 }
 0x2ea   : > { %v4949_v46 = vpack.c.bf16 %v4823_v52, %v4821_v34  ;;  %v6740_v52 = vld [vmem:[%s8844_s1 + $0x9d0] ss:$40 sps:$4 sm:$0xff]  }
 0x2eb   : > { %v4950_v7 = vpack.c.bf16 %v4824_v49, %v4822_v2  ;;  %v4524_v24 = vpop.f32.mrb[12].mxu0 }
 0x2ec   : > { %v5610_v29 = vadd.f32 %v5609_v48, %v4524_v24  ;;  %v4526_v10 = vpop.f32.mrb[13].mxu0  ;;  %v1186_v32 = vpop.permute.xlu1 %1185 }
 0x2ed   : > { %v5612_v16 = vadd.f32 %v5611_v63, %v4526_v10  ;;  %v4528_v15 = vpop.f32.mrb[14].mxu0  ;;  %5045 = vmatprep.subr.bf16.mxu1 %v4950_v7 }
 0x2ee   : > { %v5614_v55 = vadd.f32 %v5613_v11, %v4528_v15  ;;  %v4530_v31 = vpop.f32.mrb[15].mxu0  ;;  %5046 = vmatpush1.bf16.msra.mxu1 %v4949_v46  ;;  %v4825_v57 = vmax.f32 %v5610_v29, 0.0  ;;  %v1181_v46 = vpop.permute.xlu0 %1180 }
 0x2ef   : > { %v5616_v14 = vadd.f32 %v5615_v43, %v4530_v31  ;;  %v4826_v19 = vmax.f32 %v5612_v16, 0.0  ;;  %v5625_v29 = vadd.f32 %v8288_v4, %v1181_v46  ;;  %v5629_v16 = vadd.f32 %v8295_v58, %v1186_v32 }
 0x2f0   : > { %v4827_v23 = vmax.f32 %v5614_v55, 0.0  ;;  %4793 = vmatmul.mubr.bf16.gmra.mrb[120].mxu0 %v6737_v39  ;;  %v5627_v39 = vadd.f32 %v8290_v5, %v1181_v46  ;;  %v5631_v55 = vadd.f32 %v8303_v6, %v1186_v32 }
 0x2f1   : > { %v4828_v53 = vmax.f32 %v5616_v14, 0.0  ;;  %4802 = vmatprep.mubr.bf16.mxu0 %v6738_v54 }
 0x2f2   : > { %v4951_v51 = vpack.c.bf16 %v4827_v23, %v4825_v57  ;;  %v1191_v23 = vpop.permute.xlu0 %1190 }
 0x2f3   : > { %v4952_v41 = vpack.c.bf16 %v4828_v53, %v4826_v19  ;;  %v4534_v42 = vpop.f32.mrb[16].mxu0  ;;  %v1196_v53 = vpop.permute.xlu1 %1195 }
 0x2f4   : > { %v5618_v44 = vadd.f32 %v5617_v60, %v4534_v42  ;;  %v4536_v34 = vpop.f32.mrb[17].mxu0  ;;  %v5637_v42 = vadd.f32 %v8315_v18, %v1196_v53 }
 0x2f5   : > { %v5620_v2 = vadd.f32 %v5619_v28, %v4536_v34  ;;  %v4538_v49 = vpop.f32.mrb[18].mxu0  ;;  %5047 = vmatprep.subr.bf16.mxu1 %v4952_v41  ;;  %v5635_v28 = vadd.f32 %v8310_v13, %v1191_v23  ;;  %v5639_v34 = vadd.f32 %v8323_v21, %v1196_v53 }
 0x2f6   : > { %v5622_v48 = vadd.f32 %v5621_v56, %v4538_v49  ;;  %v4540_v62 = vpop.f32.mrb[19].mxu0  ;;  %5048 = vmatpush1.bf16.msra.mxu1 %v4951_v51  ;;  %v4829_v63 = vmax.f32 %v5618_v44, 0.0  ;;  %v5633_v51 = vadd.f32 %v8308_v12, %v1191_v23 }
 0x2f7   : > { %v5624_v0 = vadd.f32 %v5623_v36, %v4540_v62  ;;  %v4830_v24 = vmax.f32 %v5620_v2, 0.0 }
 0x2f8   : > { %v4831_v7 = vmax.f32 %v5622_v48, 0.0  ;;  %4803 = vmatmul.mubr.bf16.gmra.mrb[124].mxu0 %v6740_v52  ;;  %v1201_v48 = vpop.permute.xlu0 %1200 }
 0x2f9   : > { %v4832_v11 = vmax.f32 %v5624_v0, 0.0  ;;  %v1206_v0 = vpop.permute.xlu1 %1205  ;;  %v5643_v32 = vadd.f32 %v8330_v26, %v1201_v48 }
 0x2fa   : > { %v4953_v10 = vpack.c.bf16 %v4831_v7, %v4829_v63  ;;  %v5641_v7 = vadd.f32 %v8328_v35, %v1201_v48 }
 0x2fb   : > { %v4954_v9 = vpack.c.bf16 %v4832_v11, %v4830_v24  ;;  %v4544_v43 = vpop.f32.mrb[20].mxu0  ;;  %v5645_v11 = vadd.f32 %v8335_v30, %v1206_v0 }
 0x2fc   : > { %v5626_v15 = vadd.f32 %v5625_v29, %v4544_v43  ;;  %v4546_v54 = vpop.f32.mrb[21].mxu0 }
 0x2fd   : > { %v5628_v31 = vadd.f32 %v5627_v39, %v4546_v54  ;;  %v4548_v40 = vpop.f32.mrb[22].mxu0  ;;  %5049 = vmatprep.subr.bf16.mxu1 %v4954_v9  ;;  %v5647_v39 = vadd.f32 %v8343_v8, %v1206_v0  ;;  %v1211_v54 = vpop.permute.xlu0 %1210 }
 0x2fe   : > { %v5630_v14 = vadd.f32 %v5629_v16, %v4548_v40  ;;  %v4550_v57 = vpop.f32.mrb[23].mxu0  ;;  %5050 = vmatpush1.bf16.msra.mxu1 %v4953_v10  ;;  %v4833_v4 = vmax.f32 %v5626_v15, 0.0  ;;  %v1216_v40 = vpop.permute.xlu1 %1215  ;;  %v5651_v23 = vadd.f32 %v8350_v33, %v1211_v54 }
 0x2ff   : > { %v5632_v61 = vadd.f32 %v5631_v55, %v4550_v57  ;;  %v4834_v5 = vmax.f32 %v5628_v31, 0.0  ;;  %v5649_v57 = vadd.f32 %v8348_v25, %v1211_v54 }
 0x300   : > { %v4835_v19 = vmax.f32 %v5630_v14, 0.0 }
 0x301   : > { %v4836_v60 = vmax.f32 %v5632_v61, 0.0 }
 0x302   : > { %v4955_v58 = vpack.c.bf16 %v4835_v19, %v4833_v4  ;;  %v5653_v4 = vadd.f32 %v8355_v38, %v1216_v40 }
 0x303   : > { %v4956_v41 = vpack.c.bf16 %v4836_v60, %v4834_v5  ;;  %v4554_v6 = vpop.f32.mrb[24].mxu0  ;;  %v5655_v5 = vadd.f32 %v8363_v20, %v1216_v40 }
 0x304   : > { %v5634_v56 = vadd.f32 %v5633_v51, %v4554_v6  ;;  %v4556_v44 = vpop.f32.mrb[25].mxu0 }
 0x305   : > { %v5636_v52 = vadd.f32 %v5635_v28, %v4556_v44  ;;  %v4558_v36 = vpop.f32.mrb[26].mxu0  ;;  %5051 = vmatprep.subr.bf16.mxu1 %v4956_v41  ;;  %v1221_v41 = vpop.permute.xlu0 %1220 }
 0x306   : > { %v5638_v2 = vadd.f32 %v5637_v42, %v4558_v36  ;;  %v4560_v49 = vpop.f32.mrb[27].mxu0  ;;  %5052 = vmatpush1.bf16.msra.mxu1 %v4955_v58  ;;  %v4837_v12 = vmax.f32 %v5634_v56, 0.0  ;;  %v1226_v56 = vpop.permute.xlu1 %1225 }
 0x307   : > { %v5640_v62 = vadd.f32 %v5639_v34, %v4560_v49  ;;  %v4838_v13 = vmax.f32 %v5636_v52, 0.0  ;;  %v5657_v34 = vadd.f32 %v8368_v37, %v1221_v41  ;;  %v5659_v52 = vadd.f32 %v8370_v47, %v1221_v41 }
 0x308   : > { %v4839_v46 = vmax.f32 %v5638_v2, 0.0  ;;  %v5661_v2 = vadd.f32 %v8375_v50, %v1226_v56 }
 0x309   : > { %v4840_v63 = vmax.f32 %v5640_v62, 0.0  ;;  %v5663_v62 = vadd.f32 %v8383_v59, %v1226_v56 }
 0x30a   : > { %v4957_v18 = vpack.c.bf16 %v4839_v46, %v4837_v12 }
 0x30b   : > { %v4958_v24 = vpack.c.bf16 %v4840_v63, %v4838_v13  ;;  %v4564_v21 = vpop.f32.mrb[28].mxu0  ;;  %v1231_v63 = vpop.permute.xlu0 %1230 }
 0x30c   : > { %v5642_v29 = vadd.f32 %v5641_v7, %v4564_v21  ;;  %v4566_v10 = vpop.f32.mrb[29].mxu0  ;;  %v5665_v21 = vadd.f32 %v8388_v27, %v1231_v63 }
 0x30d   : > { %v5644_v9 = vadd.f32 %v5643_v32, %v4566_v10  ;;  %v4568_v43 = vpop.f32.mrb[30].mxu0  ;;  %5053 = vmatprep.subr.bf16.mxu1 %v4958_v24  ;;  %v1236_v32 = vpop.permute.xlu1 %1235 }
 0x30e   : > { %v5646_v16 = vadd.f32 %v5645_v11, %v4568_v43  ;;  %v4570_v15 = vpop.f32.mrb[31].mxu0  ;;  %5054 = vmatpush1.bf16.msra.mxu1 %v4957_v18  ;;  %v4841_v35 = vmax.f32 %v5642_v29, 0.0  ;;  %v5667_v11 = vadd.f32 %v8390_v3, %v1231_v63  ;;  %v5669_v10 = vadd.f32 %v8395_v45, %v1236_v32 }
 0x30f   : > { %v5648_v55 = vadd.f32 %v5647_v39, %v4570_v15  ;;  %v4842_v26 = vmax.f32 %v5644_v9, 0.0  ;;  %v5671_v43 = vadd.f32 %v8403_v1, %v1236_v32 }
 0x310   : > { %v4843_v31 = vmax.f32 %v5646_v16, 0.0 }
 0x311   : > { %v4844_v14 = vmax.f32 %v5648_v55, 0.0 }
 0x312   : > { %v4959_v30 = vpack.c.bf16 %v4843_v31, %v4841_v35  ;;  %v1241_v35 = vpop.permute.xlu0 %1240 }
 0x313   : > { %v4960_v61 = vpack.c.bf16 %v4844_v14, %v4842_v26  ;;  %v4574_v8 = vpop.f32.mrb[32].mxu0  ;;  %v1246_v26 = vpop.permute.xlu1 %1245  ;;  %v5675_v1 = vadd.f32 %v8410_v22, %v1241_v35 }
 0x314   : > { %v5650_v19 = vadd.f32 %v5649_v57, %v4574_v8  ;;  %v4576_v53 = vpop.f32.mrb[33].mxu0  ;;  %v5673_v57 = vadd.f32 %v8408_v17, %v1241_v35 }
 0x315   : > { %v5652_v60 = vadd.f32 %v5651_v23, %v4576_v53  ;;  %v4578_v51 = vpop.f32.mrb[34].mxu0  ;;  %5055 = vmatprep.subr.bf16.mxu1 %v4960_v61 }
 0x316   : > { %v5654_v58 = vadd.f32 %v5653_v4, %v4578_v51  ;;  %v4580_v28 = vpop.f32.mrb[35].mxu0  ;;  %5056 = vmatpush1.bf16.msra.mxu1 %v4959_v30  ;;  %v4845_v25 = vmax.f32 %v5650_v19, 0.0  ;;  %v8887_v4 = vld [vmem:[#allocation2_spill] sm:$0xff]  ;;  %v8888_v51 = vld [vmem:[#allocation3_spill] sm:$0xff]  ;;  %v1251_v22 = vpop.permute.xlu0 %1250 }
 0x317   : > { %v5656_v6 = vadd.f32 %v5655_v5, %v4580_v28  ;;  %v4846_v33 = vmax.f32 %v5652_v60, 0.0  ;;  %v5677_v19 = vadd.f32 %v8887_v4, %v1246_v26 }
 0x318   : > { %v4847_v42 = vmax.f32 %v5654_v58, 0.0  ;;  %v5679_v58 = vadd.f32 %v8888_v51, %v1246_v26 }
 0x319   : > { %v4848_v44 = vmax.f32 %v5656_v6, 0.0 }
 0x31a   : > { %v4961_v38 = vpack.c.bf16 %v4847_v42, %v4845_v25 }
 0x31b   : > { %v4962_v36 = vpack.c.bf16 %v4848_v44, %v4846_v33  ;;  %v4584_v20 = vpop.f32.mrb[36].mxu0  ;;  %v1256_v44 = vpop.permute.xlu1 %1255 }
 0x31c   : > { %v5658_v49 = vadd.f32 %v5657_v34, %v4584_v20  ;;  %v4586_v48 = vpop.f32.mrb[37].mxu0 }
 0x31d   : > { %v5660_v12 = vadd.f32 %v5659_v52, %v4586_v48  ;;  %v4588_v46 = vpop.f32.mrb[38].mxu0  ;;  %5057 = vmatprep.subr.bf16.mxu1 %v4962_v36  ;;  %v8889_v52 = vld [vmem:[#allocation4_spill] sm:$0xff] }
 0x31e   : > { %v5662_v0 = vadd.f32 %v5661_v2, %v4588_v46  ;;  %v4590_v13 = vpop.f32.mrb[39].mxu0  ;;  %5058 = vmatpush1.bf16.msra.mxu1 %v4961_v38  ;;  %v4849_v37 = vmax.f32 %v5658_v49, 0.0  ;;  %v5681_v36 = vadd.f32 %v8889_v52, %v1251_v22  ;;  %v8890_v49 = vld [vmem:[#allocation5_spill] sm:$0xff] }
 0x31f   : > { %v5664_v7 = vadd.f32 %v5663_v62, %v4590_v13  ;;  %v4850_v47 = vmax.f32 %v5660_v12, 0.0  ;;  %v5683_v48 = vadd.f32 %v8890_v49, %v1251_v22  ;;  %v8898_v52 = vld [vmem:[#allocation13_spill] sm:$0xff] }
 0x320   : > { %v4851_v18 = vmax.f32 %v5662_v0, 0.0  ;;  %v8891_v0 = vld [vmem:[#allocation6_spill] sm:$0xff] }
 0x321   : > { %v4852_v24 = vmax.f32 %v5664_v7, 0.0  ;;  %v5685_v13 = vadd.f32 %v8891_v0, %v1256_v44 }
 0x322   : > { %v4963_v50 = vpack.c.bf16 %v4851_v18, %v4849_v37  ;;  %v8892_v18 = vld [vmem:[#allocation7_spill] sm:$0xff] }
 0x323   : > { %v4964_v29 = vpack.c.bf16 %v4852_v24, %v4850_v47  ;;  %v4594_v59 = vpop.f32.mrb[40].mxu0  ;;  %v5687_v32 = vadd.f32 %v8892_v18, %v1256_v44 }
 0x324   : > { %v5666_v39 = vadd.f32 %v5665_v21, %v4594_v59  ;;  %v4596_v9 = vpop.f32.mrb[41].mxu0 }
 0x325   : > { %v5668_v16 = vadd.f32 %v5667_v11, %v4596_v9  ;;  %v4598_v15 = vpop.f32.mrb[42].mxu0  ;;  %5059 = vmatprep.subr.bf16.mxu1 %v4964_v29  ;;  %v1261_v29 = vpop.permute.xlu0 %1260 }
 0x326   : > { %v5670_v54 = vadd.f32 %v5669_v10, %v4598_v15  ;;  %v4600_v55 = vpop.f32.mrb[43].mxu0  ;;  %5060 = vmatpush1.bf16.msra.mxu1 %v4963_v50  ;;  %v4853_v27 = vmax.f32 %v5666_v39, 0.0  ;;  %v1266_v9 = vpop.permute.xlu1 %1265  ;;  %v8893_v15 = vld [vmem:[#allocation8_spill] sm:$0xff] }
 0x327   : > { %v5672_v31 = vadd.f32 %v5671_v43, %v4600_v55  ;;  %v4854_v3 = vmax.f32 %v5668_v16, 0.0 }
 0x328   : > { %v4855_v40 = vmax.f32 %v5670_v54, 0.0  ;;  %v5689_v54 = vadd.f32 %v8893_v15, %v1261_v29  ;;  %v8901_v15 = vld [vmem:[#allocation16_spill] sm:$0xff] }
 0x329   : > { %v4856_v14 = vmax.f32 %v5672_v31, 0.0  ;;  %v8894_v31 = vld [vmem:[#allocation9_spill] sm:$0xff] }
 0x32a   : > { %v4965_v45 = vpack.c.bf16 %v4855_v40, %v4853_v27  ;;  %v8650_v30 = vpop.f32.mrb[84].mxu1  ;;  %v5691_v27 = vadd.f32 %v8894_v31, %v1261_v29  ;;  %v1276_v22 = vpop.permute.xlu1 %1275 }
 0x32b   : > { %v4966_v23 = vpack.c.bf16 %v4856_v14, %v4854_v3  ;;  %v4604_v61 = vpop.f32.mrb[44].mxu0  ;;  %v8653_v8 = vpop.f32.mrb[85].mxu1  ;;  %v8895_v14 = vld [vmem:[#allocation10_spill] sm:$0xff] }
 0x32c   : > { %v5674_v53 = vadd.f32 %v5673_v57, %v4604_v61  ;;  %v4606_v5 = vpop.f32.mrb[45].mxu0  ;;  %v8656_v60 = vpop.f32.mrb[86].mxu1  ;;  %v5693_v57 = vadd.f32 %v8895_v14, %v1266_v9  ;;  %v8896_v61 = vld [vmem:[#allocation11_spill] sm:$0xff] }
 0x32d   : > { %v5676_v28 = vadd.f32 %v5675_v1, %v4606_v5  ;;  %v4608_v41 = vpop.f32.mrb[46].mxu0  ;;  %5061 = vmatprep.subr.bf16.mxu1 %v4966_v23  ;;  %v8659_v17 = vpop.f32.mrb[87].mxu1  ;;  %v5695_v4 = vadd.f32 %v8896_v61, %v1266_v9 }
 0x32e   : > { %v5678_v6 = vadd.f32 %v5677_v19, %v4608_v41  ;;  %v4610_v25 = vpop.f32.mrb[47].mxu0  ;;  %5062 = vmatpush1.bf16.msra.mxu1 %v4965_v45  ;;  %v4857_v56 = vmax.f32 %v5674_v53, 0.0  ;;  %v1286_v9 = vpop.permute.xlu1 %1285 }
 0x32f   : > { %v5680_v42 = vadd.f32 %v5679_v58, %v4610_v25  ;;  %v4858_v34 = vmax.f32 %v5676_v28, 0.0  ;;  %v1271_v28 = vpop.permute.xlu0 %1270 }
 0x330   : > { %v4859_v33 = vmax.f32 %v5678_v6, 0.0 }
 0x331   : > { %v4860_v38 = vmax.f32 %v5680_v42, 0.0 }
 0x332   : > { %v4967_v20 = vpack.c.bf16 %v4859_v33, %v4857_v56  ;;  %v8662_v2 = vpop.f32.mrb[88].mxu1  ;;  %v8897_v33 = vld [vmem:[#allocation12_spill] sm:$0xff] }
 0x333   : > { %v4968_v62 = vpack.c.bf16 %v4860_v38, %v4858_v34  ;;  %v4614_v12 = vpop.f32.mrb[48].mxu0  ;;  %v8665_v46 = vpop.f32.mrb[89].mxu1  ;;  %v5697_v44 = vadd.f32 %v8897_v33, %v1271_v28 }
 0x334   : > { %v5682_v63 = vadd.f32 %v5681_v36, %v4614_v12  ;;  %v4616_v7 = vpop.f32.mrb[49].mxu0  ;;  %v8668_v37 = vpop.f32.mrb[90].mxu1  ;;  %v5699_v36 = vadd.f32 %v8898_v52, %v1271_v28 }
 0x335   : > { %v5684_v47 = vadd.f32 %v5683_v48, %v4616_v7  ;;  %v4618_v24 = vpop.f32.mrb[50].mxu0  ;;  %5063 = vmatprep.subr.bf16.mxu1 %v4968_v62  ;;  %v8671_v21 = vpop.f32.mrb[91].mxu1  ;;  %v8899_v62 = vld [vmem:[#allocation14_spill] sm:$0xff]  ;;  %v8900_v7 = vld [vmem:[#allocation15_spill] sm:$0xff] }
 0x336   : > { %v5686_v50 = vadd.f32 %v5685_v13, %v4618_v24  ;;  %v4620_v11 = vpop.f32.mrb[51].mxu0  ;;  %5064 = vmatpush1.bf16.msra.mxu1 %v4967_v20  ;;  %v4861_v10 = vmax.f32 %v5682_v63, 0.0  ;;  %v5701_v12 = vadd.f32 %v8899_v62, %v1276_v22  ;;  %v5703_v18 = vadd.f32 %v8900_v7, %v1276_v22  ;;  %v1281_v29 = vpop.permute.xlu0 %1280 }
 0x337   : > { %v5688_v59 = vadd.f32 %v5687_v32, %v4620_v11  ;;  %v4862_v43 = vmax.f32 %v5684_v47, 0.0 }
 0x338   : > { %v4863_v39 = vmax.f32 %v5686_v50, 0.0 }
 0x339   : > { %v4864_v16 = vmax.f32 %v5688_v59, 0.0 }
 0x33a   : > { %v4969_v55 = vpack.c.bf16 %v4863_v39, %v4861_v10  ;;  %v8674_v35 = vpop.f32.mrb[92].mxu1  ;;  %v1291_v22 = vpop.permute.xlu0 %1290 }
 0x33b   : > { %v4970_v40 = vpack.c.bf16 %v4864_v16, %v4862_v43  ;;  %v4624_v26 = vpop.f32.mrb[52].mxu0  ;;  %v8677_v3 = vpop.f32.mrb[93].mxu1 }
 0x33c   : > { %v5690_v45 = vadd.f32 %v5689_v54, %v4624_v26  ;;  %v4626_v1 = vpop.f32.mrb[53].mxu0  ;;  %v8680_v23 = vpop.f32.mrb[94].mxu1  ;;  %v5705_v54 = vadd.f32 %v8901_v15, %v1281_v29 }
 0x33d   : > { %v5692_v19 = vadd.f32 %v5691_v27, %v4626_v1  ;;  %v4628_v53 = vpop.f32.mrb[54].mxu0  ;;  %5065 = vmatprep.subr.bf16.mxu1 %v4970_v40  ;;  %v8683_v5 = vpop.f32.mrb[95].mxu1  ;;  %v8902_v27 = vld [vmem:[#allocation17_spill] sm:$0xff] }
 0x33e   : > { %v5694_v51 = vadd.f32 %v5693_v57, %v4628_v53  ;;  %v4630_v58 = vpop.f32.mrb[55].mxu0  ;;  %5066 = vmatpush1.bf16.msra.mxu1 %v4969_v55  ;;  %v4865_v6 = vmax.f32 %v5690_v45, 0.0  ;;  %v5707_v40 = vadd.f32 %v8902_v27, %v1281_v29  ;;  %v8903_v45 = vld [vmem:[#allocation18_spill] sm:$0xff]  ;;  %v8904_v53 = vld [vmem:[#allocation19_spill] sm:$0xff]  ;;  %v1301_v27 = vpop.permute.xlu0 %1300 }
 0x33f   : > { %v5696_v41 = vadd.f32 %v5695_v4, %v4630_v58  ;;  %v4866_v42 = vmax.f32 %v5692_v19, 0.0  ;;  %v5709_v1 = vadd.f32 %v8903_v45, %v1286_v9 }
 0x340   : > { %v4867_v25 = vmax.f32 %v5694_v51, 0.0  ;;  %v5711_v51 = vadd.f32 %v8904_v53, %v1286_v9 }
 0x341   : > { %v4868_v56 = vmax.f32 %v5696_v41, 0.0 }
 0x342   : > { %v4971_v34 = vpack.c.bf16 %v4867_v25, %v4865_v6  ;;  %v8686_v38 = vpop.f32.mrb[96].mxu1 }
 0x343   : > { %v4972_v20 = vpack.c.bf16 %v4868_v56, %v4866_v42  ;;  %v4634_v49 = vpop.f32.mrb[56].mxu0  ;;  %v8689_v48 = vpop.f32.mrb[97].mxu1 }
 0x344   : > { %v5698_v0 = vadd.f32 %v5697_v44, %v4634_v49  ;;  %v4636_v13 = vpop.f32.mrb[57].mxu0  ;;  %v8692_v63 = vpop.f32.mrb[98].mxu1 }
 0x345   : > { %v5700_v32 = vadd.f32 %v5699_v36, %v4636_v13  ;;  %v4638_v47 = vpop.f32.mrb[58].mxu0  ;;  %5067 = vmatprep.subr.bf16.mxu1 %v4972_v20  ;;  %v8695_v24 = vpop.f32.mrb[99].mxu1  ;;  %v8905_v36 = vld [vmem:[#allocation20_spill] sm:$0xff] }
 0x346   : > { %v5702_v50 = vadd.f32 %v5701_v12, %v4638_v47  ;;  %v4640_v11 = vpop.f32.mrb[59].mxu0  ;;  %5068 = vmatpush1.bf16.msra.mxu1 %v4971_v34  ;;  %v4869_v10 = vmax.f32 %v5698_v0, 0.0  ;;  %v1296_v44 = vpop.permute.xlu1 %1295  ;;  %v5713_v20 = vadd.f32 %v8905_v36, %v1291_v22  ;;  %v8906_v12 = vld [vmem:[#allocation21_spill] sm:$0xff]  ;;  %v8912_v36 = vld [vmem:[#allocation27_spill] sm:$0xff] }
 0x347   : > { %v5704_v59 = vadd.f32 %v5703_v18, %v4640_v11  ;;  %v4870_v43 = vmax.f32 %v5700_v32, 0.0  ;;  %v5715_v0 = vadd.f32 %v8906_v12, %v1291_v22  ;;  %v8907_v32 = vld [vmem:[#allocation22_spill] sm:$0xff] }
 0x348   : > { %v4871_v39 = vmax.f32 %v5702_v50, 0.0  ;;  %v5717_v47 = vadd.f32 %v8907_v32, %v1296_v44  ;;  %v1311_v32 = vpop.permute.xlu0 %1310 }
 0x349   : > { %v4872_v16 = vmax.f32 %v5704_v59, 0.0  ;;  %v8908_v59 = vld [vmem:[#allocation23_spill] sm:$0xff] }
 0x34a   : > { %v4973_v55 = vpack.c.bf16 %v4871_v39, %v4869_v10  ;;  %v8698_v31 = vpop.f32.mrb[100].mxu1  ;;  %v5719_v10 = vadd.f32 %v8908_v59, %v1296_v44  ;;  %v1306_v45 = vpop.permute.xlu1 %1305 }
 0x34b   : > { %v4974_v26 = vpack.c.bf16 %v4872_v16, %v4870_v43  ;;  %v4644_v14 = vpop.f32.mrb[60].mxu0  ;;  %v8701_v57 = vpop.f32.mrb[101].mxu1  ;;  %v6741_v16 = vld [vmem:[%s8846_s3] ss:$16 sps:$4 sm:$0xff]  }
 0x34c   : > { %v5706_v61 = vadd.f32 %v5705_v54, %v4644_v14  ;;  %v4646_v4 = vpop.f32.mrb[61].mxu0  ;;  %v8704_v19 = vpop.f32.mrb[102].mxu1 }
 0x34d   : > { %v5708_v58 = vadd.f32 %v5707_v40, %v4646_v4  ;;  %v4648_v28 = vpop.f32.mrb[62].mxu0  ;;  %5069 = vmatprep.subr.bf16.mxu1 %v4974_v26  ;;  %v8707_v41 = vpop.f32.mrb[103].mxu1  ;;  %v8909_v4 = vld [vmem:[#allocation24_spill] sm:$0xff] }
 0x34e   : > { %v5710_v6 = vadd.f32 %v5709_v1, %v4648_v28  ;;  %v4650_v25 = vpop.f32.mrb[63].mxu0  ;;  %5070 = vmatpush1.bf16.msra.mxu1 %v4973_v55  ;;  %v4873_v56 = vmax.f32 %v5706_v61, 0.0  ;;  %v6746_v55 = vld [vmem:[%s8846_s3 + $0xc] ss:$16 sps:$4 sm:$0xff]   ;;  %v5721_v53 = vadd.f32 %v8909_v4, %v1301_v27  ;;  %v1316_v59 = vpop.permute.xlu1 %1315 }
 0x34f   : > { %v5712_v42 = vadd.f32 %v5711_v51, %v4650_v25  ;;  %v4874_v34 = vmax.f32 %v5708_v58, 0.0  ;;  %v8910_v28 = vld [vmem:[#allocation25_spill] sm:$0xff] }
 0x350   : > { %v4875_v33 = vmax.f32 %v5710_v6, 0.0  ;;  %v5723_v6 = vadd.f32 %v8910_v28, %v1301_v27 }
 0x351   : > { %v4876_v52 = vmax.f32 %v5712_v42, 0.0 }
 0x352   : > { %v4975_v49 = vpack.c.bf16 %v4875_v33, %v4873_v56  ;;  %v8710_v62 = vpop.f32.mrb[104].mxu1  ;;  %v8911_v56 = vld [vmem:[#allocation26_spill] sm:$0xff] }
 0x353   : > { %v4976_v13 = vpack.c.bf16 %v4876_v52, %v4874_v34  ;;  %v4654_v7 = vpop.f32.mrb[64].mxu0  ;;  %v8713_v18 = vpop.f32.mrb[105].mxu1  ;;  %v5725_v33 = vadd.f32 %v8911_v56, %v1306_v45 }
 0x354   : > { %v5714_v50 = vadd.f32 %v5713_v20, %v4654_v7  ;;  %v4656_v11 = vpop.f32.mrb[65].mxu0  ;;  %v8716_v29 = vpop.f32.mrb[106].mxu1  ;;  %v5727_v20 = vadd.f32 %v8912_v36, %v1306_v45  ;;  %v8915_v45 = vld [vmem:[#allocation30_spill] sm:$0xff] }
 0x355   : > { %v5716_v39 = vadd.f32 %v5715_v0, %v4656_v11  ;;  %v4658_v9 = vpop.f32.mrb[66].mxu0  ;;  %5071 = vmatprep.subr.bf16.mxu1 %v4976_v13  ;;  %v8719_v43 = vpop.f32.mrb[107].mxu1 }
 0x356   : > { %v5718_v15 = vadd.f32 %v5717_v47, %v4658_v9  ;;  %v4660_v54 = vpop.f32.mrb[67].mxu0  ;;  %5072 = vmatpush1.bf16.msra.mxu1 %v4975_v49  ;;  %v4877_v26 = vmax.f32 %v5714_v50, 0.0  ;;  %v8913_v9 = vld [vmem:[#allocation28_spill] sm:$0xff] }
 0x357   : > { %v5720_v40 = vadd.f32 %v5719_v10, %v4660_v54  ;;  %v4878_v1 = vmax.f32 %v5716_v39, 0.0 }
 0x358   : > { %v4879_v14 = vmax.f32 %v5718_v15, 0.0 }
 0x359   : > { %v4880_v61 = vmax.f32 %v5720_v40, 0.0  ;;  %5074 = vmatmul.mubr.bf16.vlgmr.msra.gmra.mrb[128].mxu1 %v6741_v16  ;;  %v5729_v16 = vadd.f32 %v8913_v9, %v1311_v32 }
 0x35a   : > { %v4977_v51 = vpack.c.bf16 %v4879_v14, %v4877_v26  ;;  %v8728_v58 = vpop.f32.mrb[108].mxu1  ;;  %5116 = vmatprep.mubr.bf16.mxu1 %v6746_v55  ;;  %v8914_v55 = vld [vmem:[#allocation29_spill] sm:$0xff] }
 0x35b   : > { %v4978_v25 = vpack.c.bf16 %v4880_v61, %v4878_v1  ;;  %v4664_v22 = vpop.f32.mrb[68].mxu0  ;;  %v8731_v42 = vpop.f32.mrb[109].mxu1  ;;  %v5731_v27 = vadd.f32 %v8914_v55, %v1311_v32  ;;  %v5733_v1 = vadd.f32 %v8915_v45, %v1316_v59 }
 0x35c   : > { %v5722_v44 = vadd.f32 %v5721_v53, %v4664_v22  ;;  %v4666_v34 = vpop.f32.mrb[69].mxu0  ;;  %v8734_v52 = vpop.f32.mrb[110].mxu1 }
 0x35d   : > { %v5724_v49 = vadd.f32 %v5723_v6, %v4666_v34  ;;  %v4668_v12 = vpop.f32.mrb[70].mxu0  ;;  %5084 = vmatprep.subr.bf16.mxu1 %v4978_v25  ;;  %v8737_v0 = vpop.f32.mrb[111].mxu1 }
 0x35e   : > { %v5726_v13 = vadd.f32 %v5725_v33, %v4668_v12  ;;  %v4670_v7 = vpop.f32.mrb[71].mxu0  ;;  %5085 = vmatpush1.bf16.msra.mxu1 %v4977_v51  ;;  %v4881_v50 = vmax.f32 %v5722_v44, 0.0  ;;  %v8916_v51 = vld [vmem:[#allocation31_spill] sm:$0xff]  ;;  %v1321_v44 = vpop.permute.xlu0 %1320 }
 0x35f   : > { %v5728_v47 = vadd.f32 %v5727_v20, %v4670_v7  ;;  %v4882_v10 = vmax.f32 %v5724_v49, 0.0  ;;  %v5735_v28 = vadd.f32 %v8916_v51, %v1316_v59  ;;  %v1326_v49 = vpop.permute.xlu1 %1325  ;;  %v8917_v7 = vld [vmem:[#allocation32_spill] sm:$0xff] }
 0x360   : > { %v4883_v11 = vmax.f32 %v5726_v13, 0.0  ;;  %v5737_v32 = vadd.f32 %v8917_v7, %v1321_v44 }
 0x361   : > { %v4884_v39 = vmax.f32 %v5728_v47, 0.0 }
 0x362   : > { %v4979_v15 = vpack.c.bf16 %v4883_v11, %v4881_v50  ;;  %v8740_v54 = vpop.f32.mrb[112].mxu1  ;;  %v8918_v11 = vld [vmem:[#allocation33_spill] sm:$0xff] }
 0x363   : > { %v4980_v40 = vpack.c.bf16 %v4884_v39, %v4882_v10  ;;  %v4674_v26 = vpop.f32.mrb[72].mxu0  ;;  %v8743_v14 = vpop.f32.mrb[113].mxu1  ;;  %v5739_v59 = vadd.f32 %v8918_v11, %v1321_v44 }
 0x364   : > { %v5730_v61 = vadd.f32 %v5729_v16, %v4674_v26  ;;  %v4676_v4 = vpop.f32.mrb[73].mxu0  ;;  %v8746_v53 = vpop.f32.mrb[114].mxu1  ;;  %v8919_v16 = vld [vmem:[#allocation34_spill] sm:$0xff]  ;;  %v8920_v26 = vld [vmem:[#allocation35_spill] sm:$0xff] }
 0x365   : > { %v5732_v6 = vadd.f32 %v5731_v27, %v4676_v4  ;;  %v4678_v25 = vpop.f32.mrb[74].mxu0  ;;  %5086 = vmatprep.subr.bf16.mxu1 %v4980_v40  ;;  %v8749_v22 = vpop.f32.mrb[115].mxu1  ;;  %v5743_v45 = vadd.f32 %v8920_v26, %v1326_v49 }
 0x366   : > { %v5734_v56 = vadd.f32 %v5733_v1, %v4678_v25  ;;  %v4680_v33 = vpop.f32.mrb[75].mxu0  ;;  %5087 = vmatpush1.bf16.msra.mxu1 %v4979_v15  ;;  %v4885_v36 = vmax.f32 %v5730_v61, 0.0  ;;  %v5741_v15 = vadd.f32 %v8919_v16, %v1326_v49  ;;  %v1336_v44 = vpop.permute.xlu1 %1335  ;;  %v8922_v49 = vld [vmem:[#allocation37_spill] sm:$0xff] }
 0x367   : > { %v5736_v34 = vadd.f32 %v5735_v28, %v4680_v33  ;;  %v4886_v12 = vmax.f32 %v5732_v6, 0.0  ;;  %v1331_v6 = vpop.permute.xlu0 %1330 }
 0x368   : > { %v4887_v20 = vmax.f32 %v5734_v56, 0.0 }
 0x369   : > { %v4888_v13 = vmax.f32 %v5736_v34, 0.0 }
 0x36a   : > { %v4981_v47 = vpack.c.bf16 %v4887_v20, %v4885_v36  ;;  %v8752_v50 = vpop.f32.mrb[116].mxu1  ;;  %v8921_v20 = vld [vmem:[#allocation36_spill] sm:$0xff] }
 0x36b   : > { %v4982_v10 = vpack.c.bf16 %v4888_v13, %v4886_v12  ;;  %v4684_v39 = vpop.f32.mrb[76].mxu0  ;;  %v8755_v9 = vpop.f32.mrb[117].mxu1  ;;  %v5745_v12 = vadd.f32 %v8921_v20, %v1331_v6 }
 0x36c   : > { %v5738_v55 = vadd.f32 %v5737_v32, %v4684_v39  ;;  %v4686_v27 = vpop.f32.mrb[77].mxu0  ;;  %v8758_v40 = vpop.f32.mrb[118].mxu1  ;;  %v5747_v32 = vadd.f32 %v8922_v49, %v1331_v6  ;;  %v8923_v39 = vld [vmem:[#allocation38_spill] sm:$0xff] }
 0x36d   : > { %v5740_v1 = vadd.f32 %v5739_v59, %v4686_v27  ;;  %v4688_v61 = vpop.f32.mrb[78].mxu0  ;;  %5088 = vmatprep.subr.bf16.mxu1 %v4982_v10  ;;  %v8761_v4 = vpop.f32.mrb[119].mxu1  ;;  %v8924_v27 = vld [vmem:[#allocation39_spill] sm:$0xff] }
 0x36e   : > { %v5742_v51 = vadd.f32 %v5741_v15, %v4688_v61  ;;  %v4690_v28 = vpop.f32.mrb[79].mxu0  ;;  %5089 = vmatpush1.bf16.msra.mxu1 %v4981_v47  ;;  %v4889_v56 = vmax.f32 %v5738_v55, 0.0  ;;  %v5749_v47 = vadd.f32 %v8923_v39, %v1336_v44  ;;  %v5751_v26 = vadd.f32 %v8924_v27, %v1336_v44  ;;  %v1346_v20 = vpop.permute.xlu1 %1345 }
 0x36f   : > { %v5744_v25 = vadd.f32 %v5743_v45, %v4690_v28  ;;  %v4890_v34 = vmax.f32 %v5740_v1, 0.0  ;;  %v5759_v27 = vadd.f32 %v8659_v17, %v1346_v20 }
 0x370   : > { %v4891_v33 = vmax.f32 %v5742_v51, 0.0 }
 0x371   : > { %v4892_v36 = vmax.f32 %v5744_v25, 0.0 }
 0x372   : > { %v4983_v13 = vpack.c.bf16 %v4891_v33, %v4889_v56  ;;  %v8764_v7 = vpop.f32.mrb[120].mxu1  ;;  %v1341_v33 = vpop.permute.xlu0 %1340 }
 0x373   : > { %v4984_v11 = vpack.c.bf16 %v4892_v36, %v4890_v34  ;;  %v4694_v59 = vpop.f32.mrb[80].mxu0  ;;  %v8767_v10 = vpop.f32.mrb[121].mxu1  ;;  %v5755_v44 = vadd.f32 %v8653_v8, %v1341_v33 }
 0x374   : > { %v5746_v16 = vadd.f32 %v5745_v12, %v4694_v59  ;;  %v4696_v15 = vpop.f32.mrb[81].mxu0  ;;  %v8770_v55 = vpop.f32.mrb[122].mxu1  ;;  %v5753_v12 = vadd.f32 %v8650_v30, %v1341_v33 }
 0x375   : > { %v5748_v45 = vadd.f32 %v5747_v32, %v4696_v15  ;;  %v4698_v1 = vpop.f32.mrb[82].mxu0  ;;  %5090 = vmatprep.subr.bf16.mxu1 %v4984_v11  ;;  %v8773_v61 = vpop.f32.mrb[123].mxu1 }
 0x376   : > { %v5750_v51 = vadd.f32 %v5749_v47, %v4698_v1  ;;  %v4700_v28 = vpop.f32.mrb[83].mxu0  ;;  %5091 = vmatpush1.bf16.msra.mxu1 %v4983_v13  ;;  %v4893_v25 = vmax.f32 %v5746_v16, 0.0  ;;  %v5757_v13 = vadd.f32 %v8656_v60, %v1346_v20 }
 0x377   : > { %v5752_v6 = vadd.f32 %v5751_v26, %v4700_v28  ;;  %v4894_v34 = vmax.f32 %v5748_v45, 0.0 }
 0x378   : > { %v4895_v56 = vmax.f32 %v5750_v51, 0.0 }
 0x379   : > { %v4896_v36 = vmax.f32 %v5752_v6, 0.0 }
 0x37a   : > { %v4985_v49 = vpack.c.bf16 %v4895_v56, %v4893_v25  ;;  %v8776_v59 = vpop.f32.mrb[124].mxu1  ;;  %v1351_v25 = vpop.permute.xlu0 %1350 }
 0x37b   : > { %v4986_v32 = vpack.c.bf16 %v4896_v36, %v4894_v34  ;;  %v4704_v11 = vpop.f32.mrb[84].mxu0  ;;  %v8779_v39 = vpop.f32.mrb[125].mxu1  ;;  %v5761_v33 = vadd.f32 %v8662_v2, %v1351_v25  ;;  %v5763_v17 = vadd.f32 %v8665_v46, %v1351_v25 }
 0x37c   : > { %v5754_v47 = vadd.f32 %v5753_v12, %v4704_v11  ;;  %v4706_v16 = vpop.f32.mrb[85].mxu0  ;;  %v8782_v15 = vpop.f32.mrb[126].mxu1 }
 0x37d   : > { %v5756_v26 = vadd.f32 %v5755_v44, %v4706_v16  ;;  %v4708_v45 = vpop.f32.mrb[86].mxu0  ;;  %5092 = vmatprep.subr.bf16.mxu1 %v4986_v32  ;;  %v8785_v30 = vpop.f32.mrb[127].mxu1 }
 0x37e   : > { %v5758_v1 = vadd.f32 %v5757_v13, %v4708_v45  ;;  %v4710_v51 = vpop.f32.mrb[87].mxu0  ;;  %5093 = vmatpush1.bf16.msra.mxu1 %v4985_v49  ;;  %v4897_v28 = vmax.f32 %v5754_v47, 0.0  ;;  %v1356_v36 = vpop.permute.xlu1 %1355 }
 0x37f   : > { %v5760_v8 = vadd.f32 %v5759_v27, %v4710_v51  ;;  %v4898_v56 = vmax.f32 %v5756_v26, 0.0  ;;  %v5765_v44 = vadd.f32 %v8668_v37, %v1356_v36  ;;  %v5767_v49 = vadd.f32 %v8671_v21, %v1356_v36 }
 0x380   : > { %v4899_v6 = vmax.f32 %v5758_v1, 0.0  ;;  %v1361_v1 = vpop.permute.xlu0 %1360 }
 0x381   : > { %v4900_v60 = vmax.f32 %v5760_v8, 0.0  ;;  %v5769_v8 = vadd.f32 %v8674_v35, %v1361_v1 }
 0x382   : > { %v4987_v34 = vpack.c.bf16 %v4899_v6, %v4897_v28  ;;  %v1366_v37 = vpop.permute.xlu1 %1365  ;;  %v5771_v6 = vadd.f32 %v8677_v3, %v1361_v1 }
 0x383   : > { %v4988_v20 = vpack.c.bf16 %v4900_v60, %v4898_v56  ;;  %v4714_v12 = vpop.f32.mrb[88].mxu0  ;;  %v5773_v56 = vadd.f32 %v8680_v23, %v1366_v37 }
 0x384   : > { %v5762_v32 = vadd.f32 %v5761_v33, %v4714_v12  ;;  %v4716_v11 = vpop.f32.mrb[89].mxu0 }
 0x385   : > { %v5764_v13 = vadd.f32 %v5763_v17, %v4716_v11  ;;  %v4718_v47 = vpop.f32.mrb[90].mxu0  ;;  %5094 = vmatprep.subr.bf16.mxu1 %v4988_v20  ;;  %v1371_v11 = vpop.permute.xlu0 %1370 }
 0x386   : > { %v5766_v16 = vadd.f32 %v5765_v44, %v4718_v47  ;;  %v4720_v27 = vpop.f32.mrb[91].mxu0  ;;  %5095 = vmatpush1.bf16.msra.mxu1 %v4987_v34  ;;  %v4901_v2 = vmax.f32 %v5762_v32, 0.0  ;;  %v5775_v34 = vadd.f32 %v8683_v5, %v1366_v37  ;;  %v1376_v23 = vpop.permute.xlu1 %1375 }
 0x387   : > { %v5768_v26 = vadd.f32 %v5767_v49, %v4720_v27  ;;  %v4902_v51 = vmax.f32 %v5764_v13, 0.0  ;;  %v5777_v13 = vadd.f32 %v8686_v38, %v1371_v11  ;;  %v5783_v1 = vadd.f32 %v8695_v24, %v1376_v23 }
 0x388   : > { %v4903_v45 = vmax.f32 %v5766_v16, 0.0  ;;  %v5779_v16 = vadd.f32 %v8689_v48, %v1371_v11 }
 0x389   : > { %v4904_v46 = vmax.f32 %v5768_v26, 0.0  ;;  %v5781_v26 = vadd.f32 %v8692_v63, %v1376_v23 }
 0x38a   : > { %v4989_v28 = vpack.c.bf16 %v4903_v45, %v4901_v2  ;;  %v1386_v63 = vpop.permute.xlu1 %1385 }
 0x38b   : > { %v4990_v25 = vpack.c.bf16 %v4904_v46, %v4902_v51  ;;  %v4724_v21 = vpop.f32.mrb[92].mxu0 }
 0x38c   : > { %v5770_v60 = vadd.f32 %v5769_v8, %v4724_v21  ;;  %v4726_v33 = vpop.f32.mrb[93].mxu0 }
 0x38d   : > { %v5772_v36 = vadd.f32 %v5771_v6, %v4726_v33  ;;  %v4728_v17 = vpop.f32.mrb[94].mxu0  ;;  %5096 = vmatprep.subr.bf16.mxu1 %v4990_v25  ;;  %v1381_v25 = vpop.permute.xlu0 %1380 }
 0x38e   : > { %v5774_v20 = vadd.f32 %v5773_v56, %v4728_v17  ;;  %v4730_v12 = vpop.f32.mrb[95].mxu0  ;;  %5097 = vmatpush1.bf16.msra.mxu1 %v4989_v28  ;;  %v4905_v35 = vmax.f32 %v5770_v60, 0.0  ;;  %v5785_v56 = vadd.f32 %v8698_v31, %v1381_v25  ;;  %v5787_v33 = vadd.f32 %v8701_v57, %v1381_v25 }
 0x38f   : > { %v5776_v44 = vadd.f32 %v5775_v34, %v4730_v12  ;;  %v4906_v49 = vmax.f32 %v5772_v36, 0.0  ;;  %v5789_v36 = vadd.f32 %v8704_v19, %v1386_v63  ;;  %v5791_v12 = vadd.f32 %v8707_v41, %v1386_v63  ;;  %v1396_v19 = vpop.permute.xlu1 %1395 }
 0x390   : > { %v4907_v32 = vmax.f32 %v5774_v20, 0.0 }
 0x391   : > { %v4908_v3 = vmax.f32 %v5776_v44, 0.0 }
 0x392   : > { %v4991_v47 = vpack.c.bf16 %v4907_v32, %v4905_v35 }
 0x393   : > { %v4992_v27 = vpack.c.bf16 %v4908_v3, %v4906_v49  ;;  %v4734_v5 = vpop.f32.mrb[96].mxu0 }
 0x394   : > { %v5778_v2 = vadd.f32 %v5777_v13, %v4734_v5  ;;  %v4736_v45 = vpop.f32.mrb[97].mxu0  ;;  %v1391_v13 = vpop.permute.xlu0 %1390 }
 0x395   : > { %v5780_v51 = vadd.f32 %v5779_v16, %v4736_v45  ;;  %v4738_v46 = vpop.f32.mrb[98].mxu0  ;;  %5098 = vmatprep.subr.bf16.mxu1 %v4992_v27  ;;  %v5793_v23 = vadd.f32 %v8710_v62, %v1391_v13  ;;  %v5795_v27 = vadd.f32 %v8713_v18, %v1391_v13 }
 0x396   : > { %v5782_v8 = vadd.f32 %v5781_v26, %v4738_v46  ;;  %v4740_v28 = vpop.f32.mrb[99].mxu0  ;;  %5099 = vmatpush1.bf16.msra.mxu1 %v4991_v47  ;;  %v4909_v38 = vmax.f32 %v5778_v2, 0.0  ;;  %v5797_v26 = vadd.f32 %v8716_v29, %v1396_v19  ;;  %v1406_v29 = vpop.permute.xlu1 %1405 }
 0x397   : > { %v5784_v37 = vadd.f32 %v5783_v1, %v4740_v28  ;;  %v4910_v21 = vmax.f32 %v5780_v51, 0.0  ;;  %v5799_v1 = vadd.f32 %v8719_v43, %v1396_v19  ;;  %v5805_v63 = vadd.f32 %v8734_v52, %v1406_v29 }
 0x398   : > { %v4911_v6 = vmax.f32 %v5782_v8, 0.0 }
 0x399   : > { %v4912_v48 = vmax.f32 %v5784_v37, 0.0 }
 0x39a   : > { %v4993_v60 = vpack.c.bf16 %v4911_v6, %v4909_v38  ;;  %v1401_v6 = vpop.permute.xlu0 %1400  ;;  %v1416_v52 = vpop.permute.xlu1 %1415 }
 0x39b   : > { %v4994_v34 = vpack.c.bf16 %v4912_v48, %v4910_v21  ;;  %v4744_v24 = vpop.f32.mrb[100].mxu0  ;;  %v5801_v21 = vadd.f32 %v8728_v58, %v1401_v6 }
 0x39c   : > { %v5786_v17 = vadd.f32 %v5785_v56, %v4744_v24  ;;  %v4746_v20 = vpop.f32.mrb[101].mxu0  ;;  %v5803_v56 = vadd.f32 %v8731_v42, %v1401_v6  ;;  %v5807_v24 = vadd.f32 %v8737_v0, %v1406_v29 }
 0x39d   : > { %v5788_v44 = vadd.f32 %v5787_v33, %v4746_v20  ;;  %v4748_v35 = vpop.f32.mrb[102].mxu0  ;;  %5100 = vmatprep.subr.bf16.mxu1 %v4994_v34 }
 0x39e   : > { %v5790_v32 = vadd.f32 %v5789_v36, %v4748_v35  ;;  %v4750_v11 = vpop.f32.mrb[103].mxu0  ;;  %5101 = vmatpush1.bf16.msra.mxu1 %v4993_v60  ;;  %v4913_v31 = vmax.f32 %v5786_v17, 0.0 }
 0x39f   : > { %v5792_v49 = vadd.f32 %v5791_v12, %v4750_v11  ;;  %v4914_v47 = vmax.f32 %v5788_v44, 0.0 }
 0x3a0   : > { %v4915_v3 = vmax.f32 %v5790_v32, 0.0  ;;  %v1411_v32 = vpop.permute.xlu0 %1410 }
 0x3a1   : > { %v4916_v57 = vmax.f32 %v5792_v49, 0.0  ;;  %v5809_v49 = vadd.f32 %v8740_v54, %v1411_v32 }
 0x3a2   : > { %v4995_v16 = vpack.c.bf16 %v4915_v3, %v4913_v31  ;;  %v5811_v3 = vadd.f32 %v8743_v14, %v1411_v32 }
 0x3a3   : > { %v4996_v5 = vpack.c.bf16 %v4916_v57, %v4914_v47  ;;  %v4754_v41 = vpop.f32.mrb[104].mxu0  ;;  %v5813_v47 = vadd.f32 %v8746_v53, %v1416_v52  ;;  %v1426_v53 = vpop.permute.xlu1 %1425 }
 0x3a4   : > { %v5794_v2 = vadd.f32 %v5793_v23, %v4754_v41  ;;  %v4756_v45 = vpop.f32.mrb[105].mxu0  ;;  %v5823_v6 = vadd.f32 %v8761_v4, %v1426_v53 }
 0x3a5   : > { %v5796_v51 = vadd.f32 %v5795_v27, %v4756_v45  ;;  %v4758_v46 = vpop.f32.mrb[106].mxu0  ;;  %5102 = vmatprep.subr.bf16.mxu1 %v4996_v5  ;;  %v1421_v45 = vpop.permute.xlu0 %1420 }
 0x3a6   : > { %v5798_v8 = vadd.f32 %v5797_v26, %v4758_v46  ;;  %v4760_v28 = vpop.f32.mrb[107].mxu0  ;;  %5103 = vmatpush1.bf16.msra.mxu1 %v4995_v16  ;;  %v4917_v62 = vmax.f32 %v5794_v2, 0.0  ;;  %v5815_v16 = vadd.f32 %v8749_v22, %v1416_v52 }
 0x3a7   : > { %v5800_v37 = vadd.f32 %v5799_v1, %v4760_v28  ;;  %v4918_v25 = vmax.f32 %v5796_v51, 0.0  ;;  %v5817_v51 = vadd.f32 %v8752_v50, %v1421_v45 }
 0x3a8   : > { %v4919_v38 = vmax.f32 %v5798_v8, 0.0  ;;  %v5819_v8 = vadd.f32 %v8755_v9, %v1421_v45 }
 0x3a9   : > { %v4920_v18 = vmax.f32 %v5800_v37, 0.0  ;;  %v5821_v37 = vadd.f32 %v8758_v40, %v1426_v53  ;;  %v1436_v40 = vpop.permute.xlu1 %1435 }
 0x3aa   : > { %v4997_v48 = vpack.c.bf16 %v4919_v38, %v4917_v62 }
 0x3ab   : > { %v4998_v60 = vpack.c.bf16 %v4920_v18, %v4918_v25  ;;  %v4764_v43 = vpop.f32.mrb[108].mxu0 }
 0x3ac   : > { %v5802_v33 = vadd.f32 %v5801_v21, %v4764_v43  ;;  %v4766_v34 = vpop.f32.mrb[109].mxu0 }
 0x3ad   : > { %v5804_v36 = vadd.f32 %v5803_v56, %v4766_v34  ;;  %v4768_v17 = vpop.f32.mrb[110].mxu0  ;;  %5104 = vmatprep.subr.bf16.mxu1 %v4998_v60  ;;  %v1431_v60 = vpop.permute.xlu0 %1430 }
 0x3ae   : > { %v5806_v20 = vadd.f32 %v5805_v63, %v4768_v17  ;;  %v4770_v12 = vpop.f32.mrb[111].mxu0  ;;  %5105 = vmatpush1.bf16.msra.mxu1 %v4997_v48  ;;  %v4921_v58 = vmax.f32 %v5802_v33, 0.0  ;;  %v5825_v63 = vadd.f32 %v8764_v7, %v1431_v60  ;;  %v5827_v34 = vadd.f32 %v8767_v10, %v1431_v60 }
 0x3af   : > { %v5808_v44 = vadd.f32 %v5807_v24, %v4770_v12  ;;  %v4922_v11 = vmax.f32 %v5804_v36, 0.0  ;;  %v5829_v36 = vadd.f32 %v8770_v55, %v1436_v40  ;;  %v5831_v12 = vadd.f32 %v8773_v61, %v1436_v40  ;;  %v1446_v55 = vpop.permute.xlu1 %1445 }
 0x3b0   : > { %v4923_v35 = vmax.f32 %v5806_v20, 0.0 }
 0x3b1   : > { %v4924_v42 = vmax.f32 %v5808_v44, 0.0 }
 0x3b2   : > { %v4999_v31 = vpack.c.bf16 %v4923_v35, %v4921_v58 }
 0x3b3   : > { %v5000_v13 = vpack.c.bf16 %v4924_v42, %v4922_v11  ;;  %v4774_v0 = vpop.f32.mrb[112].mxu0  ;;  %v5019_v53 = vpop.permute.xlu1 %5018 }
 0x3b4   : > { %v5810_v57 = vadd.f32 %v5809_v49, %v4774_v0  ;;  %v4776_v23 = vpop.f32.mrb[113].mxu0  ;;  %v1441_v49 = vpop.permute.xlu0 %1440 }
 0x3b5   : > { %v5812_v19 = vadd.f32 %v5811_v3, %v4776_v23  ;;  %v4778_v27 = vpop.f32.mrb[114].mxu0  ;;  %5106 = vmatprep.subr.bf16.mxu1 %v5000_v13  ;;  %v5833_v52 = vadd.f32 %v8776_v59, %v1441_v49  ;;  %v5835_v13 = vadd.f32 %v8779_v39, %v1441_v49 }
 0x3b6   : > { %v5814_v5 = vadd.f32 %v5813_v47, %v4778_v27  ;;  %v4780_v41 = vpop.f32.mrb[115].mxu0  ;;  %5107 = vmatpush1.bf16.msra.mxu1 %v4999_v31  ;;  %v4925_v54 = vmax.f32 %v5810_v57, 0.0  ;;  %v5837_v47 = vadd.f32 %v8782_v15, %v1446_v55  ;;  %v6744_v15 = vld [vmem:[%s8846_s3 + $0x8] ss:$16 sps:$4 sm:$0xff]  }
 0x3b7   : > { %v5816_v26 = vadd.f32 %v5815_v16, %v4780_v41  ;;  %v4926_v1 = vmax.f32 %v5812_v19, 0.0  ;;  %v5839_v16 = vadd.f32 %v8785_v30, %v1446_v55 }
 0x3b8   : > { %v4927_v2 = vmax.f32 %v5814_v5, 0.0  ;;  %v5014_v30 = vpop.permute.xlu0 %5013 }
 0x3b9   : > { %v4928_v14 = vmax.f32 %v5816_v26, 0.0 }
 0x3ba   : > { %v5001_v46 = vpack.c.bf16 %v4927_v2, %v4925_v54 }
 0x3bb   : > { %v5002_v28 = vpack.c.bf16 %v4928_v14, %v4926_v1  ;;  %v4784_v22 = vpop.f32.mrb[116].mxu0 }
 0x3bc   : > { %v5818_v62 = vadd.f32 %v5817_v51, %v4784_v22  ;;  %v4786_v38 = vpop.f32.mrb[117].mxu0 }
 0x3bd   : > { %v5820_v25 = vadd.f32 %v5819_v8, %v4786_v38  ;;  %v4788_v18 = vpop.f32.mrb[118].mxu0  ;;  %5108 = vmatprep.subr.bf16.mxu1 %v5002_v28 }
 0x3be   : > { %v5822_v21 = vadd.f32 %v5821_v37, %v4788_v18  ;;  %v4790_v48 = vpop.f32.mrb[119].mxu0  ;;  %5109 = vmatpush1.bf16.msra.mxu1 %v5001_v46  ;;  %v4929_v50 = vmax.f32 %v5818_v62, 0.0 }
 0x3bf   : > { %v5824_v29 = vadd.f32 %v5823_v6, %v4790_v48  ;;  %v4930_v43 = vmax.f32 %v5820_v25, 0.0 }
 0x3c0   : > { %v4931_v56 = vmax.f32 %v5822_v21, 0.0 }
 0x3c1   : > { %v4932_v9 = vmax.f32 %v5824_v29, 0.0 }
 0x3c2   : > { %v5003_v33 = vpack.c.bf16 %v4931_v56, %v4929_v50 }
 0x3c3   : > { %v5004_v24 = vpack.c.bf16 %v4932_v9, %v4930_v43  ;;  %v4794_v4 = vpop.f32.mrb[120].mxu0 }
 0x3c4   : > { %v5826_v17 = vadd.f32 %v5825_v63, %v4794_v4  ;;  %v4796_v20 = vpop.f32.mrb[121].mxu0 }
 0x3c5   : > { %v5828_v44 = vadd.f32 %v5827_v34, %v4796_v20  ;;  %v4798_v58 = vpop.f32.mrb[122].mxu0  ;;  %5110 = vmatprep.subr.bf16.mxu1 %v5004_v24 }
 0x3c6   : > { %v5830_v35 = vadd.f32 %v5829_v36, %v4798_v58  ;;  %v4800_v32 = vpop.f32.mrb[123].mxu0  ;;  %5111 = vmatpush1.bf16.msra.mxu1 %v5003_v33  ;;  %v4933_v7 = vmax.f32 %v5826_v17, 0.0 }
 0x3c7   : > { %v5832_v11 = vadd.f32 %v5831_v12, %v4800_v32  ;;  %v4934_v31 = vmax.f32 %v5828_v44, 0.0 }
 0x3c8   : > { %v4935_v42 = vmax.f32 %v5830_v35, 0.0 }
 0x3c9   : > { %v4936_v10 = vmax.f32 %v5832_v11, 0.0 }
 0x3ca   : > { %v5005_v3 = vpack.c.bf16 %v4935_v42, %v4933_v7 }
 0x3cb   : > { %v5006_v0 = vpack.c.bf16 %v4936_v10, %v4934_v31  ;;  %v4804_v61 = vpop.f32.mrb[124].mxu0 }
 0x3cc   : > { %v5834_v57 = vadd.f32 %v5833_v52, %v4804_v61  ;;  %v4806_v23 = vpop.f32.mrb[125].mxu0 }
 0x3cd   : > { %v5836_v19 = vadd.f32 %v5835_v13, %v4806_v23  ;;  %v4808_v27 = vpop.f32.mrb[126].mxu0  ;;  %5112 = vmatprep.subr.bf16.mxu1 %v5006_v0 }
 0x3ce   : > { %v5838_v5 = vadd.f32 %v5837_v47, %v4808_v27  ;;  %v4810_v41 = vpop.f32.mrb[127].mxu0  ;;  %5113 = vmatpush1.bf16.msra.mxu1 %v5005_v3  ;;  %v4937_v26 = vmax.f32 %v5834_v57, 0.0 }
 0x3cf   : > { %v5840_v59 = vadd.f32 %v5839_v16, %v4810_v41  ;;  %v4938_v2 = vmax.f32 %v5836_v19, 0.0 }
 0x3d0   : > { %v4939_v54 = vmax.f32 %v5838_v5, 0.0 }
 0x3d1   : > { %v4940_v39 = vmax.f32 %v5840_v59, 0.0 }
 0x3d2   : > { %v5007_v45 = vpack.c.bf16 %v4939_v54, %v4937_v26 }
 0x3d3   : > { %v5008_v1 = vpack.c.bf16 %v4940_v39, %v4938_v2 }
 0x3d5   : > { %5114 = vmatprep.subr.bf16.mxu1 %v5008_v1 }
 0x3d6   : > { %5115 = vmatpush1.bf16.msra.mxu1 %v5007_v45 }
 0x3d9   : > { %5117 = vmatmul.mubr.bf16.vlgmr.msra.gmra.mrb[128].mxu1 %v6744_v15 }
 0x4ac   : > { %v5118_v14 = vpop.f32.mrb[128].mxu1 }
 0x4ad   : > { %v5841_v51 = vadd.f32 %v5118_v14, %v5014_v30  ;;  %v5120_v46 = vpop.f32.mrb[129].mxu1 }
 0x4ae   : > { %v5842_v8 = vadd.f32 %v5120_v46, %v5014_v30  ;;  %v5122_v28 = vpop.f32.mrb[130].mxu1 }
 0x4af   : > { %5127 = vst [vmem:[%s262_s26] sm:$0xff] %v5841_v51  ;;  %v5843_v22 = vadd.f32 %v5122_v28, %v5019_v53  ;;  %v5124_v37 = vpop.f32.mrb[131].mxu1 }
 0x4b0   : > { %5128 = vst [vmem:[%s262_s26 + $0x8] sm:$0xff] %v5842_v8  ;;  %v5844_v62 = vadd.f32 %v5124_v37, %v5019_v53 }
 0x4b1   : > { %5129 = vst [vmem:[%s262_s26 + $0x10] sm:$0xff] %v5843_v22 }
 0x4b2   : > { %5130 = vst [vmem:[%s262_s26 + $0x18] sm:$0xff] %v5844_v62 }
 0x4b3 PF: > { %s15_s20 = sadd.s32 1, %s6769_s20   ;;  %s8925_s18 = smov %s6765_s19 }
 0x4b4   : > { %p12_p5 = scmp.ge.s32.totalorder %s15_s20, 4   ;;  %s8926_s19 = smov %s8928_s21 }
 0x4b6   :  { %14 = sbr.rel (!%p12_p5) target bundleno = 2 (0x2), region = 70 }

</bundles_post_ra>
